<compile_context>
chip_gen: v7x
topology: tpu7x:2x2x1
jax: 0.10.0
libtpu: 0.0.40
codegen_flags: <defaults>
</compile_context>

<pallas_src>
import jax
import jax.numpy as jnp
import numpy as np
from jax import lax
from jax.experimental import pallas as pl
from jax.experimental.pallas import tpu as pltpu

KSIZE = 7
PAD = 3


def pixel_attention_kernel(x_ref, p_ref, w_ref, b_ref, o_ref, xp_ref, pp_ref):
    # x_ref, p_ref : (H, W, C)      NHWC input planes for this batch element
    # w_ref        : (2, 7, 7, C)   tap weights, channel on lanes (grid-resident)
    # b_ref        : (1, 1, C)      bias (grid-resident)
    # o_ref        : (H, W, C)      output block
    # xp_ref/pp_ref: (H+6, W+6, C)  f32 VMEM scratch: reflect-padded planes
    H, W, C = o_ref.shape

    def reflect_pad(src, dst):
        # center
        dst[pl.ds(PAD, H), pl.ds(PAD, W), :] = src[...].astype(jnp.float32)
        # top / bottom rows (reflect: no edge repeat)
        for p in range(PAD):
            dst[pl.ds(p, 1), pl.ds(PAD, W), :] = (
                src[pl.ds(PAD - p, 1), :, :].astype(jnp.float32))
            dst[pl.ds(H + PAD + p, 1), pl.ds(PAD, W), :] = (
                src[pl.ds(H - 2 - p, 1), :, :].astype(jnp.float32))
        # left / right columns; read back from dst so the corners reflect correctly
        for q in range(PAD):
            dst[:, pl.ds(q, 1), :] = dst[:, pl.ds(2 * PAD - q, 1), :]
            dst[:, pl.ds(W + PAD + q, 1), :] = dst[:, pl.ds(W + PAD - 2 - q, 1), :]

    reflect_pad(x_ref, xp_ref)
    reflect_pad(p_ref, pp_ref)

    bias_v = b_ref[0, 0, :].astype(jnp.float32)  # (C,) lane vector

    @pl.loop(0, H)
    def _(h):
        acc = jnp.zeros((W, C), jnp.float32)
        # Unrolled 7x7 two-tap depthwise conv; tap 0 -> x, tap 1 -> pattn1
        # (matches the 'b c t h w -> b (c t) h w' interleave).
        for i in range(KSIZE):
            rx = xp_ref[h + i]            # (W+6, C) padded row, f32
            rp = pp_ref[h + i]
            for j in range(KSIZE):
                wx = w_ref[0, i, j, :].astype(jnp.float32)   # (C,) lane-resident
                wp = w_ref[1, i, j, :].astype(jnp.float32)
                acc = acc + rx[j:j + W] * wx                 # sublane shift + VPU MAC
                acc = acc + rp[j:j + W] * wp
        o_ref[h] = jax.nn.sigmoid(acc + bias_v).astype(o_ref.dtype)


def pixel_attention(x, pattn1, weight, bias):
    """x, pattn1: (B, C, H, W); weight: (C, 2, 7, 7); bias: (C,). Returns (B, C, H, W)."""
    B, C, H, W = x.shape
    assert H > PAD and W > PAD, "reflect padding requires H, W > 3"
    Hp, Wp = H + 2 * PAD, W + 2 * PAD

    # Layout plumbing (wrapper-side): NCHW -> NHWC so channels sit on the lane axis.
    x_n = jnp.transpose(x, (0, 2, 3, 1))           # (B, H, W, C)
    p_n = jnp.transpose(pattn1, (0, 2, 3, 1))      # (B, H, W, C)
    w_n = jnp.transpose(weight, (1, 2, 3, 0))      # (2, 7, 7, C)
    b_n = bias.reshape(1, 1, C)

    # TODO(synk): for very large planes (H*W*C*4B approaching the VMEM limit on
    # v7x / v5e), tile H into row bands with a 3-row halo instead of full planes.
    out_n = pl.pallas_call(
        pixel_attention_kernel,
        out_shape=jax.ShapeDtypeStruct((B, H, W, C), x.dtype),
        grid_spec=pltpu.PrefetchScalarGridSpec(
            num_scalar_prefetch=0,
            grid=(B,),
            in_specs=[
                pl.BlockSpec((None, H, W, C), lambda b: (b, 0, 0, 0)),
                pl.BlockSpec((None, H, W, C), lambda b: (b, 0, 0, 0)),
                # Constant index maps -> weights / bias stay resident in VMEM.
                pl.BlockSpec((2, KSIZE, KSIZE, C), lambda b: (0, 0, 0, 0)),
                pl.BlockSpec((1, 1, C), lambda b: (0, 0, 0)),
            ],
            out_specs=pl.BlockSpec((None, H, W, C), lambda b: (b, 0, 0, 0)),
            scratch_shapes=[
                pltpu.VMEM((Hp, Wp, C), jnp.float32),
                pltpu.VMEM((Hp, Wp, C), jnp.float32),
            ],
        ),
        compiler_params=pltpu.CompilerParams(
            dimension_semantics=("parallel",),
            vmem_limit_bytes=32 * 1024 * 1024,
        ),
    )(x_n, p_n, w_n, b_n)

    return jnp.transpose(out_n, (0, 3, 1, 2))


def pixel_attention_reference(x, pattn1, weight, bias):
    """Pure-JAX reference reproducing the PyTorch module exactly."""
    B, C, H, W = x.shape
    # cat on dim=2 then rearrange 'b c t h w -> b (c t) h w' => interleave x / pattn1.
    x2 = jnp.stack([x, pattn1], axis=2).reshape(B, 2 * C, H, W)
    x2p = jnp.pad(x2, ((0, 0), (0, 0), (PAD, PAD), (PAD, PAD)), mode="reflect")
    out = lax.conv_general_dilated(
        x2p, weight,
        window_strides=(1, 1), padding="VALID",
        dimension_numbers=("NCHW", "OIHW", "NCHW"),
        feature_group_count=C,
    )
    out = out + bias.reshape(1, C, 1, 1)
    return jax.nn.sigmoid(out)


if __name__ == "__main__":
    B, C, H, W = 2, 4, 16, 16
    key = jax.random.PRNGKey(0)
    kx, kp, kw, kb = jax.random.split(key, 4)

    x = jax.random.normal(kx, (B, C, H, W), dtype=jnp.float32)
    pattn1 = jax.random.normal(kp, (B, C, H, W), dtype=jnp.float32)

    # Parameter shapes from nn.Conv2d(2C, C, 7, groups=C, bias=True):
    # weight (C, 2, 7, 7), bias (C,)
    weight = jax.random.normal(kw, (C, 2, KSIZE, KSIZE), dtype=jnp.float32) * 0.1
    bias = jax.random.normal(kb, (C,), dtype=jnp.float32) * 0.1

    out = pixel_attention(x, pattn1, weight, bias)
    out = jax.block_until_ready(out)

    ref = jax.block_until_ready(pixel_attention_reference(x, pattn1, weight, bias))
    assert out.shape == (B, C, H, W)
    assert np.allclose(np.asarray(out), np.asarray(ref), atol=1e-5, rtol=1e-5)

    print("KERNEL_OK")
</pallas_src>

<mosaic_0001>
module attributes {stable_mosaic.version = 11 : i64} {
  func.func @pixel_attention_kernel(%arg0: i32, %arg1: memref<1x16x16x4xf32, #tpu.memory_space<vmem>>, %arg2: memref<1x16x16x4xf32, #tpu.memory_space<vmem>>, %arg3: memref<2x7x7x4xf32, #tpu.memory_space<vmem>>, %arg4: memref<1x1x4xf32, #tpu.memory_space<vmem>>, %arg5: memref<1x16x16x4xf32, #tpu.memory_space<vmem>>, %arg6: memref<22x22x4xf32, #tpu.memory_space<vmem>>, %arg7: memref<22x22x4xf32, #tpu.memory_space<vmem>>) attributes {dimension_semantics = [#tpu.dimension_semantics<parallel>], iteration_bounds = array<i64: 2>, scalar_prefetch = 0 : i64, scratch_operands = 2 : i64, tpu.core_type = #tpu.core_type<tc>, window_params = [{transform_indices = @transform_0, window_bounds = array<i64: 1, 16, 16, 4>}, {transform_indices = @transform_1, window_bounds = array<i64: 1, 16, 16, 4>}, {pipeline_mode = #tpu.pipeline_mode<synchronous>, transform_indices = @transform_2, window_bounds = array<i64: 2, 7, 7, 4>}, {pipeline_mode = #tpu.pipeline_mode<synchronous>, transform_indices = @transform_3, window_bounds = array<i64: 1, 1, 4>}, {transform_indices = @transform_4, window_bounds = array<i64: 1, 16, 16, 4>}]} {
    %c0 = arith.constant 0 : index
    %c0_0 = arith.constant 0 : index
    %c0_1 = arith.constant 0 : index
    %c0_2 = arith.constant 0 : index
    %0 = vector.load %arg1[%c0, %c0_0, %c0_1, %c0_2] : memref<1x16x16x4xf32, #tpu.memory_space<vmem>>, vector<1x16x16x4xf32>
    %1 = vector.shape_cast %0 : vector<1x16x16x4xf32> to vector<16x16x4xf32>
    %c3 = arith.constant 3 : index
    %c3_3 = arith.constant 3 : index
    %c0_4 = arith.constant 0 : index
    %2 = vector.load %arg6[%c3, %c3_3, %c0_4] : memref<22x22x4xf32, #tpu.memory_space<vmem>>, vector<16x16x4xf32>
    tpu.vector_store %arg6[%c3, %c3_3, %c0_4], %1 {strides = array<i32>} : memref<22x22x4xf32, #tpu.memory_space<vmem>>, vector<16x16x4xf32>,
    %c0_5 = arith.constant 0 : index
    %c3_6 = arith.constant 3 : index
    %c0_7 = arith.constant 0 : index
    %c0_8 = arith.constant 0 : index
    %3 = vector.load %arg1[%c0_5, %c3_6, %c0_7, %c0_8] : memref<1x16x16x4xf32, #tpu.memory_space<vmem>>, vector<1x1x16x4xf32>
    %4 = vector.shape_cast %3 : vector<1x1x16x4xf32> to vector<1x16x4xf32>
    %c0_9 = arith.constant 0 : index
    %c3_10 = arith.constant 3 : index
    %c0_11 = arith.constant 0 : index
    %5 = vector.load %arg6[%c0_9, %c3_10, %c0_11] : memref<22x22x4xf32, #tpu.memory_space<vmem>>, vector<1x16x4xf32>
    tpu.vector_store %arg6[%c0_9, %c3_10, %c0_11], %4 {strides = array<i32>} : memref<22x22x4xf32, #tpu.memory_space<vmem>>, vector<1x16x4xf32>,
    %c0_12 = arith.constant 0 : index
    %c14 = arith.constant 14 : index
    %c0_13 = arith.constant 0 : index
    %c0_14 = arith.constant 0 : index
    %6 = vector.load %arg1[%c0_12, %c14, %c0_13, %c0_14] : memref<1x16x16x4xf32, #tpu.memory_space<vmem>>, vector<1x1x16x4xf32>
    %7 = vector.shape_cast %6 : vector<1x1x16x4xf32> to vector<1x16x4xf32>
    %c19 = arith.constant 19 : index
    %c3_15 = arith.constant 3 : index
    %c0_16 = arith.constant 0 : index
    %8 = vector.load %arg6[%c19, %c3_15, %c0_16] : memref<22x22x4xf32, #tpu.memory_space<vmem>>, vector<1x16x4xf32>
    tpu.vector_store %arg6[%c19, %c3_15, %c0_16], %7 {strides = array<i32>} : memref<22x22x4xf32, #tpu.memory_space<vmem>>, vector<1x16x4xf32>,
    %c0_17 = arith.constant 0 : index
    %c2 = arith.constant 2 : index
    %c0_18 = arith.constant 0 : index
    %c0_19 = arith.constant 0 : index
    %9 = vector.load %arg1[%c0_17, %c2, %c0_18, %c0_19] : memref<1x16x16x4xf32, #tpu.memory_space<vmem>>, vector<1x1x16x4xf32>
    %10 = vector.shape_cast %9 : vector<1x1x16x4xf32> to vector<1x16x4xf32>
    %c1 = arith.constant 1 : index
    %c3_20 = arith.constant 3 : index
    %c0_21 = arith.constant 0 : index
    %11 = vector.load %arg6[%c1, %c3_20, %c0_21] : memref<22x22x4xf32, #tpu.memory_space<vmem>>, vector<1x16x4xf32>
    tpu.vector_store %arg6[%c1, %c3_20, %c0_21], %10 {strides = array<i32>} : memref<22x22x4xf32, #tpu.memory_space<vmem>>, vector<1x16x4xf32>,
    %c0_22 = arith.constant 0 : index
    %c13 = arith.constant 13 : index
    %c0_23 = arith.constant 0 : index
    %c0_24 = arith.constant 0 : index
    %12 = vector.load %arg1[%c0_22, %c13, %c0_23, %c0_24] : memref<1x16x16x4xf32, #tpu.memory_space<vmem>>, vector<1x1x16x4xf32>
    %13 = vector.shape_cast %12 : vector<1x1x16x4xf32> to vector<1x16x4xf32>
    %c20 = arith.constant 20 : index
    %c3_25 = arith.constant 3 : index
    %c0_26 = arith.constant 0 : index
    %14 = vector.load %arg6[%c20, %c3_25, %c0_26] : memref<22x22x4xf32, #tpu.memory_space<vmem>>, vector<1x16x4xf32>
    tpu.vector_store %arg6[%c20, %c3_25, %c0_26], %13 {strides = array<i32>} : memref<22x22x4xf32, #tpu.memory_space<vmem>>, vector<1x16x4xf32>,
    %c0_27 = arith.constant 0 : index
    %c1_28 = arith.constant 1 : index
    %c0_29 = arith.constant 0 : index
    %c0_30 = arith.constant 0 : index
    %15 = vector.load %arg1[%c0_27, %c1_28, %c0_29, %c0_30] : memref<1x16x16x4xf32, #tpu.memory_space<vmem>>, vector<1x1x16x4xf32>
    %16 = vector.shape_cast %15 : vector<1x1x16x4xf32> to vector<1x16x4xf32>
    %c2_31 = arith.constant 2 : index
    %c3_32 = arith.constant 3 : index
    %c0_33 = arith.constant 0 : index
    %17 = vector.load %arg6[%c2_31, %c3_32, %c0_33] : memref<22x22x4xf32, #tpu.memory_space<vmem>>, vector<1x16x4xf32>
    tpu.vector_store %arg6[%c2_31, %c3_32, %c0_33], %16 {strides = array<i32>} : memref<22x22x4xf32, #tpu.memory_space<vmem>>, vector<1x16x4xf32>,
    %c0_34 = arith.constant 0 : index
    %c12 = arith.constant 12 : index
    %c0_35 = arith.constant 0 : index
    %c0_36 = arith.constant 0 : index
    %18 = vector.load %arg1[%c0_34, %c12, %c0_35, %c0_36] : memref<1x16x16x4xf32, #tpu.memory_space<vmem>>, vector<1x1x16x4xf32>
    %19 = vector.shape_cast %18 : vector<1x1x16x4xf32> to vector<1x16x4xf32>
    %c21 = arith.constant 21 : index
    %c3_37 = arith.constant 3 : index
    %c0_38 = arith.constant 0 : index
    %20 = vector.load %arg6[%c21, %c3_37, %c0_38] : memref<22x22x4xf32, #tpu.memory_space<vmem>>, vector<1x16x4xf32>
    tpu.vector_store %arg6[%c21, %c3_37, %c0_38], %19 {strides = array<i32>} : memref<22x22x4xf32, #tpu.memory_space<vmem>>, vector<1x16x4xf32>,
    %c0_39 = arith.constant 0 : index
    %c6 = arith.constant 6 : index
    %c0_40 = arith.constant 0 : index
    %21 = vector.load %arg6[%c0_39, %c6, %c0_40] : memref<22x22x4xf32, #tpu.memory_space<vmem>>, vector<22x1x4xf32>
    %c0_41 = arith.constant 0 : index
    %c0_42 = arith.constant 0 : index
    %c0_43 = arith.constant 0 : index
    %22 = vector.load %arg6[%c0_41, %c0_42, %c0_43] : memref<22x22x4xf32, #tpu.memory_space<vmem>>, vector<22x1x4xf32>
    tpu.vector_store %arg6[%c0_41, %c0_42, %c0_43], %21 {strides = array<i32>} : memref<22x22x4xf32, #tpu.memory_space<vmem>>, vector<22x1x4xf32>,
    %c0_44 = arith.constant 0 : index
    %c17 = arith.constant 17 : index
    %c0_45 = arith.constant 0 : index
    %23 = vector.load %arg6[%c0_44, %c17, %c0_45] : memref<22x22x4xf32, #tpu.memory_space<vmem>>, vector<22x1x4xf32>
    %c0_46 = arith.constant 0 : index
    %c19_47 = arith.constant 19 : index
    %c0_48 = arith.constant 0 : index
    %24 = vector.load %arg6[%c0_46, %c19_47, %c0_48] : memref<22x22x4xf32, #tpu.memory_space<vmem>>, vector<22x1x4xf32>
    tpu.vector_store %arg6[%c0_46, %c19_47, %c0_48], %23 {strides = array<i32>} : memref<22x22x4xf32, #tpu.memory_space<vmem>>, vector<22x1x4xf32>,
    %c0_49 = arith.constant 0 : index
    %c5 = arith.constant 5 : index
    %c0_50 = arith.constant 0 : index
    %25 = vector.load %arg6[%c0_49, %c5, %c0_50] : memref<22x22x4xf32, #tpu.memory_space<vmem>>, vector<22x1x4xf32>
    %c0_51 = arith.constant 0 : index
    %c1_52 = arith.constant 1 : index
    %c0_53 = arith.constant 0 : index
    %26 = vector.load %arg6[%c0_51, %c1_52, %c0_53] : memref<22x22x4xf32, #tpu.memory_space<vmem>>, vector<22x1x4xf32>
    tpu.vector_store %arg6[%c0_51, %c1_52, %c0_53], %25 {strides = array<i32>} : memref<22x22x4xf32, #tpu.memory_space<vmem>>, vector<22x1x4xf32>,
    %c0_54 = arith.constant 0 : index
    %c16 = arith.constant 16 : index
    %c0_55 = arith.constant 0 : index
    %27 = vector.load %arg6[%c0_54, %c16, %c0_55] : memref<22x22x4xf32, #tpu.memory_space<vmem>>, vector<22x1x4xf32>
    %c0_56 = arith.constant 0 : index
    %c20_57 = arith.constant 20 : index
    %c0_58 = arith.constant 0 : index
    %28 = vector.load %arg6[%c0_56, %c20_57, %c0_58] : memref<22x22x4xf32, #tpu.memory_space<vmem>>, vector<22x1x4xf32>
    tpu.vector_store %arg6[%c0_56, %c20_57, %c0_58], %27 {strides = array<i32>} : memref<22x22x4xf32, #tpu.memory_space<vmem>>, vector<22x1x4xf32>,
    %c0_59 = arith.constant 0 : index
    %c4 = arith.constant 4 : index
    %c0_60 = arith.constant 0 : index
    %29 = vector.load %arg6[%c0_59, %c4, %c0_60] : memref<22x22x4xf32, #tpu.memory_space<vmem>>, vector<22x1x4xf32>
    %c0_61 = arith.constant 0 : index
    %c2_62 = arith.constant 2 : index
    %c0_63 = arith.constant 0 : index
    %30 = vector.load %arg6[%c0_61, %c2_62, %c0_63] : memref<22x22x4xf32, #tpu.memory_space<vmem>>, vector<22x1x4xf32>
    tpu.vector_store %arg6[%c0_61, %c2_62, %c0_63], %29 {strides = array<i32>} : memref<22x22x4xf32, #tpu.memory_space<vmem>>, vector<22x1x4xf32>,
    %c0_64 = arith.constant 0 : index
    %c15 = arith.constant 15 : index
    %c0_65 = arith.constant 0 : index
    %31 = vector.load %arg6[%c0_64, %c15, %c0_65] : memref<22x22x4xf32, #tpu.memory_space<vmem>>, vector<22x1x4xf32>
    %c0_66 = arith.constant 0 : index
    %c21_67 = arith.constant 21 : index
    %c0_68 = arith.constant 0 : index
    %32 = vector.load %arg6[%c0_66, %c21_67, %c0_68] : memref<22x22x4xf32, #tpu.memory_space<vmem>>, vector<22x1x4xf32>
    tpu.vector_store %arg6[%c0_66, %c21_67, %c0_68], %31 {strides = array<i32>} : memref<22x22x4xf32, #tpu.memory_space<vmem>>, vector<22x1x4xf32>,
    %c0_69 = arith.constant 0 : index
    %c0_70 = arith.constant 0 : index
    %c0_71 = arith.constant 0 : index
    %c0_72 = arith.constant 0 : index
    %33 = vector.load %arg2[%c0_69, %c0_70, %c0_71, %c0_72] : memref<1x16x16x4xf32, #tpu.memory_space<vmem>>, vector<1x16x16x4xf32>
    %34 = vector.shape_cast %33 : vector<1x16x16x4xf32> to vector<16x16x4xf32>
    %c3_73 = arith.constant 3 : index
    %c3_74 = arith.constant 3 : index
    %c0_75 = arith.constant 0 : index
    %35 = vector.load %arg7[%c3_73, %c3_74, %c0_75] : memref<22x22x4xf32, #tpu.memory_space<vmem>>, vector<16x16x4xf32>
    tpu.vector_store %arg7[%c3_73, %c3_74, %c0_75], %34 {strides = array<i32>} : memref<22x22x4xf32, #tpu.memory_space<vmem>>, vector<16x16x4xf32>,
    %c0_76 = arith.constant 0 : index
    %c3_77 = arith.constant 3 : index
    %c0_78 = arith.constant 0 : index
    %c0_79 = arith.constant 0 : index
    %36 = vector.load %arg2[%c0_76, %c3_77, %c0_78, %c0_79] : memref<1x16x16x4xf32, #tpu.memory_space<vmem>>, vector<1x1x16x4xf32>
    %37 = vector.shape_cast %36 : vector<1x1x16x4xf32> to vector<1x16x4xf32>
    %c0_80 = arith.constant 0 : index
    %c3_81 = arith.constant 3 : index
    %c0_82 = arith.constant 0 : index
    %38 = vector.load %arg7[%c0_80, %c3_81, %c0_82] : memref<22x22x4xf32, #tpu.memory_space<vmem>>, vector<1x16x4xf32>
    tpu.vector_store %arg7[%c0_80, %c3_81, %c0_82], %37 {strides = array<i32>} : memref<22x22x4xf32, #tpu.memory_space<vmem>>, vector<1x16x4xf32>,
    %c0_83 = arith.constant 0 : index
    %c14_84 = arith.constant 14 : index
    %c0_85 = arith.constant 0 : index
    %c0_86 = arith.constant 0 : index
    %39 = vector.load %arg2[%c0_83, %c14_84, %c0_85, %c0_86] : memref<1x16x16x4xf32, #tpu.memory_space<vmem>>, vector<1x1x16x4xf32>
    %40 = vector.shape_cast %39 : vector<1x1x16x4xf32> to vector<1x16x4xf32>
    %c19_87 = arith.constant 19 : index
    %c3_88 = arith.constant 3 : index
    %c0_89 = arith.constant 0 : index
    %41 = vector.load %arg7[%c19_87, %c3_88, %c0_89] : memref<22x22x4xf32, #tpu.memory_space<vmem>>, vector<1x16x4xf32>
    tpu.vector_store %arg7[%c19_87, %c3_88, %c0_89], %40 {strides = array<i32>} : memref<22x22x4xf32, #tpu.memory_space<vmem>>, vector<1x16x4xf32>,
    %c0_90 = arith.constant 0 : index
    %c2_91 = arith.constant 2 : index
    %c0_92 = arith.constant 0 : index
    %c0_93 = arith.constant 0 : index
    %42 = vector.load %arg2[%c0_90, %c2_91, %c0_92, %c0_93] : memref<1x16x16x4xf32, #tpu.memory_space<vmem>>, vector<1x1x16x4xf32>
    %43 = vector.shape_cast %42 : vector<1x1x16x4xf32> to vector<1x16x4xf32>
    %c1_94 = arith.constant 1 : index
    %c3_95 = arith.constant 3 : index
    %c0_96 = arith.constant 0 : index
    %44 = vector.load %arg7[%c1_94, %c3_95, %c0_96] : memref<22x22x4xf32, #tpu.memory_space<vmem>>, vector<1x16x4xf32>
    tpu.vector_store %arg7[%c1_94, %c3_95, %c0_96], %43 {strides = array<i32>} : memref<22x22x4xf32, #tpu.memory_space<vmem>>, vector<1x16x4xf32>,
    %c0_97 = arith.constant 0 : index
    %c13_98 = arith.constant 13 : index
    %c0_99 = arith.constant 0 : index
    %c0_100 = arith.constant 0 : index
    %45 = vector.load %arg2[%c0_97, %c13_98, %c0_99, %c0_100] : memref<1x16x16x4xf32, #tpu.memory_space<vmem>>, vector<1x1x16x4xf32>
    %46 = vector.shape_cast %45 : vector<1x1x16x4xf32> to vector<1x16x4xf32>
    %c20_101 = arith.constant 20 : index
    %c3_102 = arith.constant 3 : index
    %c0_103 = arith.constant 0 : index
    %47 = vector.load %arg7[%c20_101, %c3_102, %c0_103] : memref<22x22x4xf32, #tpu.memory_space<vmem>>, vector<1x16x4xf32>
    tpu.vector_store %arg7[%c20_101, %c3_102, %c0_103], %46 {strides = array<i32>} : memref<22x22x4xf32, #tpu.memory_space<vmem>>, vector<1x16x4xf32>,
    %c0_104 = arith.constant 0 : index
    %c1_105 = arith.constant 1 : index
    %c0_106 = arith.constant 0 : index
    %c0_107 = arith.constant 0 : index
    %48 = vector.load %arg2[%c0_104, %c1_105, %c0_106, %c0_107] : memref<1x16x16x4xf32, #tpu.memory_space<vmem>>, vector<1x1x16x4xf32>
    %49 = vector.shape_cast %48 : vector<1x1x16x4xf32> to vector<1x16x4xf32>
    %c2_108 = arith.constant 2 : index
    %c3_109 = arith.constant 3 : index
    %c0_110 = arith.constant 0 : index
    %50 = vector.load %arg7[%c2_108, %c3_109, %c0_110] : memref<22x22x4xf32, #tpu.memory_space<vmem>>, vector<1x16x4xf32>
    tpu.vector_store %arg7[%c2_108, %c3_109, %c0_110], %49 {strides = array<i32>} : memref<22x22x4xf32, #tpu.memory_space<vmem>>, vector<1x16x4xf32>,
    %c0_111 = arith.constant 0 : index
    %c12_112 = arith.constant 12 : index
    %c0_113 = arith.constant 0 : index
    %c0_114 = arith.constant 0 : index
    %51 = vector.load %arg2[%c0_111, %c12_112, %c0_113, %c0_114] : memref<1x16x16x4xf32, #tpu.memory_space<vmem>>, vector<1x1x16x4xf32>
    %52 = vector.shape_cast %51 : vector<1x1x16x4xf32> to vector<1x16x4xf32>
    %c21_115 = arith.constant 21 : index
    %c3_116 = arith.constant 3 : index
    %c0_117 = arith.constant 0 : index
    %53 = vector.load %arg7[%c21_115, %c3_116, %c0_117] : memref<22x22x4xf32, #tpu.memory_space<vmem>>, vector<1x16x4xf32>
    tpu.vector_store %arg7[%c21_115, %c3_116, %c0_117], %52 {strides = array<i32>} : memref<22x22x4xf32, #tpu.memory_space<vmem>>, vector<1x16x4xf32>,
    %c0_118 = arith.constant 0 : index
    %c6_119 = arith.constant 6 : index
    %c0_120 = arith.constant 0 : index
    %54 = vector.load %arg7[%c0_118, %c6_119, %c0_120] : memref<22x22x4xf32, #tpu.memory_space<vmem>>, vector<22x1x4xf32>
    %c0_121 = arith.constant 0 : index
    %c0_122 = arith.constant 0 : index
    %c0_123 = arith.constant 0 : index
    %55 = vector.load %arg7[%c0_121, %c0_122, %c0_123] : memref<22x22x4xf32, #tpu.memory_space<vmem>>, vector<22x1x4xf32>
    tpu.vector_store %arg7[%c0_121, %c0_122, %c0_123], %54 {strides = array<i32>} : memref<22x22x4xf32, #tpu.memory_space<vmem>>, vector<22x1x4xf32>,
    %c0_124 = arith.constant 0 : index
    %c17_125 = arith.constant 17 : index
    %c0_126 = arith.constant 0 : index
    %56 = vector.load %arg7[%c0_124, %c17_125, %c0_126] : memref<22x22x4xf32, #tpu.memory_space<vmem>>, vector<22x1x4xf32>
    %c0_127 = arith.constant 0 : index
    %c19_128 = arith.constant 19 : index
    %c0_129 = arith.constant 0 : index
    %57 = vector.load %arg7[%c0_127, %c19_128, %c0_129] : memref<22x22x4xf32, #tpu.memory_space<vmem>>, vector<22x1x4xf32>
    tpu.vector_store %arg7[%c0_127, %c19_128, %c0_129], %56 {strides = array<i32>} : memref<22x22x4xf32, #tpu.memory_space<vmem>>, vector<22x1x4xf32>,
    %c0_130 = arith.constant 0 : index
    %c5_131 = arith.constant 5 : index
    %c0_132 = arith.constant 0 : index
    %58 = vector.load %arg7[%c0_130, %c5_131, %c0_132] : memref<22x22x4xf32, #tpu.memory_space<vmem>>, vector<22x1x4xf32>
    %c0_133 = arith.constant 0 : index
    %c1_134 = arith.constant 1 : index
    %c0_135 = arith.constant 0 : index
    %59 = vector.load %arg7[%c0_133, %c1_134, %c0_135] : memref<22x22x4xf32, #tpu.memory_space<vmem>>, vector<22x1x4xf32>
    tpu.vector_store %arg7[%c0_133, %c1_134, %c0_135], %58 {strides = array<i32>} : memref<22x22x4xf32, #tpu.memory_space<vmem>>, vector<22x1x4xf32>,
    %c0_136 = arith.constant 0 : index
    %c16_137 = arith.constant 16 : index
    %c0_138 = arith.constant 0 : index
    %60 = vector.load %arg7[%c0_136, %c16_137, %c0_138] : memref<22x22x4xf32, #tpu.memory_space<vmem>>, vector<22x1x4xf32>
    %c0_139 = arith.constant 0 : index
    %c20_140 = arith.constant 20 : index
    %c0_141 = arith.constant 0 : index
    %61 = vector.load %arg7[%c0_139, %c20_140, %c0_141] : memref<22x22x4xf32, #tpu.memory_space<vmem>>, vector<22x1x4xf32>
    tpu.vector_store %arg7[%c0_139, %c20_140, %c0_141], %60 {strides = array<i32>} : memref<22x22x4xf32, #tpu.memory_space<vmem>>, vector<22x1x4xf32>,
    %c0_142 = arith.constant 0 : index
    %c4_143 = arith.constant 4 : index
    %c0_144 = arith.constant 0 : index
    %62 = vector.load %arg7[%c0_142, %c4_143, %c0_144] : memref<22x22x4xf32, #tpu.memory_space<vmem>>, vector<22x1x4xf32>
    %c0_145 = arith.constant 0 : index
    %c2_146 = arith.constant 2 : index
    %c0_147 = arith.constant 0 : index
    %63 = vector.load %arg7[%c0_145, %c2_146, %c0_147] : memref<22x22x4xf32, #tpu.memory_space<vmem>>, vector<22x1x4xf32>
    tpu.vector_store %arg7[%c0_145, %c2_146, %c0_147], %62 {strides = array<i32>} : memref<22x22x4xf32, #tpu.memory_space<vmem>>, vector<22x1x4xf32>,
    %c0_148 = arith.constant 0 : index
    %c15_149 = arith.constant 15 : index
    %c0_150 = arith.constant 0 : index
    %64 = vector.load %arg7[%c0_148, %c15_149, %c0_150] : memref<22x22x4xf32, #tpu.memory_space<vmem>>, vector<22x1x4xf32>
    %c0_151 = arith.constant 0 : index
    %c21_152 = arith.constant 21 : index
    %c0_153 = arith.constant 0 : index
    %65 = vector.load %arg7[%c0_151, %c21_152, %c0_153] : memref<22x22x4xf32, #tpu.memory_space<vmem>>, vector<22x1x4xf32>
    tpu.vector_store %arg7[%c0_151, %c21_152, %c0_153], %64 {strides = array<i32>} : memref<22x22x4xf32, #tpu.memory_space<vmem>>, vector<22x1x4xf32>,
    %c0_154 = arith.constant 0 : index
    %c0_155 = arith.constant 0 : index
    %c0_156 = arith.constant 0 : index
    %66 = vector.load %arg4[%c0_154, %c0_155, %c0_156] : memref<1x1x4xf32, #tpu.memory_space<vmem>>, vector<1x1x4xf32>
    %67 = vector.shape_cast %66 : vector<1x1x4xf32> to vector<4xf32>
    %c0_i32 = arith.constant 0 : i32
    %c16_i32 = arith.constant 16 : i32
    %68 = arith.addi %c0_i32, %c16_i32 : i32
    %c1_i32 = arith.constant 1 : i32
    scf.for %arg8 = %c0_i32 to %68 step %c1_i32  : i32 {
      %c1_i32_158 = arith.constant 1 : i32
      %69 = arith.muli %arg8, %c1_i32_158 : i32
      %c0_i32_159 = arith.constant 0 : i32
      %70 = arith.addi %c0_i32_159, %69 : i32
      %cst = arith.constant 0.000000e+00 : f32
      %71 = vector.broadcast %cst : f32 to vector<16x4xf32>
      %c0_i32_160 = arith.constant 0 : i32
      %72 = arith.addi %70, %c0_i32_160 : i32
      %73 = arith.index_cast %72 : i32 to index
      %c0_161 = arith.constant 0 : index
      %c0_162 = arith.constant 0 : index
      %74 = vector.load %arg6[%73, %c0_161, %c0_162] : memref<22x22x4xf32, #tpu.memory_space<vmem>>, vector<1x22x4xf32>
      %75 = vector.shape_cast %74 : vector<1x22x4xf32> to vector<22x4xf32>
      %c0_i32_163 = arith.constant 0 : i32
      %76 = arith.addi %70, %c0_i32_163 : i32
      %77 = arith.index_cast %76 : i32 to index
      %c0_164 = arith.constant 0 : index
      %c0_165 = arith.constant 0 : index
      %78 = vector.load %arg7[%77, %c0_164, %c0_165] : memref<22x22x4xf32, #tpu.memory_space<vmem>>, vector<1x22x4xf32>
      %79 = vector.shape_cast %78 : vector<1x22x4xf32> to vector<22x4xf32>
      %c0_166 = arith.constant 0 : index
      %c0_167 = arith.constant 0 : index
      %c0_168 = arith.constant 0 : index
      %c0_169 = arith.constant 0 : index
      %80 = vector.load %arg3[%c0_166, %c0_167, %c0_168, %c0_169] : memref<2x7x7x4xf32, #tpu.memory_space<vmem>>, vector<1x1x1x4xf32>
      %81 = vector.shape_cast %80 : vector<1x1x1x4xf32> to vector<4xf32>
      %c1_170 = arith.constant 1 : index
      %c0_171 = arith.constant 0 : index
      %c0_172 = arith.constant 0 : index
      %c0_173 = arith.constant 0 : index
      %82 = vector.load %arg3[%c1_170, %c0_171, %c0_172, %c0_173] : memref<2x7x7x4xf32, #tpu.memory_space<vmem>>, vector<1x1x1x4xf32>
      %83 = vector.shape_cast %82 : vector<1x1x1x4xf32> to vector<4xf32>
      %84 = vector.extract_strided_slice %75 {offsets = [0, 0], sizes = [16, 4], strides = [1, 1]} : vector<22x4xf32> to vector<16x4xf32>
      %85 = vector.shape_cast %81 : vector<4xf32> to vector<1x4xf32>
      %86 = vector.broadcast %85 : vector<1x4xf32> to vector<16x4xf32>
      %87 = arith.mulf %84, %86 : vector<16x4xf32>
      %88 = arith.addf %71, %87 : vector<16x4xf32>
      %89 = vector.extract_strided_slice %79 {offsets = [0, 0], sizes = [16, 4], strides = [1, 1]} : vector<22x4xf32> to vector<16x4xf32>
      %90 = vector.shape_cast %83 : vector<4xf32> to vector<1x4xf32>
      %91 = vector.broadcast %90 : vector<1x4xf32> to vector<16x4xf32>
      %92 = arith.mulf %89, %91 : vector<16x4xf32>
      %93 = arith.addf %88, %92 : vector<16x4xf32>
      %c0_174 = arith.constant 0 : index
      %c0_175 = arith.constant 0 : index
      %c1_176 = arith.constant 1 : index
      %c0_177 = arith.constant 0 : index
      %94 = vector.load %arg3[%c0_174, %c0_175, %c1_176, %c0_177] : memref<2x7x7x4xf32, #tpu.memory_space<vmem>>, vector<1x1x1x4xf32>
      %95 = vector.shape_cast %94 : vector<1x1x1x4xf32> to vector<4xf32>
      %c1_178 = arith.constant 1 : index
      %c0_179 = arith.constant 0 : index
      %c1_180 = arith.constant 1 : index
      %c0_181 = arith.constant 0 : index
      %96 = vector.load %arg3[%c1_178, %c0_179, %c1_180, %c0_181] : memref<2x7x7x4xf32, #tpu.memory_space<vmem>>, vector<1x1x1x4xf32>
      %97 = vector.shape_cast %96 : vector<1x1x1x4xf32> to vector<4xf32>
      %98 = vector.extract_strided_slice %75 {offsets = [1, 0], sizes = [16, 4], strides = [1, 1]} : vector<22x4xf32> to vector<16x4xf32>
      %99 = vector.shape_cast %95 : vector<4xf32> to vector<1x4xf32>
      %100 = vector.broadcast %99 : vector<1x4xf32> to vector<16x4xf32>
      %101 = arith.mulf %98, %100 : vector<16x4xf32>
      %102 = arith.addf %93, %101 : vector<16x4xf32>
      %103 = vector.extract_strided_slice %79 {offsets = [1, 0], sizes = [16, 4], strides = [1, 1]} : vector<22x4xf32> to vector<16x4xf32>
      %104 = vector.shape_cast %97 : vector<4xf32> to vector<1x4xf32>
      %105 = vector.broadcast %104 : vector<1x4xf32> to vector<16x4xf32>
      %106 = arith.mulf %103, %105 : vector<16x4xf32>
      %107 = arith.addf %102, %106 : vector<16x4xf32>
      %c0_182 = arith.constant 0 : index
      %c0_183 = arith.constant 0 : index
      %c2_184 = arith.constant 2 : index
      %c0_185 = arith.constant 0 : index
      %108 = vector.load %arg3[%c0_182, %c0_183, %c2_184, %c0_185] : memref<2x7x7x4xf32, #tpu.memory_space<vmem>>, vector<1x1x1x4xf32>
      %109 = vector.shape_cast %108 : vector<1x1x1x4xf32> to vector<4xf32>
      %c1_186 = arith.constant 1 : index
      %c0_187 = arith.constant 0 : index
      %c2_188 = arith.constant 2 : index
      %c0_189 = arith.constant 0 : index
      %110 = vector.load %arg3[%c1_186, %c0_187, %c2_188, %c0_189] : memref<2x7x7x4xf32, #tpu.memory_space<vmem>>, vector<1x1x1x4xf32>
      %111 = vector.shape_cast %110 : vector<1x1x1x4xf32> to vector<4xf32>
      %112 = vector.extract_strided_slice %75 {offsets = [2, 0], sizes = [16, 4], strides = [1, 1]} : vector<22x4xf32> to vector<16x4xf32>
      %113 = vector.shape_cast %109 : vector<4xf32> to vector<1x4xf32>
      %114 = vector.broadcast %113 : vector<1x4xf32> to vector<16x4xf32>
      %115 = arith.mulf %112, %114 : vector<16x4xf32>
      %116 = arith.addf %107, %115 : vector<16x4xf32>
      %117 = vector.extract_strided_slice %79 {offsets = [2, 0], sizes = [16, 4], strides = [1, 1]} : vector<22x4xf32> to vector<16x4xf32>
      %118 = vector.shape_cast %111 : vector<4xf32> to vector<1x4xf32>
      %119 = vector.broadcast %118 : vector<1x4xf32> to vector<16x4xf32>
      %120 = arith.mulf %117, %119 : vector<16x4xf32>
      %121 = arith.addf %116, %120 : vector<16x4xf32>
      %c0_190 = arith.constant 0 : index
      %c0_191 = arith.constant 0 : index
      %c3_192 = arith.constant 3 : index
      %c0_193 = arith.constant 0 : index
      %122 = vector.load %arg3[%c0_190, %c0_191, %c3_192, %c0_193] : memref<2x7x7x4xf32, #tpu.memory_space<vmem>>, vector<1x1x1x4xf32>
      %123 = vector.shape_cast %122 : vector<1x1x1x4xf32> to vector<4xf32>
      %c1_194 = arith.constant 1 : index
      %c0_195 = arith.constant 0 : index
      %c3_196 = arith.constant 3 : index
      %c0_197 = arith.constant 0 : index
      %124 = vector.load %arg3[%c1_194, %c0_195, %c3_196, %c0_197] : memref<2x7x7x4xf32, #tpu.memory_space<vmem>>, vector<1x1x1x4xf32>
      %125 = vector.shape_cast %124 : vector<1x1x1x4xf32> to vector<4xf32>
      %126 = vector.extract_strided_slice %75 {offsets = [3, 0], sizes = [16, 4], strides = [1, 1]} : vector<22x4xf32> to vector<16x4xf32>
      %127 = vector.shape_cast %123 : vector<4xf32> to vector<1x4xf32>
      %128 = vector.broadcast %127 : vector<1x4xf32> to vector<16x4xf32>
      %129 = arith.mulf %126, %128 : vector<16x4xf32>
      %130 = arith.addf %121, %129 : vector<16x4xf32>
      %131 = vector.extract_strided_slice %79 {offsets = [3, 0], sizes = [16, 4], strides = [1, 1]} : vector<22x4xf32> to vector<16x4xf32>
      %132 = vector.shape_cast %125 : vector<4xf32> to vector<1x4xf32>
      %133 = vector.broadcast %132 : vector<1x4xf32> to vector<16x4xf32>
      %134 = arith.mulf %131, %133 : vector<16x4xf32>
      %135 = arith.addf %130, %134 : vector<16x4xf32>
      %c0_198 = arith.constant 0 : index
      %c0_199 = arith.constant 0 : index
      %c4_200 = arith.constant 4 : index
      %c0_201 = arith.constant 0 : index
      %136 = vector.load %arg3[%c0_198, %c0_199, %c4_200, %c0_201] : memref<2x7x7x4xf32, #tpu.memory_space<vmem>>, vector<1x1x1x4xf32>
      %137 = vector.shape_cast %136 : vector<1x1x1x4xf32> to vector<4xf32>
      %c1_202 = arith.constant 1 : index
      %c0_203 = arith.constant 0 : index
      %c4_204 = arith.constant 4 : index
      %c0_205 = arith.constant 0 : index
      %138 = vector.load %arg3[%c1_202, %c0_203, %c4_204, %c0_205] : memref<2x7x7x4xf32, #tpu.memory_space<vmem>>, vector<1x1x1x4xf32>
      %139 = vector.shape_cast %138 : vector<1x1x1x4xf32> to vector<4xf32>
      %140 = vector.extract_strided_slice %75 {offsets = [4, 0], sizes = [16, 4], strides = [1, 1]} : vector<22x4xf32> to vector<16x4xf32>
      %141 = vector.shape_cast %137 : vector<4xf32> to vector<1x4xf32>
      %142 = vector.broadcast %141 : vector<1x4xf32> to vector<16x4xf32>
      %143 = arith.mulf %140, %142 : vector<16x4xf32>
      %144 = arith.addf %135, %143 : vector<16x4xf32>
      %145 = vector.extract_strided_slice %79 {offsets = [4, 0], sizes = [16, 4], strides = [1, 1]} : vector<22x4xf32> to vector<16x4xf32>
      %146 = vector.shape_cast %139 : vector<4xf32> to vector<1x4xf32>
      %147 = vector.broadcast %146 : vector<1x4xf32> to vector<16x4xf32>
      %148 = arith.mulf %145, %147 : vector<16x4xf32>
      %149 = arith.addf %144, %148 : vector<16x4xf32>
      %c0_206 = arith.constant 0 : index
      %c0_207 = arith.constant 0 : index
      %c5_208 = arith.constant 5 : index
      %c0_209 = arith.constant 0 : index
      %150 = vector.load %arg3[%c0_206, %c0_207, %c5_208, %c0_209] : memref<2x7x7x4xf32, #tpu.memory_space<vmem>>, vector<1x1x1x4xf32>
      %151 = vector.shape_cast %150 : vector<1x1x1x4xf32> to vector<4xf32>
      %c1_210 = arith.constant 1 : index
      %c0_211 = arith.constant 0 : index
      %c5_212 = arith.constant 5 : index
      %c0_213 = arith.constant 0 : index
      %152 = vector.load %arg3[%c1_210, %c0_211, %c5_212, %c0_213] : memref<2x7x7x4xf32, #tpu.memory_space<vmem>>, vector<1x1x1x4xf32>
      %153 = vector.shape_cast %152 : vector<1x1x1x4xf32> to vector<4xf32>
      %154 = vector.extract_strided_slice %75 {offsets = [5, 0], sizes = [16, 4], strides = [1, 1]} : vector<22x4xf32> to vector<16x4xf32>
      %155 = vector.shape_cast %151 : vector<4xf32> to vector<1x4xf32>
      %156 = vector.broadcast %155 : vector<1x4xf32> to vector<16x4xf32>
      %157 = arith.mulf %154, %156 : vector<16x4xf32>
      %158 = arith.addf %149, %157 : vector<16x4xf32>
      %159 = vector.extract_strided_slice %79 {offsets = [5, 0], sizes = [16, 4], strides = [1, 1]} : vector<22x4xf32> to vector<16x4xf32>
      %160 = vector.shape_cast %153 : vector<4xf32> to vector<1x4xf32>
      %161 = vector.broadcast %160 : vector<1x4xf32> to vector<16x4xf32>
      %162 = arith.mulf %159, %161 : vector<16x4xf32>
      %163 = arith.addf %158, %162 : vector<16x4xf32>
      %c0_214 = arith.constant 0 : index
      %c0_215 = arith.constant 0 : index
      %c6_216 = arith.constant 6 : index
      %c0_217 = arith.constant 0 : index
      %164 = vector.load %arg3[%c0_214, %c0_215, %c6_216, %c0_217] : memref<2x7x7x4xf32, #tpu.memory_space<vmem>>, vector<1x1x1x4xf32>
      %165 = vector.shape_cast %164 : vector<1x1x1x4xf32> to vector<4xf32>
      %c1_218 = arith.constant 1 : index
      %c0_219 = arith.constant 0 : index
      %c6_220 = arith.constant 6 : index
      %c0_221 = arith.constant 0 : index
      %166 = vector.load %arg3[%c1_218, %c0_219, %c6_220, %c0_221] : memref<2x7x7x4xf32, #tpu.memory_space<vmem>>, vector<1x1x1x4xf32>
      %167 = vector.shape_cast %166 : vector<1x1x1x4xf32> to vector<4xf32>
      %168 = vector.extract_strided_slice %75 {offsets = [6, 0], sizes = [16, 4], strides = [1, 1]} : vector<22x4xf32> to vector<16x4xf32>
      %169 = vector.shape_cast %165 : vector<4xf32> to vector<1x4xf32>
      %170 = vector.broadcast %169 : vector<1x4xf32> to vector<16x4xf32>
      %171 = arith.mulf %168, %170 : vector<16x4xf32>
      %172 = arith.addf %163, %171 : vector<16x4xf32>
      %173 = vector.extract_strided_slice %79 {offsets = [6, 0], sizes = [16, 4], strides = [1, 1]} : vector<22x4xf32> to vector<16x4xf32>
      %174 = vector.shape_cast %167 : vector<4xf32> to vector<1x4xf32>
      %175 = vector.broadcast %174 : vector<1x4xf32> to vector<16x4xf32>
      %176 = arith.mulf %173, %175 : vector<16x4xf32>
      %177 = arith.addf %172, %176 : vector<16x4xf32>
      %c1_i32_222 = arith.constant 1 : i32
      %178 = arith.addi %70, %c1_i32_222 : i32
      %179 = arith.index_cast %178 : i32 to index
      %c0_223 = arith.constant 0 : index
      %c0_224 = arith.constant 0 : index
      %180 = vector.load %arg6[%179, %c0_223, %c0_224] : memref<22x22x4xf32, #tpu.memory_space<vmem>>, vector<1x22x4xf32>
      %181 = vector.shape_cast %180 : vector<1x22x4xf32> to vector<22x4xf32>
      %c1_i32_225 = arith.constant 1 : i32
      %182 = arith.addi %70, %c1_i32_225 : i32
      %183 = arith.index_cast %182 : i32 to index
      %c0_226 = arith.constant 0 : index
      %c0_227 = arith.constant 0 : index
      %184 = vector.load %arg7[%183, %c0_226, %c0_227] : memref<22x22x4xf32, #tpu.memory_space<vmem>>, vector<1x22x4xf32>
      %185 = vector.shape_cast %184 : vector<1x22x4xf32> to vector<22x4xf32>
      %c0_228 = arith.constant 0 : index
      %c1_229 = arith.constant 1 : index
      %c0_230 = arith.constant 0 : index
      %c0_231 = arith.constant 0 : index
      %186 = vector.load %arg3[%c0_228, %c1_229, %c0_230, %c0_231] : memref<2x7x7x4xf32, #tpu.memory_space<vmem>>, vector<1x1x1x4xf32>
      %187 = vector.shape_cast %186 : vector<1x1x1x4xf32> to vector<4xf32>
      %c1_232 = arith.constant 1 : index
      %c1_233 = arith.constant 1 : index
      %c0_234 = arith.constant 0 : index
      %c0_235 = arith.constant 0 : index
      %188 = vector.load %arg3[%c1_232, %c1_233, %c0_234, %c0_235] : memref<2x7x7x4xf32, #tpu.memory_space<vmem>>, vector<1x1x1x4xf32>
      %189 = vector.shape_cast %188 : vector<1x1x1x4xf32> to vector<4xf32>
      %190 = vector.extract_strided_slice %181 {offsets = [0, 0], sizes = [16, 4], strides = [1, 1]} : vector<22x4xf32> to vector<16x4xf32>
      %191 = vector.shape_cast %187 : vector<4xf32> to vector<1x4xf32>
      %192 = vector.broadcast %191 : vector<1x4xf32> to vector<16x4xf32>
      %193 = arith.mulf %190, %192 : vector<16x4xf32>
      %194 = arith.addf %177, %193 : vector<16x4xf32>
      %195 = vector.extract_strided_slice %185 {offsets = [0, 0], sizes = [16, 4], strides = [1, 1]} : vector<22x4xf32> to vector<16x4xf32>
      %196 = vector.shape_cast %189 : vector<4xf32> to vector<1x4xf32>
      %197 = vector.broadcast %196 : vector<1x4xf32> to vector<16x4xf32>
      %198 = arith.mulf %195, %197 : vector<16x4xf32>
      %199 = arith.addf %194, %198 : vector<16x4xf32>
      %c0_236 = arith.constant 0 : index
      %c1_237 = arith.constant 1 : index
      %c1_238 = arith.constant 1 : index
      %c0_239 = arith.constant 0 : index
      %200 = vector.load %arg3[%c0_236, %c1_237, %c1_238, %c0_239] : memref<2x7x7x4xf32, #tpu.memory_space<vmem>>, vector<1x1x1x4xf32>
      %201 = vector.shape_cast %200 : vector<1x1x1x4xf32> to vector<4xf32>
      %c1_240 = arith.constant 1 : index
      %c1_241 = arith.constant 1 : index
      %c1_242 = arith.constant 1 : index
      %c0_243 = arith.constant 0 : index
      %202 = vector.load %arg3[%c1_240, %c1_241, %c1_242, %c0_243] : memref<2x7x7x4xf32, #tpu.memory_space<vmem>>, vector<1x1x1x4xf32>
      %203 = vector.shape_cast %202 : vector<1x1x1x4xf32> to vector<4xf32>
      %204 = vector.extract_strided_slice %181 {offsets = [1, 0], sizes = [16, 4], strides = [1, 1]} : vector<22x4xf32> to vector<16x4xf32>
      %205 = vector.shape_cast %201 : vector<4xf32> to vector<1x4xf32>
      %206 = vector.broadcast %205 : vector<1x4xf32> to vector<16x4xf32>
      %207 = arith.mulf %204, %206 : vector<16x4xf32>
      %208 = arith.addf %199, %207 : vector<16x4xf32>
      %209 = vector.extract_strided_slice %185 {offsets = [1, 0], sizes = [16, 4], strides = [1, 1]} : vector<22x4xf32> to vector<16x4xf32>
      %210 = vector.shape_cast %203 : vector<4xf32> to vector<1x4xf32>
      %211 = vector.broadcast %210 : vector<1x4xf32> to vector<16x4xf32>
      %212 = arith.mulf %209, %211 : vector<16x4xf32>
      %213 = arith.addf %208, %212 : vector<16x4xf32>
      %c0_244 = arith.constant 0 : index
      %c1_245 = arith.constant 1 : index
      %c2_246 = arith.constant 2 : index
      %c0_247 = arith.constant 0 : index
      %214 = vector.load %arg3[%c0_244, %c1_245, %c2_246, %c0_247] : memref<2x7x7x4xf32, #tpu.memory_space<vmem>>, vector<1x1x1x4xf32>
      %215 = vector.shape_cast %214 : vector<1x1x1x4xf32> to vector<4xf32>
      %c1_248 = arith.constant 1 : index
      %c1_249 = arith.constant 1 : index
      %c2_250 = arith.constant 2 : index
      %c0_251 = arith.constant 0 : index
      %216 = vector.load %arg3[%c1_248, %c1_249, %c2_250, %c0_251] : memref<2x7x7x4xf32, #tpu.memory_space<vmem>>, vector<1x1x1x4xf32>
      %217 = vector.shape_cast %216 : vector<1x1x1x4xf32> to vector<4xf32>
      %218 = vector.extract_strided_slice %181 {offsets = [2, 0], sizes = [16, 4], strides = [1, 1]} : vector<22x4xf32> to vector<16x4xf32>
      %219 = vector.shape_cast %215 : vector<4xf32> to vector<1x4xf32>
      %220 = vector.broadcast %219 : vector<1x4xf32> to vector<16x4xf32>
      %221 = arith.mulf %218, %220 : vector<16x4xf32>
      %222 = arith.addf %213, %221 : vector<16x4xf32>
      %223 = vector.extract_strided_slice %185 {offsets = [2, 0], sizes = [16, 4], strides = [1, 1]} : vector<22x4xf32> to vector<16x4xf32>
      %224 = vector.shape_cast %217 : vector<4xf32> to vector<1x4xf32>
      %225 = vector.broadcast %224 : vector<1x4xf32> to vector<16x4xf32>
      %226 = arith.mulf %223, %225 : vector<16x4xf32>
      %227 = arith.addf %222, %226 : vector<16x4xf32>
      %c0_252 = arith.constant 0 : index
      %c1_253 = arith.constant 1 : index
      %c3_254 = arith.constant 3 : index
      %c0_255 = arith.constant 0 : index
      %228 = vector.load %arg3[%c0_252, %c1_253, %c3_254, %c0_255] : memref<2x7x7x4xf32, #tpu.memory_space<vmem>>, vector<1x1x1x4xf32>
      %229 = vector.shape_cast %228 : vector<1x1x1x4xf32> to vector<4xf32>
      %c1_256 = arith.constant 1 : index
      %c1_257 = arith.constant 1 : index
      %c3_258 = arith.constant 3 : index
      %c0_259 = arith.constant 0 : index
      %230 = vector.load %arg3[%c1_256, %c1_257, %c3_258, %c0_259] : memref<2x7x7x4xf32, #tpu.memory_space<vmem>>, vector<1x1x1x4xf32>
      %231 = vector.shape_cast %230 : vector<1x1x1x4xf32> to vector<4xf32>
      %232 = vector.extract_strided_slice %181 {offsets = [3, 0], sizes = [16, 4], strides = [1, 1]} : vector<22x4xf32> to vector<16x4xf32>
      %233 = vector.shape_cast %229 : vector<4xf32> to vector<1x4xf32>
      %234 = vector.broadcast %233 : vector<1x4xf32> to vector<16x4xf32>
      %235 = arith.mulf %232, %234 : vector<16x4xf32>
      %236 = arith.addf %227, %235 : vector<16x4xf32>
      %237 = vector.extract_strided_slice %185 {offsets = [3, 0], sizes = [16, 4], strides = [1, 1]} : vector<22x4xf32> to vector<16x4xf32>
      %238 = vector.shape_cast %231 : vector<4xf32> to vector<1x4xf32>
      %239 = vector.broadcast %238 : vector<1x4xf32> to vector<16x4xf32>
      %240 = arith.mulf %237, %239 : vector<16x4xf32>
      %241 = arith.addf %236, %240 : vector<16x4xf32>
      %c0_260 = arith.constant 0 : index
      %c1_261 = arith.constant 1 : index
      %c4_262 = arith.constant 4 : index
      %c0_263 = arith.constant 0 : index
      %242 = vector.load %arg3[%c0_260, %c1_261, %c4_262, %c0_263] : memref<2x7x7x4xf32, #tpu.memory_space<vmem>>, vector<1x1x1x4xf32>
      %243 = vector.shape_cast %242 : vector<1x1x1x4xf32> to vector<4xf32>
      %c1_264 = arith.constant 1 : index
      %c1_265 = arith.constant 1 : index
      %c4_266 = arith.constant 4 : index
      %c0_267 = arith.constant 0 : index
      %244 = vector.load %arg3[%c1_264, %c1_265, %c4_266, %c0_267] : memref<2x7x7x4xf32, #tpu.memory_space<vmem>>, vector<1x1x1x4xf32>
      %245 = vector.shape_cast %244 : vector<1x1x1x4xf32> to vector<4xf32>
      %246 = vector.extract_strided_slice %181 {offsets = [4, 0], sizes = [16, 4], strides = [1, 1]} : vector<22x4xf32> to vector<16x4xf32>
      %247 = vector.shape_cast %243 : vector<4xf32> to vector<1x4xf32>
      %248 = vector.broadcast %247 : vector<1x4xf32> to vector<16x4xf32>
      %249 = arith.mulf %246, %248 : vector<16x4xf32>
      %250 = arith.addf %241, %249 : vector<16x4xf32>
      %251 = vector.extract_strided_slice %185 {offsets = [4, 0], sizes = [16, 4], strides = [1, 1]} : vector<22x4xf32> to vector<16x4xf32>
      %252 = vector.shape_cast %245 : vector<4xf32> to vector<1x4xf32>
      %253 = vector.broadcast %252 : vector<1x4xf32> to vector<16x4xf32>
      %254 = arith.mulf %251, %253 : vector<16x4xf32>
      %255 = arith.addf %250, %254 : vector<16x4xf32>
      %c0_268 = arith.constant 0 : index
      %c1_269 = arith.constant 1 : index
      %c5_270 = arith.constant 5 : index
      %c0_271 = arith.constant 0 : index
      %256 = vector.load %arg3[%c0_268, %c1_269, %c5_270, %c0_271] : memref<2x7x7x4xf32, #tpu.memory_space<vmem>>, vector<1x1x1x4xf32>
      %257 = vector.shape_cast %256 : vector<1x1x1x4xf32> to vector<4xf32>
      %c1_272 = arith.constant 1 : index
      %c1_273 = arith.constant 1 : index
      %c5_274 = arith.constant 5 : index
      %c0_275 = arith.constant 0 : index
      %258 = vector.load %arg3[%c1_272, %c1_273, %c5_274, %c0_275] : memref<2x7x7x4xf32, #tpu.memory_space<vmem>>, vector<1x1x1x4xf32>
      %259 = vector.shape_cast %258 : vector<1x1x1x4xf32> to vector<4xf32>
      %260 = vector.extract_strided_slice %181 {offsets = [5, 0], sizes = [16, 4], strides = [1, 1]} : vector<22x4xf32> to vector<16x4xf32>
      %261 = vector.shape_cast %257 : vector<4xf32> to vector<1x4xf32>
      %262 = vector.broadcast %261 : vector<1x4xf32> to vector<16x4xf32>
      %263 = arith.mulf %260, %262 : vector<16x4xf32>
      %264 = arith.addf %255, %263 : vector<16x4xf32>
      %265 = vector.extract_strided_slice %185 {offsets = [5, 0], sizes = [16, 4], strides = [1, 1]} : vector<22x4xf32> to vector<16x4xf32>
      %266 = vector.shape_cast %259 : vector<4xf32> to vector<1x4xf32>
      %267 = vector.broadcast %266 : vector<1x4xf32> to vector<16x4xf32>
      %268 = arith.mulf %265, %267 : vector<16x4xf32>
      %269 = arith.addf %264, %268 : vector<16x4xf32>
      %c0_276 = arith.constant 0 : index
      %c1_277 = arith.constant 1 : index
      %c6_278 = arith.constant 6 : index
      %c0_279 = arith.constant 0 : index
      %270 = vector.load %arg3[%c0_276, %c1_277, %c6_278, %c0_279] : memref<2x7x7x4xf32, #tpu.memory_space<vmem>>, vector<1x1x1x4xf32>
      %271 = vector.shape_cast %270 : vector<1x1x1x4xf32> to vector<4xf32>
      %c1_280 = arith.constant 1 : index
      %c1_281 = arith.constant 1 : index
      %c6_282 = arith.constant 6 : index
      %c0_283 = arith.constant 0 : index
      %272 = vector.load %arg3[%c1_280, %c1_281, %c6_282, %c0_283] : memref<2x7x7x4xf32, #tpu.memory_space<vmem>>, vector<1x1x1x4xf32>
      %273 = vector.shape_cast %272 : vector<1x1x1x4xf32> to vector<4xf32>
      %274 = vector.extract_strided_slice %181 {offsets = [6, 0], sizes = [16, 4], strides = [1, 1]} : vector<22x4xf32> to vector<16x4xf32>
      %275 = vector.shape_cast %271 : vector<4xf32> to vector<1x4xf32>
      %276 = vector.broadcast %275 : vector<1x4xf32> to vector<16x4xf32>
      %277 = arith.mulf %274, %276 : vector<16x4xf32>
      %278 = arith.addf %269, %277 : vector<16x4xf32>
      %279 = vector.extract_strided_slice %185 {offsets = [6, 0], sizes = [16, 4], strides = [1, 1]} : vector<22x4xf32> to vector<16x4xf32>
      %280 = vector.shape_cast %273 : vector<4xf32> to vector<1x4xf32>
      %281 = vector.broadcast %280 : vector<1x4xf32> to vector<16x4xf32>
      %282 = arith.mulf %279, %281 : vector<16x4xf32>
      %283 = arith.addf %278, %282 : vector<16x4xf32>
      %c2_i32 = arith.constant 2 : i32
      %284 = arith.addi %70, %c2_i32 : i32
      %285 = arith.index_cast %284 : i32 to index
      %c0_284 = arith.constant 0 : index
      %c0_285 = arith.constant 0 : index
      %286 = vector.load %arg6[%285, %c0_284, %c0_285] : memref<22x22x4xf32, #tpu.memory_space<vmem>>, vector<1x22x4xf32>
      %287 = vector.shape_cast %286 : vector<1x22x4xf32> to vector<22x4xf32>
      %c2_i32_286 = arith.constant 2 : i32
      %288 = arith.addi %70, %c2_i32_286 : i32
      %289 = arith.index_cast %288 : i32 to index
      %c0_287 = arith.constant 0 : index
      %c0_288 = arith.constant 0 : index
      %290 = vector.load %arg7[%289, %c0_287, %c0_288] : memref<22x22x4xf32, #tpu.memory_space<vmem>>, vector<1x22x4xf32>
      %291 = vector.shape_cast %290 : vector<1x22x4xf32> to vector<22x4xf32>
      %c0_289 = arith.constant 0 : index
      %c2_290 = arith.constant 2 : index
      %c0_291 = arith.constant 0 : index
      %c0_292 = arith.constant 0 : index
      %292 = vector.load %arg3[%c0_289, %c2_290, %c0_291, %c0_292] : memref<2x7x7x4xf32, #tpu.memory_space<vmem>>, vector<1x1x1x4xf32>
      %293 = vector.shape_cast %292 : vector<1x1x1x4xf32> to vector<4xf32>
      %c1_293 = arith.constant 1 : index
      %c2_294 = arith.constant 2 : index
      %c0_295 = arith.constant 0 : index
      %c0_296 = arith.constant 0 : index
      %294 = vector.load %arg3[%c1_293, %c2_294, %c0_295, %c0_296] : memref<2x7x7x4xf32, #tpu.memory_space<vmem>>, vector<1x1x1x4xf32>
      %295 = vector.shape_cast %294 : vector<1x1x1x4xf32> to vector<4xf32>
      %296 = vector.extract_strided_slice %287 {offsets = [0, 0], sizes = [16, 4], strides = [1, 1]} : vector<22x4xf32> to vector<16x4xf32>
      %297 = vector.shape_cast %293 : vector<4xf32> to vector<1x4xf32>
      %298 = vector.broadcast %297 : vector<1x4xf32> to vector<16x4xf32>
      %299 = arith.mulf %296, %298 : vector<16x4xf32>
      %300 = arith.addf %283, %299 : vector<16x4xf32>
      %301 = vector.extract_strided_slice %291 {offsets = [0, 0], sizes = [16, 4], strides = [1, 1]} : vector<22x4xf32> to vector<16x4xf32>
      %302 = vector.shape_cast %295 : vector<4xf32> to vector<1x4xf32>
      %303 = vector.broadcast %302 : vector<1x4xf32> to vector<16x4xf32>
      %304 = arith.mulf %301, %303 : vector<16x4xf32>
      %305 = arith.addf %300, %304 : vector<16x4xf32>
      %c0_297 = arith.constant 0 : index
      %c2_298 = arith.constant 2 : index
      %c1_299 = arith.constant 1 : index
      %c0_300 = arith.constant 0 : index
      %306 = vector.load %arg3[%c0_297, %c2_298, %c1_299, %c0_300] : memref<2x7x7x4xf32, #tpu.memory_space<vmem>>, vector<1x1x1x4xf32>
      %307 = vector.shape_cast %306 : vector<1x1x1x4xf32> to vector<4xf32>
      %c1_301 = arith.constant 1 : index
      %c2_302 = arith.constant 2 : index
      %c1_303 = arith.constant 1 : index
      %c0_304 = arith.constant 0 : index
      %308 = vector.load %arg3[%c1_301, %c2_302, %c1_303, %c0_304] : memref<2x7x7x4xf32, #tpu.memory_space<vmem>>, vector<1x1x1x4xf32>
      %309 = vector.shape_cast %308 : vector<1x1x1x4xf32> to vector<4xf32>
      %310 = vector.extract_strided_slice %287 {offsets = [1, 0], sizes = [16, 4], strides = [1, 1]} : vector<22x4xf32> to vector<16x4xf32>
      %311 = vector.shape_cast %307 : vector<4xf32> to vector<1x4xf32>
      %312 = vector.broadcast %311 : vector<1x4xf32> to vector<16x4xf32>
      %313 = arith.mulf %310, %312 : vector<16x4xf32>
      %314 = arith.addf %305, %313 : vector<16x4xf32>
      %315 = vector.extract_strided_slice %291 {offsets = [1, 0], sizes = [16, 4], strides = [1, 1]} : vector<22x4xf32> to vector<16x4xf32>
      %316 = vector.shape_cast %309 : vector<4xf32> to vector<1x4xf32>
      %317 = vector.broadcast %316 : vector<1x4xf32> to vector<16x4xf32>
      %318 = arith.mulf %315, %317 : vector<16x4xf32>
      %319 = arith.addf %314, %318 : vector<16x4xf32>
      %c0_305 = arith.constant 0 : index
      %c2_306 = arith.constant 2 : index
      %c2_307 = arith.constant 2 : index
      %c0_308 = arith.constant 0 : index
      %320 = vector.load %arg3[%c0_305, %c2_306, %c2_307, %c0_308] : memref<2x7x7x4xf32, #tpu.memory_space<vmem>>, vector<1x1x1x4xf32>
      %321 = vector.shape_cast %320 : vector<1x1x1x4xf32> to vector<4xf32>
      %c1_309 = arith.constant 1 : index
      %c2_310 = arith.constant 2 : index
      %c2_311 = arith.constant 2 : index
      %c0_312 = arith.constant 0 : index
      %322 = vector.load %arg3[%c1_309, %c2_310, %c2_311, %c0_312] : memref<2x7x7x4xf32, #tpu.memory_space<vmem>>, vector<1x1x1x4xf32>
      %323 = vector.shape_cast %322 : vector<1x1x1x4xf32> to vector<4xf32>
      %324 = vector.extract_strided_slice %287 {offsets = [2, 0], sizes = [16, 4], strides = [1, 1]} : vector<22x4xf32> to vector<16x4xf32>
      %325 = vector.shape_cast %321 : vector<4xf32> to vector<1x4xf32>
      %326 = vector.broadcast %325 : vector<1x4xf32> to vector<16x4xf32>
      %327 = arith.mulf %324, %326 : vector<16x4xf32>
      %328 = arith.addf %319, %327 : vector<16x4xf32>
      %329 = vector.extract_strided_slice %291 {offsets = [2, 0], sizes = [16, 4], strides = [1, 1]} : vector<22x4xf32> to vector<16x4xf32>
      %330 = vector.shape_cast %323 : vector<4xf32> to vector<1x4xf32>
      %331 = vector.broadcast %330 : vector<1x4xf32> to vector<16x4xf32>
      %332 = arith.mulf %329, %331 : vector<16x4xf32>
      %333 = arith.addf %328, %332 : vector<16x4xf32>
      %c0_313 = arith.constant 0 : index
      %c2_314 = arith.constant 2 : index
      %c3_315 = arith.constant 3 : index
      %c0_316 = arith.constant 0 : index
      %334 = vector.load %arg3[%c0_313, %c2_314, %c3_315, %c0_316] : memref<2x7x7x4xf32, #tpu.memory_space<vmem>>, vector<1x1x1x4xf32>
      %335 = vector.shape_cast %334 : vector<1x1x1x4xf32> to vector<4xf32>
      %c1_317 = arith.constant 1 : index
      %c2_318 = arith.constant 2 : index
      %c3_319 = arith.constant 3 : index
      %c0_320 = arith.constant 0 : index
      %336 = vector.load %arg3[%c1_317, %c2_318, %c3_319, %c0_320] : memref<2x7x7x4xf32, #tpu.memory_space<vmem>>, vector<1x1x1x4xf32>
      %337 = vector.shape_cast %336 : vector<1x1x1x4xf32> to vector<4xf32>
      %338 = vector.extract_strided_slice %287 {offsets = [3, 0], sizes = [16, 4], strides = [1, 1]} : vector<22x4xf32> to vector<16x4xf32>
      %339 = vector.shape_cast %335 : vector<4xf32> to vector<1x4xf32>
      %340 = vector.broadcast %339 : vector<1x4xf32> to vector<16x4xf32>
      %341 = arith.mulf %338, %340 : vector<16x4xf32>
      %342 = arith.addf %333, %341 : vector<16x4xf32>
      %343 = vector.extract_strided_slice %291 {offsets = [3, 0], sizes = [16, 4], strides = [1, 1]} : vector<22x4xf32> to vector<16x4xf32>
      %344 = vector.shape_cast %337 : vector<4xf32> to vector<1x4xf32>
      %345 = vector.broadcast %344 : vector<1x4xf32> to vector<16x4xf32>
      %346 = arith.mulf %343, %345 : vector<16x4xf32>
      %347 = arith.addf %342, %346 : vector<16x4xf32>
      %c0_321 = arith.constant 0 : index
      %c2_322 = arith.constant 2 : index
      %c4_323 = arith.constant 4 : index
      %c0_324 = arith.constant 0 : index
      %348 = vector.load %arg3[%c0_321, %c2_322, %c4_323, %c0_324] : memref<2x7x7x4xf32, #tpu.memory_space<vmem>>, vector<1x1x1x4xf32>
      %349 = vector.shape_cast %348 : vector<1x1x1x4xf32> to vector<4xf32>
      %c1_325 = arith.constant 1 : index
      %c2_326 = arith.constant 2 : index
      %c4_327 = arith.constant 4 : index
      %c0_328 = arith.constant 0 : index
      %350 = vector.load %arg3[%c1_325, %c2_326, %c4_327, %c0_328] : memref<2x7x7x4xf32, #tpu.memory_space<vmem>>, vector<1x1x1x4xf32>
      %351 = vector.shape_cast %350 : vector<1x1x1x4xf32> to vector<4xf32>
      %352 = vector.extract_strided_slice %287 {offsets = [4, 0], sizes = [16, 4], strides = [1, 1]} : vector<22x4xf32> to vector<16x4xf32>
      %353 = vector.shape_cast %349 : vector<4xf32> to vector<1x4xf32>
      %354 = vector.broadcast %353 : vector<1x4xf32> to vector<16x4xf32>
      %355 = arith.mulf %352, %354 : vector<16x4xf32>
      %356 = arith.addf %347, %355 : vector<16x4xf32>
      %357 = vector.extract_strided_slice %291 {offsets = [4, 0], sizes = [16, 4], strides = [1, 1]} : vector<22x4xf32> to vector<16x4xf32>
      %358 = vector.shape_cast %351 : vector<4xf32> to vector<1x4xf32>
      %359 = vector.broadcast %358 : vector<1x4xf32> to vector<16x4xf32>
      %360 = arith.mulf %357, %359 : vector<16x4xf32>
      %361 = arith.addf %356, %360 : vector<16x4xf32>
      %c0_329 = arith.constant 0 : index
      %c2_330 = arith.constant 2 : index
      %c5_331 = arith.constant 5 : index
      %c0_332 = arith.constant 0 : index
      %362 = vector.load %arg3[%c0_329, %c2_330, %c5_331, %c0_332] : memref<2x7x7x4xf32, #tpu.memory_space<vmem>>, vector<1x1x1x4xf32>
      %363 = vector.shape_cast %362 : vector<1x1x1x4xf32> to vector<4xf32>
      %c1_333 = arith.constant 1 : index
      %c2_334 = arith.constant 2 : index
      %c5_335 = arith.constant 5 : index
      %c0_336 = arith.constant 0 : index
      %364 = vector.load %arg3[%c1_333, %c2_334, %c5_335, %c0_336] : memref<2x7x7x4xf32, #tpu.memory_space<vmem>>, vector<1x1x1x4xf32>
      %365 = vector.shape_cast %364 : vector<1x1x1x4xf32> to vector<4xf32>
      %366 = vector.extract_strided_slice %287 {offsets = [5, 0], sizes = [16, 4], strides = [1, 1]} : vector<22x4xf32> to vector<16x4xf32>
      %367 = vector.shape_cast %363 : vector<4xf32> to vector<1x4xf32>
      %368 = vector.broadcast %367 : vector<1x4xf32> to vector<16x4xf32>
      %369 = arith.mulf %366, %368 : vector<16x4xf32>
      %370 = arith.addf %361, %369 : vector<16x4xf32>
      %371 = vector.extract_strided_slice %291 {offsets = [5, 0], sizes = [16, 4], strides = [1, 1]} : vector<22x4xf32> to vector<16x4xf32>
      %372 = vector.shape_cast %365 : vector<4xf32> to vector<1x4xf32>
      %373 = vector.broadcast %372 : vector<1x4xf32> to vector<16x4xf32>
      %374 = arith.mulf %371, %373 : vector<16x4xf32>
      %375 = arith.addf %370, %374 : vector<16x4xf32>
      %c0_337 = arith.constant 0 : index
      %c2_338 = arith.constant 2 : index
      %c6_339 = arith.constant 6 : index
      %c0_340 = arith.constant 0 : index
      %376 = vector.load %arg3[%c0_337, %c2_338, %c6_339, %c0_340] : memref<2x7x7x4xf32, #tpu.memory_space<vmem>>, vector<1x1x1x4xf32>
      %377 = vector.shape_cast %376 : vector<1x1x1x4xf32> to vector<4xf32>
      %c1_341 = arith.constant 1 : index
      %c2_342 = arith.constant 2 : index
      %c6_343 = arith.constant 6 : index
      %c0_344 = arith.constant 0 : index
      %378 = vector.load %arg3[%c1_341, %c2_342, %c6_343, %c0_344] : memref<2x7x7x4xf32, #tpu.memory_space<vmem>>, vector<1x1x1x4xf32>
      %379 = vector.shape_cast %378 : vector<1x1x1x4xf32> to vector<4xf32>
      %380 = vector.extract_strided_slice %287 {offsets = [6, 0], sizes = [16, 4], strides = [1, 1]} : vector<22x4xf32> to vector<16x4xf32>
      %381 = vector.shape_cast %377 : vector<4xf32> to vector<1x4xf32>
      %382 = vector.broadcast %381 : vector<1x4xf32> to vector<16x4xf32>
      %383 = arith.mulf %380, %382 : vector<16x4xf32>
      %384 = arith.addf %375, %383 : vector<16x4xf32>
      %385 = vector.extract_strided_slice %291 {offsets = [6, 0], sizes = [16, 4], strides = [1, 1]} : vector<22x4xf32> to vector<16x4xf32>
      %386 = vector.shape_cast %379 : vector<4xf32> to vector<1x4xf32>
      %387 = vector.broadcast %386 : vector<1x4xf32> to vector<16x4xf32>
      %388 = arith.mulf %385, %387 : vector<16x4xf32>
      %389 = arith.addf %384, %388 : vector<16x4xf32>
      %c3_i32 = arith.constant 3 : i32
      %390 = arith.addi %70, %c3_i32 : i32
      %391 = arith.index_cast %390 : i32 to index
      %c0_345 = arith.constant 0 : index
      %c0_346 = arith.constant 0 : index
      %392 = vector.load %arg6[%391, %c0_345, %c0_346] : memref<22x22x4xf32, #tpu.memory_space<vmem>>, vector<1x22x4xf32>
      %393 = vector.shape_cast %392 : vector<1x22x4xf32> to vector<22x4xf32>
      %c3_i32_347 = arith.constant 3 : i32
      %394 = arith.addi %70, %c3_i32_347 : i32
      %395 = arith.index_cast %394 : i32 to index
      %c0_348 = arith.constant 0 : index
      %c0_349 = arith.constant 0 : index
      %396 = vector.load %arg7[%395, %c0_348, %c0_349] : memref<22x22x4xf32, #tpu.memory_space<vmem>>, vector<1x22x4xf32>
      %397 = vector.shape_cast %396 : vector<1x22x4xf32> to vector<22x4xf32>
      %c0_350 = arith.constant 0 : index
      %c3_351 = arith.constant 3 : index
      %c0_352 = arith.constant 0 : index
      %c0_353 = arith.constant 0 : index
      %398 = vector.load %arg3[%c0_350, %c3_351, %c0_352, %c0_353] : memref<2x7x7x4xf32, #tpu.memory_space<vmem>>, vector<1x1x1x4xf32>
      %399 = vector.shape_cast %398 : vector<1x1x1x4xf32> to vector<4xf32>
      %c1_354 = arith.constant 1 : index
      %c3_355 = arith.constant 3 : index
      %c0_356 = arith.constant 0 : index
      %c0_357 = arith.constant 0 : index
      %400 = vector.load %arg3[%c1_354, %c3_355, %c0_356, %c0_357] : memref<2x7x7x4xf32, #tpu.memory_space<vmem>>, vector<1x1x1x4xf32>
      %401 = vector.shape_cast %400 : vector<1x1x1x4xf32> to vector<4xf32>
      %402 = vector.extract_strided_slice %393 {offsets = [0, 0], sizes = [16, 4], strides = [1, 1]} : vector<22x4xf32> to vector<16x4xf32>
      %403 = vector.shape_cast %399 : vector<4xf32> to vector<1x4xf32>
      %404 = vector.broadcast %403 : vector<1x4xf32> to vector<16x4xf32>
      %405 = arith.mulf %402, %404 : vector<16x4xf32>
      %406 = arith.addf %389, %405 : vector<16x4xf32>
      %407 = vector.extract_strided_slice %397 {offsets = [0, 0], sizes = [16, 4], strides = [1, 1]} : vector<22x4xf32> to vector<16x4xf32>
      %408 = vector.shape_cast %401 : vector<4xf32> to vector<1x4xf32>
      %409 = vector.broadcast %408 : vector<1x4xf32> to vector<16x4xf32>
      %410 = arith.mulf %407, %409 : vector<16x4xf32>
      %411 = arith.addf %406, %410 : vector<16x4xf32>
      %c0_358 = arith.constant 0 : index
      %c3_359 = arith.constant 3 : index
      %c1_360 = arith.constant 1 : index
      %c0_361 = arith.constant 0 : index
      %412 = vector.load %arg3[%c0_358, %c3_359, %c1_360, %c0_361] : memref<2x7x7x4xf32, #tpu.memory_space<vmem>>, vector<1x1x1x4xf32>
      %413 = vector.shape_cast %412 : vector<1x1x1x4xf32> to vector<4xf32>
      %c1_362 = arith.constant 1 : index
      %c3_363 = arith.constant 3 : index
      %c1_364 = arith.constant 1 : index
      %c0_365 = arith.constant 0 : index
      %414 = vector.load %arg3[%c1_362, %c3_363, %c1_364, %c0_365] : memref<2x7x7x4xf32, #tpu.memory_space<vmem>>, vector<1x1x1x4xf32>
      %415 = vector.shape_cast %414 : vector<1x1x1x4xf32> to vector<4xf32>
      %416 = vector.extract_strided_slice %393 {offsets = [1, 0], sizes = [16, 4], strides = [1, 1]} : vector<22x4xf32> to vector<16x4xf32>
      %417 = vector.shape_cast %413 : vector<4xf32> to vector<1x4xf32>
      %418 = vector.broadcast %417 : vector<1x4xf32> to vector<16x4xf32>
      %419 = arith.mulf %416, %418 : vector<16x4xf32>
      %420 = arith.addf %411, %419 : vector<16x4xf32>
      %421 = vector.extract_strided_slice %397 {offsets = [1, 0], sizes = [16, 4], strides = [1, 1]} : vector<22x4xf32> to vector<16x4xf32>
      %422 = vector.shape_cast %415 : vector<4xf32> to vector<1x4xf32>
      %423 = vector.broadcast %422 : vector<1x4xf32> to vector<16x4xf32>
      %424 = arith.mulf %421, %423 : vector<16x4xf32>
      %425 = arith.addf %420, %424 : vector<16x4xf32>
      %c0_366 = arith.constant 0 : index
      %c3_367 = arith.constant 3 : index
      %c2_368 = arith.constant 2 : index
      %c0_369 = arith.constant 0 : index
      %426 = vector.load %arg3[%c0_366, %c3_367, %c2_368, %c0_369] : memref<2x7x7x4xf32, #tpu.memory_space<vmem>>, vector<1x1x1x4xf32>
      %427 = vector.shape_cast %426 : vector<1x1x1x4xf32> to vector<4xf32>
      %c1_370 = arith.constant 1 : index
      %c3_371 = arith.constant 3 : index
      %c2_372 = arith.constant 2 : index
      %c0_373 = arith.constant 0 : index
      %428 = vector.load %arg3[%c1_370, %c3_371, %c2_372, %c0_373] : memref<2x7x7x4xf32, #tpu.memory_space<vmem>>, vector<1x1x1x4xf32>
      %429 = vector.shape_cast %428 : vector<1x1x1x4xf32> to vector<4xf32>
      %430 = vector.extract_strided_slice %393 {offsets = [2, 0], sizes = [16, 4], strides = [1, 1]} : vector<22x4xf32> to vector<16x4xf32>
      %431 = vector.shape_cast %427 : vector<4xf32> to vector<1x4xf32>
      %432 = vector.broadcast %431 : vector<1x4xf32> to vector<16x4xf32>
      %433 = arith.mulf %430, %432 : vector<16x4xf32>
      %434 = arith.addf %425, %433 : vector<16x4xf32>
      %435 = vector.extract_strided_slice %397 {offsets = [2, 0], sizes = [16, 4], strides = [1, 1]} : vector<22x4xf32> to vector<16x4xf32>
      %436 = vector.shape_cast %429 : vector<4xf32> to vector<1x4xf32>
      %437 = vector.broadcast %436 : vector<1x4xf32> to vector<16x4xf32>
      %438 = arith.mulf %435, %437 : vector<16x4xf32>
      %439 = arith.addf %434, %438 : vector<16x4xf32>
      %c0_374 = arith.constant 0 : index
      %c3_375 = arith.constant 3 : index
      %c3_376 = arith.constant 3 : index
      %c0_377 = arith.constant 0 : index
      %440 = vector.load %arg3[%c0_374, %c3_375, %c3_376, %c0_377] : memref<2x7x7x4xf32, #tpu.memory_space<vmem>>, vector<1x1x1x4xf32>
      %441 = vector.shape_cast %440 : vector<1x1x1x4xf32> to vector<4xf32>
      %c1_378 = arith.constant 1 : index
      %c3_379 = arith.constant 3 : index
      %c3_380 = arith.constant 3 : index
      %c0_381 = arith.constant 0 : index
      %442 = vector.load %arg3[%c1_378, %c3_379, %c3_380, %c0_381] : memref<2x7x7x4xf32, #tpu.memory_space<vmem>>, vector<1x1x1x4xf32>
      %443 = vector.shape_cast %442 : vector<1x1x1x4xf32> to vector<4xf32>
      %444 = vector.extract_strided_slice %393 {offsets = [3, 0], sizes = [16, 4], strides = [1, 1]} : vector<22x4xf32> to vector<16x4xf32>
      %445 = vector.shape_cast %441 : vector<4xf32> to vector<1x4xf32>
      %446 = vector.broadcast %445 : vector<1x4xf32> to vector<16x4xf32>
      %447 = arith.mulf %444, %446 : vector<16x4xf32>
      %448 = arith.addf %439, %447 : vector<16x4xf32>
      %449 = vector.extract_strided_slice %397 {offsets = [3, 0], sizes = [16, 4], strides = [1, 1]} : vector<22x4xf32> to vector<16x4xf32>
      %450 = vector.shape_cast %443 : vector<4xf32> to vector<1x4xf32>
      %451 = vector.broadcast %450 : vector<1x4xf32> to vector<16x4xf32>
      %452 = arith.mulf %449, %451 : vector<16x4xf32>
      %453 = arith.addf %448, %452 : vector<16x4xf32>
      %c0_382 = arith.constant 0 : index
      %c3_383 = arith.constant 3 : index
      %c4_384 = arith.constant 4 : index
      %c0_385 = arith.constant 0 : index
      %454 = vector.load %arg3[%c0_382, %c3_383, %c4_384, %c0_385] : memref<2x7x7x4xf32, #tpu.memory_space<vmem>>, vector<1x1x1x4xf32>
      %455 = vector.shape_cast %454 : vector<1x1x1x4xf32> to vector<4xf32>
      %c1_386 = arith.constant 1 : index
      %c3_387 = arith.constant 3 : index
      %c4_388 = arith.constant 4 : index
      %c0_389 = arith.constant 0 : index
      %456 = vector.load %arg3[%c1_386, %c3_387, %c4_388, %c0_389] : memref<2x7x7x4xf32, #tpu.memory_space<vmem>>, vector<1x1x1x4xf32>
      %457 = vector.shape_cast %456 : vector<1x1x1x4xf32> to vector<4xf32>
      %458 = vector.extract_strided_slice %393 {offsets = [4, 0], sizes = [16, 4], strides = [1, 1]} : vector<22x4xf32> to vector<16x4xf32>
      %459 = vector.shape_cast %455 : vector<4xf32> to vector<1x4xf32>
      %460 = vector.broadcast %459 : vector<1x4xf32> to vector<16x4xf32>
      %461 = arith.mulf %458, %460 : vector<16x4xf32>
      %462 = arith.addf %453, %461 : vector<16x4xf32>
      %463 = vector.extract_strided_slice %397 {offsets = [4, 0], sizes = [16, 4], strides = [1, 1]} : vector<22x4xf32> to vector<16x4xf32>
      %464 = vector.shape_cast %457 : vector<4xf32> to vector<1x4xf32>
      %465 = vector.broadcast %464 : vector<1x4xf32> to vector<16x4xf32>
      %466 = arith.mulf %463, %465 : vector<16x4xf32>
      %467 = arith.addf %462, %466 : vector<16x4xf32>
      %c0_390 = arith.constant 0 : index
      %c3_391 = arith.constant 3 : index
      %c5_392 = arith.constant 5 : index
      %c0_393 = arith.constant 0 : index
      %468 = vector.load %arg3[%c0_390, %c3_391, %c5_392, %c0_393] : memref<2x7x7x4xf32, #tpu.memory_space<vmem>>, vector<1x1x1x4xf32>
      %469 = vector.shape_cast %468 : vector<1x1x1x4xf32> to vector<4xf32>
      %c1_394 = arith.constant 1 : index
      %c3_395 = arith.constant 3 : index
      %c5_396 = arith.constant 5 : index
      %c0_397 = arith.constant 0 : index
      %470 = vector.load %arg3[%c1_394, %c3_395, %c5_396, %c0_397] : memref<2x7x7x4xf32, #tpu.memory_space<vmem>>, vector<1x1x1x4xf32>
      %471 = vector.shape_cast %470 : vector<1x1x1x4xf32> to vector<4xf32>
      %472 = vector.extract_strided_slice %393 {offsets = [5, 0], sizes = [16, 4], strides = [1, 1]} : vector<22x4xf32> to vector<16x4xf32>
      %473 = vector.shape_cast %469 : vector<4xf32> to vector<1x4xf32>
      %474 = vector.broadcast %473 : vector<1x4xf32> to vector<16x4xf32>
      %475 = arith.mulf %472, %474 : vector<16x4xf32>
      %476 = arith.addf %467, %475 : vector<16x4xf32>
      %477 = vector.extract_strided_slice %397 {offsets = [5, 0], sizes = [16, 4], strides = [1, 1]} : vector<22x4xf32> to vector<16x4xf32>
      %478 = vector.shape_cast %471 : vector<4xf32> to vector<1x4xf32>
      %479 = vector.broadcast %478 : vector<1x4xf32> to vector<16x4xf32>
      %480 = arith.mulf %477, %479 : vector<16x4xf32>
      %481 = arith.addf %476, %480 : vector<16x4xf32>
      %c0_398 = arith.constant 0 : index
      %c3_399 = arith.constant 3 : index
      %c6_400 = arith.constant 6 : index
      %c0_401 = arith.constant 0 : index
      %482 = vector.load %arg3[%c0_398, %c3_399, %c6_400, %c0_401] : memref<2x7x7x4xf32, #tpu.memory_space<vmem>>, vector<1x1x1x4xf32>
      %483 = vector.shape_cast %482 : vector<1x1x1x4xf32> to vector<4xf32>
      %c1_402 = arith.constant 1 : index
      %c3_403 = arith.constant 3 : index
      %c6_404 = arith.constant 6 : index
      %c0_405 = arith.constant 0 : index
      %484 = vector.load %arg3[%c1_402, %c3_403, %c6_404, %c0_405] : memref<2x7x7x4xf32, #tpu.memory_space<vmem>>, vector<1x1x1x4xf32>
      %485 = vector.shape_cast %484 : vector<1x1x1x4xf32> to vector<4xf32>
      %486 = vector.extract_strided_slice %393 {offsets = [6, 0], sizes = [16, 4], strides = [1, 1]} : vector<22x4xf32> to vector<16x4xf32>
      %487 = vector.shape_cast %483 : vector<4xf32> to vector<1x4xf32>
      %488 = vector.broadcast %487 : vector<1x4xf32> to vector<16x4xf32>
      %489 = arith.mulf %486, %488 : vector<16x4xf32>
      %490 = arith.addf %481, %489 : vector<16x4xf32>
      %491 = vector.extract_strided_slice %397 {offsets = [6, 0], sizes = [16, 4], strides = [1, 1]} : vector<22x4xf32> to vector<16x4xf32>
      %492 = vector.shape_cast %485 : vector<4xf32> to vector<1x4xf32>
      %493 = vector.broadcast %492 : vector<1x4xf32> to vector<16x4xf32>
      %494 = arith.mulf %491, %493 : vector<16x4xf32>
      %495 = arith.addf %490, %494 : vector<16x4xf32>
      %c4_i32 = arith.constant 4 : i32
      %496 = arith.addi %70, %c4_i32 : i32
      %497 = arith.index_cast %496 : i32 to index
      %c0_406 = arith.constant 0 : index
      %c0_407 = arith.constant 0 : index
      %498 = vector.load %arg6[%497, %c0_406, %c0_407] : memref<22x22x4xf32, #tpu.memory_space<vmem>>, vector<1x22x4xf32>
      %499 = vector.shape_cast %498 : vector<1x22x4xf32> to vector<22x4xf32>
      %c4_i32_408 = arith.constant 4 : i32
      %500 = arith.addi %70, %c4_i32_408 : i32
      %501 = arith.index_cast %500 : i32 to index
      %c0_409 = arith.constant 0 : index
      %c0_410 = arith.constant 0 : index
      %502 = vector.load %arg7[%501, %c0_409, %c0_410] : memref<22x22x4xf32, #tpu.memory_space<vmem>>, vector<1x22x4xf32>
      %503 = vector.shape_cast %502 : vector<1x22x4xf32> to vector<22x4xf32>
      %c0_411 = arith.constant 0 : index
      %c4_412 = arith.constant 4 : index
      %c0_413 = arith.constant 0 : index
      %c0_414 = arith.constant 0 : index
      %504 = vector.load %arg3[%c0_411, %c4_412, %c0_413, %c0_414] : memref<2x7x7x4xf32, #tpu.memory_space<vmem>>, vector<1x1x1x4xf32>
      %505 = vector.shape_cast %504 : vector<1x1x1x4xf32> to vector<4xf32>
      %c1_415 = arith.constant 1 : index
      %c4_416 = arith.constant 4 : index
      %c0_417 = arith.constant 0 : index
      %c0_418 = arith.constant 0 : index
      %506 = vector.load %arg3[%c1_415, %c4_416, %c0_417, %c0_418] : memref<2x7x7x4xf32, #tpu.memory_space<vmem>>, vector<1x1x1x4xf32>
      %507 = vector.shape_cast %506 : vector<1x1x1x4xf32> to vector<4xf32>
      %508 = vector.extract_strided_slice %499 {offsets = [0, 0], sizes = [16, 4], strides = [1, 1]} : vector<22x4xf32> to vector<16x4xf32>
      %509 = vector.shape_cast %505 : vector<4xf32> to vector<1x4xf32>
      %510 = vector.broadcast %509 : vector<1x4xf32> to vector<16x4xf32>
      %511 = arith.mulf %508, %510 : vector<16x4xf32>
      %512 = arith.addf %495, %511 : vector<16x4xf32>
      %513 = vector.extract_strided_slice %503 {offsets = [0, 0], sizes = [16, 4], strides = [1, 1]} : vector<22x4xf32> to vector<16x4xf32>
      %514 = vector.shape_cast %507 : vector<4xf32> to vector<1x4xf32>
      %515 = vector.broadcast %514 : vector<1x4xf32> to vector<16x4xf32>
      %516 = arith.mulf %513, %515 : vector<16x4xf32>
      %517 = arith.addf %512, %516 : vector<16x4xf32>
      %c0_419 = arith.constant 0 : index
      %c4_420 = arith.constant 4 : index
      %c1_421 = arith.constant 1 : index
      %c0_422 = arith.constant 0 : index
      %518 = vector.load %arg3[%c0_419, %c4_420, %c1_421, %c0_422] : memref<2x7x7x4xf32, #tpu.memory_space<vmem>>, vector<1x1x1x4xf32>
      %519 = vector.shape_cast %518 : vector<1x1x1x4xf32> to vector<4xf32>
      %c1_423 = arith.constant 1 : index
      %c4_424 = arith.constant 4 : index
      %c1_425 = arith.constant 1 : index
      %c0_426 = arith.constant 0 : index
      %520 = vector.load %arg3[%c1_423, %c4_424, %c1_425, %c0_426] : memref<2x7x7x4xf32, #tpu.memory_space<vmem>>, vector<1x1x1x4xf32>
      %521 = vector.shape_cast %520 : vector<1x1x1x4xf32> to vector<4xf32>
      %522 = vector.extract_strided_slice %499 {offsets = [1, 0], sizes = [16, 4], strides = [1, 1]} : vector<22x4xf32> to vector<16x4xf32>
      %523 = vector.shape_cast %519 : vector<4xf32> to vector<1x4xf32>
      %524 = vector.broadcast %523 : vector<1x4xf32> to vector<16x4xf32>
      %525 = arith.mulf %522, %524 : vector<16x4xf32>
      %526 = arith.addf %517, %525 : vector<16x4xf32>
      %527 = vector.extract_strided_slice %503 {offsets = [1, 0], sizes = [16, 4], strides = [1, 1]} : vector<22x4xf32> to vector<16x4xf32>
      %528 = vector.shape_cast %521 : vector<4xf32> to vector<1x4xf32>
      %529 = vector.broadcast %528 : vector<1x4xf32> to vector<16x4xf32>
      %530 = arith.mulf %527, %529 : vector<16x4xf32>
      %531 = arith.addf %526, %530 : vector<16x4xf32>
      %c0_427 = arith.constant 0 : index
      %c4_428 = arith.constant 4 : index
      %c2_429 = arith.constant 2 : index
      %c0_430 = arith.constant 0 : index
      %532 = vector.load %arg3[%c0_427, %c4_428, %c2_429, %c0_430] : memref<2x7x7x4xf32, #tpu.memory_space<vmem>>, vector<1x1x1x4xf32>
      %533 = vector.shape_cast %532 : vector<1x1x1x4xf32> to vector<4xf32>
      %c1_431 = arith.constant 1 : index
      %c4_432 = arith.constant 4 : index
      %c2_433 = arith.constant 2 : index
      %c0_434 = arith.constant 0 : index
      %534 = vector.load %arg3[%c1_431, %c4_432, %c2_433, %c0_434] : memref<2x7x7x4xf32, #tpu.memory_space<vmem>>, vector<1x1x1x4xf32>
      %535 = vector.shape_cast %534 : vector<1x1x1x4xf32> to vector<4xf32>
      %536 = vector.extract_strided_slice %499 {offsets = [2, 0], sizes = [16, 4], strides = [1, 1]} : vector<22x4xf32> to vector<16x4xf32>
      %537 = vector.shape_cast %533 : vector<4xf32> to vector<1x4xf32>
      %538 = vector.broadcast %537 : vector<1x4xf32> to vector<16x4xf32>
      %539 = arith.mulf %536, %538 : vector<16x4xf32>
      %540 = arith.addf %531, %539 : vector<16x4xf32>
      %541 = vector.extract_strided_slice %503 {offsets = [2, 0], sizes = [16, 4], strides = [1, 1]} : vector<22x4xf32> to vector<16x4xf32>
      %542 = vector.shape_cast %535 : vector<4xf32> to vector<1x4xf32>
      %543 = vector.broadcast %542 : vector<1x4xf32> to vector<16x4xf32>
      %544 = arith.mulf %541, %543 : vector<16x4xf32>
      %545 = arith.addf %540, %544 : vector<16x4xf32>
      %c0_435 = arith.constant 0 : index
      %c4_436 = arith.constant 4 : index
      %c3_437 = arith.constant 3 : index
      %c0_438 = arith.constant 0 : index
      %546 = vector.load %arg3[%c0_435, %c4_436, %c3_437, %c0_438] : memref<2x7x7x4xf32, #tpu.memory_space<vmem>>, vector<1x1x1x4xf32>
      %547 = vector.shape_cast %546 : vector<1x1x1x4xf32> to vector<4xf32>
      %c1_439 = arith.constant 1 : index
      %c4_440 = arith.constant 4 : index
      %c3_441 = arith.constant 3 : index
      %c0_442 = arith.constant 0 : index
      %548 = vector.load %arg3[%c1_439, %c4_440, %c3_441, %c0_442] : memref<2x7x7x4xf32, #tpu.memory_space<vmem>>, vector<1x1x1x4xf32>
      %549 = vector.shape_cast %548 : vector<1x1x1x4xf32> to vector<4xf32>
      %550 = vector.extract_strided_slice %499 {offsets = [3, 0], sizes = [16, 4], strides = [1, 1]} : vector<22x4xf32> to vector<16x4xf32>
      %551 = vector.shape_cast %547 : vector<4xf32> to vector<1x4xf32>
      %552 = vector.broadcast %551 : vector<1x4xf32> to vector<16x4xf32>
      %553 = arith.mulf %550, %552 : vector<16x4xf32>
      %554 = arith.addf %545, %553 : vector<16x4xf32>
      %555 = vector.extract_strided_slice %503 {offsets = [3, 0], sizes = [16, 4], strides = [1, 1]} : vector<22x4xf32> to vector<16x4xf32>
      %556 = vector.shape_cast %549 : vector<4xf32> to vector<1x4xf32>
      %557 = vector.broadcast %556 : vector<1x4xf32> to vector<16x4xf32>
      %558 = arith.mulf %555, %557 : vector<16x4xf32>
      %559 = arith.addf %554, %558 : vector<16x4xf32>
      %c0_443 = arith.constant 0 : index
      %c4_444 = arith.constant 4 : index
      %c4_445 = arith.constant 4 : index
      %c0_446 = arith.constant 0 : index
      %560 = vector.load %arg3[%c0_443, %c4_444, %c4_445, %c0_446] : memref<2x7x7x4xf32, #tpu.memory_space<vmem>>, vector<1x1x1x4xf32>
      %561 = vector.shape_cast %560 : vector<1x1x1x4xf32> to vector<4xf32>
      %c1_447 = arith.constant 1 : index
      %c4_448 = arith.constant 4 : index
      %c4_449 = arith.constant 4 : index
      %c0_450 = arith.constant 0 : index
      %562 = vector.load %arg3[%c1_447, %c4_448, %c4_449, %c0_450] : memref<2x7x7x4xf32, #tpu.memory_space<vmem>>, vector<1x1x1x4xf32>
      %563 = vector.shape_cast %562 : vector<1x1x1x4xf32> to vector<4xf32>
      %564 = vector.extract_strided_slice %499 {offsets = [4, 0], sizes = [16, 4], strides = [1, 1]} : vector<22x4xf32> to vector<16x4xf32>
      %565 = vector.shape_cast %561 : vector<4xf32> to vector<1x4xf32>
      %566 = vector.broadcast %565 : vector<1x4xf32> to vector<16x4xf32>
      %567 = arith.mulf %564, %566 : vector<16x4xf32>
      %568 = arith.addf %559, %567 : vector<16x4xf32>
      %569 = vector.extract_strided_slice %503 {offsets = [4, 0], sizes = [16, 4], strides = [1, 1]} : vector<22x4xf32> to vector<16x4xf32>
      %570 = vector.shape_cast %563 : vector<4xf32> to vector<1x4xf32>
      %571 = vector.broadcast %570 : vector<1x4xf32> to vector<16x4xf32>
      %572 = arith.mulf %569, %571 : vector<16x4xf32>
      %573 = arith.addf %568, %572 : vector<16x4xf32>
      %c0_451 = arith.constant 0 : index
      %c4_452 = arith.constant 4 : index
      %c5_453 = arith.constant 5 : index
      %c0_454 = arith.constant 0 : index
      %574 = vector.load %arg3[%c0_451, %c4_452, %c5_453, %c0_454] : memref<2x7x7x4xf32, #tpu.memory_space<vmem>>, vector<1x1x1x4xf32>
      %575 = vector.shape_cast %574 : vector<1x1x1x4xf32> to vector<4xf32>
      %c1_455 = arith.constant 1 : index
      %c4_456 = arith.constant 4 : index
      %c5_457 = arith.constant 5 : index
      %c0_458 = arith.constant 0 : index
      %576 = vector.load %arg3[%c1_455, %c4_456, %c5_457, %c0_458] : memref<2x7x7x4xf32, #tpu.memory_space<vmem>>, vector<1x1x1x4xf32>
      %577 = vector.shape_cast %576 : vector<1x1x1x4xf32> to vector<4xf32>
      %578 = vector.extract_strided_slice %499 {offsets = [5, 0], sizes = [16, 4], strides = [1, 1]} : vector<22x4xf32> to vector<16x4xf32>
      %579 = vector.shape_cast %575 : vector<4xf32> to vector<1x4xf32>
      %580 = vector.broadcast %579 : vector<1x4xf32> to vector<16x4xf32>
      %581 = arith.mulf %578, %580 : vector<16x4xf32>
      %582 = arith.addf %573, %581 : vector<16x4xf32>
      %583 = vector.extract_strided_slice %503 {offsets = [5, 0], sizes = [16, 4], strides = [1, 1]} : vector<22x4xf32> to vector<16x4xf32>
      %584 = vector.shape_cast %577 : vector<4xf32> to vector<1x4xf32>
      %585 = vector.broadcast %584 : vector<1x4xf32> to vector<16x4xf32>
      %586 = arith.mulf %583, %585 : vector<16x4xf32>
      %587 = arith.addf %582, %586 : vector<16x4xf32>
      %c0_459 = arith.constant 0 : index
      %c4_460 = arith.constant 4 : index
      %c6_461 = arith.constant 6 : index
      %c0_462 = arith.constant 0 : index
      %588 = vector.load %arg3[%c0_459, %c4_460, %c6_461, %c0_462] : memref<2x7x7x4xf32, #tpu.memory_space<vmem>>, vector<1x1x1x4xf32>
      %589 = vector.shape_cast %588 : vector<1x1x1x4xf32> to vector<4xf32>
      %c1_463 = arith.constant 1 : index
      %c4_464 = arith.constant 4 : index
      %c6_465 = arith.constant 6 : index
      %c0_466 = arith.constant 0 : index
      %590 = vector.load %arg3[%c1_463, %c4_464, %c6_465, %c0_466] : memref<2x7x7x4xf32, #tpu.memory_space<vmem>>, vector<1x1x1x4xf32>
      %591 = vector.shape_cast %590 : vector<1x1x1x4xf32> to vector<4xf32>
      %592 = vector.extract_strided_slice %499 {offsets = [6, 0], sizes = [16, 4], strides = [1, 1]} : vector<22x4xf32> to vector<16x4xf32>
      %593 = vector.shape_cast %589 : vector<4xf32> to vector<1x4xf32>
      %594 = vector.broadcast %593 : vector<1x4xf32> to vector<16x4xf32>
      %595 = arith.mulf %592, %594 : vector<16x4xf32>
      %596 = arith.addf %587, %595 : vector<16x4xf32>
      %597 = vector.extract_strided_slice %503 {offsets = [6, 0], sizes = [16, 4], strides = [1, 1]} : vector<22x4xf32> to vector<16x4xf32>
      %598 = vector.shape_cast %591 : vector<4xf32> to vector<1x4xf32>
      %599 = vector.broadcast %598 : vector<1x4xf32> to vector<16x4xf32>
      %600 = arith.mulf %597, %599 : vector<16x4xf32>
      %601 = arith.addf %596, %600 : vector<16x4xf32>
      %c5_i32 = arith.constant 5 : i32
      %602 = arith.addi %70, %c5_i32 : i32
      %603 = arith.index_cast %602 : i32 to index
      %c0_467 = arith.constant 0 : index
      %c0_468 = arith.constant 0 : index
      %604 = vector.load %arg6[%603, %c0_467, %c0_468] : memref<22x22x4xf32, #tpu.memory_space<vmem>>, vector<1x22x4xf32>
      %605 = vector.shape_cast %604 : vector<1x22x4xf32> to vector<22x4xf32>
      %c5_i32_469 = arith.constant 5 : i32
      %606 = arith.addi %70, %c5_i32_469 : i32
      %607 = arith.index_cast %606 : i32 to index
      %c0_470 = arith.constant 0 : index
      %c0_471 = arith.constant 0 : index
      %608 = vector.load %arg7[%607, %c0_470, %c0_471] : memref<22x22x4xf32, #tpu.memory_space<vmem>>, vector<1x22x4xf32>
      %609 = vector.shape_cast %608 : vector<1x22x4xf32> to vector<22x4xf32>
      %c0_472 = arith.constant 0 : index
      %c5_473 = arith.constant 5 : index
      %c0_474 = arith.constant 0 : index
      %c0_475 = arith.constant 0 : index
      %610 = vector.load %arg3[%c0_472, %c5_473, %c0_474, %c0_475] : memref<2x7x7x4xf32, #tpu.memory_space<vmem>>, vector<1x1x1x4xf32>
      %611 = vector.shape_cast %610 : vector<1x1x1x4xf32> to vector<4xf32>
      %c1_476 = arith.constant 1 : index
      %c5_477 = arith.constant 5 : index
      %c0_478 = arith.constant 0 : index
      %c0_479 = arith.constant 0 : index
      %612 = vector.load %arg3[%c1_476, %c5_477, %c0_478, %c0_479] : memref<2x7x7x4xf32, #tpu.memory_space<vmem>>, vector<1x1x1x4xf32>
      %613 = vector.shape_cast %612 : vector<1x1x1x4xf32> to vector<4xf32>
      %614 = vector.extract_strided_slice %605 {offsets = [0, 0], sizes = [16, 4], strides = [1, 1]} : vector<22x4xf32> to vector<16x4xf32>
      %615 = vector.shape_cast %611 : vector<4xf32> to vector<1x4xf32>
      %616 = vector.broadcast %615 : vector<1x4xf32> to vector<16x4xf32>
      %617 = arith.mulf %614, %616 : vector<16x4xf32>
      %618 = arith.addf %601, %617 : vector<16x4xf32>
      %619 = vector.extract_strided_slice %609 {offsets = [0, 0], sizes = [16, 4], strides = [1, 1]} : vector<22x4xf32> to vector<16x4xf32>
      %620 = vector.shape_cast %613 : vector<4xf32> to vector<1x4xf32>
      %621 = vector.broadcast %620 : vector<1x4xf32> to vector<16x4xf32>
      %622 = arith.mulf %619, %621 : vector<16x4xf32>
      %623 = arith.addf %618, %622 : vector<16x4xf32>
      %c0_480 = arith.constant 0 : index
      %c5_481 = arith.constant 5 : index
      %c1_482 = arith.constant 1 : index
      %c0_483 = arith.constant 0 : index
      %624 = vector.load %arg3[%c0_480, %c5_481, %c1_482, %c0_483] : memref<2x7x7x4xf32, #tpu.memory_space<vmem>>, vector<1x1x1x4xf32>
      %625 = vector.shape_cast %624 : vector<1x1x1x4xf32> to vector<4xf32>
      %c1_484 = arith.constant 1 : index
      %c5_485 = arith.constant 5 : index
      %c1_486 = arith.constant 1 : index
      %c0_487 = arith.constant 0 : index
      %626 = vector.load %arg3[%c1_484, %c5_485, %c1_486, %c0_487] : memref<2x7x7x4xf32, #tpu.memory_space<vmem>>, vector<1x1x1x4xf32>
      %627 = vector.shape_cast %626 : vector<1x1x1x4xf32> to vector<4xf32>
      %628 = vector.extract_strided_slice %605 {offsets = [1, 0], sizes = [16, 4], strides = [1, 1]} : vector<22x4xf32> to vector<16x4xf32>
      %629 = vector.shape_cast %625 : vector<4xf32> to vector<1x4xf32>
      %630 = vector.broadcast %629 : vector<1x4xf32> to vector<16x4xf32>
      %631 = arith.mulf %628, %630 : vector<16x4xf32>
      %632 = arith.addf %623, %631 : vector<16x4xf32>
      %633 = vector.extract_strided_slice %609 {offsets = [1, 0], sizes = [16, 4], strides = [1, 1]} : vector<22x4xf32> to vector<16x4xf32>
      %634 = vector.shape_cast %627 : vector<4xf32> to vector<1x4xf32>
      %635 = vector.broadcast %634 : vector<1x4xf32> to vector<16x4xf32>
      %636 = arith.mulf %633, %635 : vector<16x4xf32>
      %637 = arith.addf %632, %636 : vector<16x4xf32>
      %c0_488 = arith.constant 0 : index
      %c5_489 = arith.constant 5 : index
      %c2_490 = arith.constant 2 : index
      %c0_491 = arith.constant 0 : index
      %638 = vector.load %arg3[%c0_488, %c5_489, %c2_490, %c0_491] : memref<2x7x7x4xf32, #tpu.memory_space<vmem>>, vector<1x1x1x4xf32>
      %639 = vector.shape_cast %638 : vector<1x1x1x4xf32> to vector<4xf32>
      %c1_492 = arith.constant 1 : index
      %c5_493 = arith.constant 5 : index
      %c2_494 = arith.constant 2 : index
      %c0_495 = arith.constant 0 : index
      %640 = vector.load %arg3[%c1_492, %c5_493, %c2_494, %c0_495] : memref<2x7x7x4xf32, #tpu.memory_space<vmem>>, vector<1x1x1x4xf32>
      %641 = vector.shape_cast %640 : vector<1x1x1x4xf32> to vector<4xf32>
      %642 = vector.extract_strided_slice %605 {offsets = [2, 0], sizes = [16, 4], strides = [1, 1]} : vector<22x4xf32> to vector<16x4xf32>
      %643 = vector.shape_cast %639 : vector<4xf32> to vector<1x4xf32>
      %644 = vector.broadcast %643 : vector<1x4xf32> to vector<16x4xf32>
      %645 = arith.mulf %642, %644 : vector<16x4xf32>
      %646 = arith.addf %637, %645 : vector<16x4xf32>
      %647 = vector.extract_strided_slice %609 {offsets = [2, 0], sizes = [16, 4], strides = [1, 1]} : vector<22x4xf32> to vector<16x4xf32>
      %648 = vector.shape_cast %641 : vector<4xf32> to vector<1x4xf32>
      %649 = vector.broadcast %648 : vector<1x4xf32> to vector<16x4xf32>
      %650 = arith.mulf %647, %649 : vector<16x4xf32>
      %651 = arith.addf %646, %650 : vector<16x4xf32>
      %c0_496 = arith.constant 0 : index
      %c5_497 = arith.constant 5 : index
      %c3_498 = arith.constant 3 : index
      %c0_499 = arith.constant 0 : index
      %652 = vector.load %arg3[%c0_496, %c5_497, %c3_498, %c0_499] : memref<2x7x7x4xf32, #tpu.memory_space<vmem>>, vector<1x1x1x4xf32>
      %653 = vector.shape_cast %652 : vector<1x1x1x4xf32> to vector<4xf32>
      %c1_500 = arith.constant 1 : index
      %c5_501 = arith.constant 5 : index
      %c3_502 = arith.constant 3 : index
      %c0_503 = arith.constant 0 : index
      %654 = vector.load %arg3[%c1_500, %c5_501, %c3_502, %c0_503] : memref<2x7x7x4xf32, #tpu.memory_space<vmem>>, vector<1x1x1x4xf32>
      %655 = vector.shape_cast %654 : vector<1x1x1x4xf32> to vector<4xf32>
      %656 = vector.extract_strided_slice %605 {offsets = [3, 0], sizes = [16, 4], strides = [1, 1]} : vector<22x4xf32> to vector<16x4xf32>
      %657 = vector.shape_cast %653 : vector<4xf32> to vector<1x4xf32>
      %658 = vector.broadcast %657 : vector<1x4xf32> to vector<16x4xf32>
      %659 = arith.mulf %656, %658 : vector<16x4xf32>
      %660 = arith.addf %651, %659 : vector<16x4xf32>
      %661 = vector.extract_strided_slice %609 {offsets = [3, 0], sizes = [16, 4], strides = [1, 1]} : vector<22x4xf32> to vector<16x4xf32>
      %662 = vector.shape_cast %655 : vector<4xf32> to vector<1x4xf32>
      %663 = vector.broadcast %662 : vector<1x4xf32> to vector<16x4xf32>
      %664 = arith.mulf %661, %663 : vector<16x4xf32>
      %665 = arith.addf %660, %664 : vector<16x4xf32>
      %c0_504 = arith.constant 0 : index
      %c5_505 = arith.constant 5 : index
      %c4_506 = arith.constant 4 : index
      %c0_507 = arith.constant 0 : index
      %666 = vector.load %arg3[%c0_504, %c5_505, %c4_506, %c0_507] : memref<2x7x7x4xf32, #tpu.memory_space<vmem>>, vector<1x1x1x4xf32>
      %667 = vector.shape_cast %666 : vector<1x1x1x4xf32> to vector<4xf32>
      %c1_508 = arith.constant 1 : index
      %c5_509 = arith.constant 5 : index
      %c4_510 = arith.constant 4 : index
      %c0_511 = arith.constant 0 : index
      %668 = vector.load %arg3[%c1_508, %c5_509, %c4_510, %c0_511] : memref<2x7x7x4xf32, #tpu.memory_space<vmem>>, vector<1x1x1x4xf32>
      %669 = vector.shape_cast %668 : vector<1x1x1x4xf32> to vector<4xf32>
      %670 = vector.extract_strided_slice %605 {offsets = [4, 0], sizes = [16, 4], strides = [1, 1]} : vector<22x4xf32> to vector<16x4xf32>
      %671 = vector.shape_cast %667 : vector<4xf32> to vector<1x4xf32>
      %672 = vector.broadcast %671 : vector<1x4xf32> to vector<16x4xf32>
      %673 = arith.mulf %670, %672 : vector<16x4xf32>
      %674 = arith.addf %665, %673 : vector<16x4xf32>
      %675 = vector.extract_strided_slice %609 {offsets = [4, 0], sizes = [16, 4], strides = [1, 1]} : vector<22x4xf32> to vector<16x4xf32>
      %676 = vector.shape_cast %669 : vector<4xf32> to vector<1x4xf32>
      %677 = vector.broadcast %676 : vector<1x4xf32> to vector<16x4xf32>
      %678 = arith.mulf %675, %677 : vector<16x4xf32>
      %679 = arith.addf %674, %678 : vector<16x4xf32>
      %c0_512 = arith.constant 0 : index
      %c5_513 = arith.constant 5 : index
      %c5_514 = arith.constant 5 : index
      %c0_515 = arith.constant 0 : index
      %680 = vector.load %arg3[%c0_512, %c5_513, %c5_514, %c0_515] : memref<2x7x7x4xf32, #tpu.memory_space<vmem>>, vector<1x1x1x4xf32>
      %681 = vector.shape_cast %680 : vector<1x1x1x4xf32> to vector<4xf32>
      %c1_516 = arith.constant 1 : index
      %c5_517 = arith.constant 5 : index
      %c5_518 = arith.constant 5 : index
      %c0_519 = arith.constant 0 : index
      %682 = vector.load %arg3[%c1_516, %c5_517, %c5_518, %c0_519] : memref<2x7x7x4xf32, #tpu.memory_space<vmem>>, vector<1x1x1x4xf32>
      %683 = vector.shape_cast %682 : vector<1x1x1x4xf32> to vector<4xf32>
      %684 = vector.extract_strided_slice %605 {offsets = [5, 0], sizes = [16, 4], strides = [1, 1]} : vector<22x4xf32> to vector<16x4xf32>
      %685 = vector.shape_cast %681 : vector<4xf32> to vector<1x4xf32>
      %686 = vector.broadcast %685 : vector<1x4xf32> to vector<16x4xf32>
      %687 = arith.mulf %684, %686 : vector<16x4xf32>
      %688 = arith.addf %679, %687 : vector<16x4xf32>
      %689 = vector.extract_strided_slice %609 {offsets = [5, 0], sizes = [16, 4], strides = [1, 1]} : vector<22x4xf32> to vector<16x4xf32>
      %690 = vector.shape_cast %683 : vector<4xf32> to vector<1x4xf32>
      %691 = vector.broadcast %690 : vector<1x4xf32> to vector<16x4xf32>
      %692 = arith.mulf %689, %691 : vector<16x4xf32>
      %693 = arith.addf %688, %692 : vector<16x4xf32>
      %c0_520 = arith.constant 0 : index
      %c5_521 = arith.constant 5 : index
      %c6_522 = arith.constant 6 : index
      %c0_523 = arith.constant 0 : index
      %694 = vector.load %arg3[%c0_520, %c5_521, %c6_522, %c0_523] : memref<2x7x7x4xf32, #tpu.memory_space<vmem>>, vector<1x1x1x4xf32>
      %695 = vector.shape_cast %694 : vector<1x1x1x4xf32> to vector<4xf32>
      %c1_524 = arith.constant 1 : index
      %c5_525 = arith.constant 5 : index
      %c6_526 = arith.constant 6 : index
      %c0_527 = arith.constant 0 : index
      %696 = vector.load %arg3[%c1_524, %c5_525, %c6_526, %c0_527] : memref<2x7x7x4xf32, #tpu.memory_space<vmem>>, vector<1x1x1x4xf32>
      %697 = vector.shape_cast %696 : vector<1x1x1x4xf32> to vector<4xf32>
      %698 = vector.extract_strided_slice %605 {offsets = [6, 0], sizes = [16, 4], strides = [1, 1]} : vector<22x4xf32> to vector<16x4xf32>
      %699 = vector.shape_cast %695 : vector<4xf32> to vector<1x4xf32>
      %700 = vector.broadcast %699 : vector<1x4xf32> to vector<16x4xf32>
      %701 = arith.mulf %698, %700 : vector<16x4xf32>
      %702 = arith.addf %693, %701 : vector<16x4xf32>
      %703 = vector.extract_strided_slice %609 {offsets = [6, 0], sizes = [16, 4], strides = [1, 1]} : vector<22x4xf32> to vector<16x4xf32>
      %704 = vector.shape_cast %697 : vector<4xf32> to vector<1x4xf32>
      %705 = vector.broadcast %704 : vector<1x4xf32> to vector<16x4xf32>
      %706 = arith.mulf %703, %705 : vector<16x4xf32>
      %707 = arith.addf %702, %706 : vector<16x4xf32>
      %c6_i32 = arith.constant 6 : i32
      %708 = arith.addi %70, %c6_i32 : i32
      %709 = arith.index_cast %708 : i32 to index
      %c0_528 = arith.constant 0 : index
      %c0_529 = arith.constant 0 : index
      %710 = vector.load %arg6[%709, %c0_528, %c0_529] : memref<22x22x4xf32, #tpu.memory_space<vmem>>, vector<1x22x4xf32>
      %711 = vector.shape_cast %710 : vector<1x22x4xf32> to vector<22x4xf32>
      %c6_i32_530 = arith.constant 6 : i32
      %712 = arith.addi %70, %c6_i32_530 : i32
      %713 = arith.index_cast %712 : i32 to index
      %c0_531 = arith.constant 0 : index
      %c0_532 = arith.constant 0 : index
      %714 = vector.load %arg7[%713, %c0_531, %c0_532] : memref<22x22x4xf32, #tpu.memory_space<vmem>>, vector<1x22x4xf32>
      %715 = vector.shape_cast %714 : vector<1x22x4xf32> to vector<22x4xf32>
      %c0_533 = arith.constant 0 : index
      %c6_534 = arith.constant 6 : index
      %c0_535 = arith.constant 0 : index
      %c0_536 = arith.constant 0 : index
      %716 = vector.load %arg3[%c0_533, %c6_534, %c0_535, %c0_536] : memref<2x7x7x4xf32, #tpu.memory_space<vmem>>, vector<1x1x1x4xf32>
      %717 = vector.shape_cast %716 : vector<1x1x1x4xf32> to vector<4xf32>
      %c1_537 = arith.constant 1 : index
      %c6_538 = arith.constant 6 : index
      %c0_539 = arith.constant 0 : index
      %c0_540 = arith.constant 0 : index
      %718 = vector.load %arg3[%c1_537, %c6_538, %c0_539, %c0_540] : memref<2x7x7x4xf32, #tpu.memory_space<vmem>>, vector<1x1x1x4xf32>
      %719 = vector.shape_cast %718 : vector<1x1x1x4xf32> to vector<4xf32>
      %720 = vector.extract_strided_slice %711 {offsets = [0, 0], sizes = [16, 4], strides = [1, 1]} : vector<22x4xf32> to vector<16x4xf32>
      %721 = vector.shape_cast %717 : vector<4xf32> to vector<1x4xf32>
      %722 = vector.broadcast %721 : vector<1x4xf32> to vector<16x4xf32>
      %723 = arith.mulf %720, %722 : vector<16x4xf32>
      %724 = arith.addf %707, %723 : vector<16x4xf32>
      %725 = vector.extract_strided_slice %715 {offsets = [0, 0], sizes = [16, 4], strides = [1, 1]} : vector<22x4xf32> to vector<16x4xf32>
      %726 = vector.shape_cast %719 : vector<4xf32> to vector<1x4xf32>
      %727 = vector.broadcast %726 : vector<1x4xf32> to vector<16x4xf32>
      %728 = arith.mulf %725, %727 : vector<16x4xf32>
      %729 = arith.addf %724, %728 : vector<16x4xf32>
      %c0_541 = arith.constant 0 : index
      %c6_542 = arith.constant 6 : index
      %c1_543 = arith.constant 1 : index
      %c0_544 = arith.constant 0 : index
      %730 = vector.load %arg3[%c0_541, %c6_542, %c1_543, %c0_544] : memref<2x7x7x4xf32, #tpu.memory_space<vmem>>, vector<1x1x1x4xf32>
      %731 = vector.shape_cast %730 : vector<1x1x1x4xf32> to vector<4xf32>
      %c1_545 = arith.constant 1 : index
      %c6_546 = arith.constant 6 : index
      %c1_547 = arith.constant 1 : index
      %c0_548 = arith.constant 0 : index
      %732 = vector.load %arg3[%c1_545, %c6_546, %c1_547, %c0_548] : memref<2x7x7x4xf32, #tpu.memory_space<vmem>>, vector<1x1x1x4xf32>
      %733 = vector.shape_cast %732 : vector<1x1x1x4xf32> to vector<4xf32>
      %734 = vector.extract_strided_slice %711 {offsets = [1, 0], sizes = [16, 4], strides = [1, 1]} : vector<22x4xf32> to vector<16x4xf32>
      %735 = vector.shape_cast %731 : vector<4xf32> to vector<1x4xf32>
      %736 = vector.broadcast %735 : vector<1x4xf32> to vector<16x4xf32>
      %737 = arith.mulf %734, %736 : vector<16x4xf32>
      %738 = arith.addf %729, %737 : vector<16x4xf32>
      %739 = vector.extract_strided_slice %715 {offsets = [1, 0], sizes = [16, 4], strides = [1, 1]} : vector<22x4xf32> to vector<16x4xf32>
      %740 = vector.shape_cast %733 : vector<4xf32> to vector<1x4xf32>
      %741 = vector.broadcast %740 : vector<1x4xf32> to vector<16x4xf32>
      %742 = arith.mulf %739, %741 : vector<16x4xf32>
      %743 = arith.addf %738, %742 : vector<16x4xf32>
      %c0_549 = arith.constant 0 : index
      %c6_550 = arith.constant 6 : index
      %c2_551 = arith.constant 2 : index
      %c0_552 = arith.constant 0 : index
      %744 = vector.load %arg3[%c0_549, %c6_550, %c2_551, %c0_552] : memref<2x7x7x4xf32, #tpu.memory_space<vmem>>, vector<1x1x1x4xf32>
      %745 = vector.shape_cast %744 : vector<1x1x1x4xf32> to vector<4xf32>
      %c1_553 = arith.constant 1 : index
      %c6_554 = arith.constant 6 : index
      %c2_555 = arith.constant 2 : index
      %c0_556 = arith.constant 0 : index
      %746 = vector.load %arg3[%c1_553, %c6_554, %c2_555, %c0_556] : memref<2x7x7x4xf32, #tpu.memory_space<vmem>>, vector<1x1x1x4xf32>
      %747 = vector.shape_cast %746 : vector<1x1x1x4xf32> to vector<4xf32>
      %748 = vector.extract_strided_slice %711 {offsets = [2, 0], sizes = [16, 4], strides = [1, 1]} : vector<22x4xf32> to vector<16x4xf32>
      %749 = vector.shape_cast %745 : vector<4xf32> to vector<1x4xf32>
      %750 = vector.broadcast %749 : vector<1x4xf32> to vector<16x4xf32>
      %751 = arith.mulf %748, %750 : vector<16x4xf32>
      %752 = arith.addf %743, %751 : vector<16x4xf32>
      %753 = vector.extract_strided_slice %715 {offsets = [2, 0], sizes = [16, 4], strides = [1, 1]} : vector<22x4xf32> to vector<16x4xf32>
      %754 = vector.shape_cast %747 : vector<4xf32> to vector<1x4xf32>
      %755 = vector.broadcast %754 : vector<1x4xf32> to vector<16x4xf32>
      %756 = arith.mulf %753, %755 : vector<16x4xf32>
      %757 = arith.addf %752, %756 : vector<16x4xf32>
      %c0_557 = arith.constant 0 : index
      %c6_558 = arith.constant 6 : index
      %c3_559 = arith.constant 3 : index
      %c0_560 = arith.constant 0 : index
      %758 = vector.load %arg3[%c0_557, %c6_558, %c3_559, %c0_560] : memref<2x7x7x4xf32, #tpu.memory_space<vmem>>, vector<1x1x1x4xf32>
      %759 = vector.shape_cast %758 : vector<1x1x1x4xf32> to vector<4xf32>
      %c1_561 = arith.constant 1 : index
      %c6_562 = arith.constant 6 : index
      %c3_563 = arith.constant 3 : index
      %c0_564 = arith.constant 0 : index
      %760 = vector.load %arg3[%c1_561, %c6_562, %c3_563, %c0_564] : memref<2x7x7x4xf32, #tpu.memory_space<vmem>>, vector<1x1x1x4xf32>
      %761 = vector.shape_cast %760 : vector<1x1x1x4xf32> to vector<4xf32>
      %762 = vector.extract_strided_slice %711 {offsets = [3, 0], sizes = [16, 4], strides = [1, 1]} : vector<22x4xf32> to vector<16x4xf32>
      %763 = vector.shape_cast %759 : vector<4xf32> to vector<1x4xf32>
      %764 = vector.broadcast %763 : vector<1x4xf32> to vector<16x4xf32>
      %765 = arith.mulf %762, %764 : vector<16x4xf32>
      %766 = arith.addf %757, %765 : vector<16x4xf32>
      %767 = vector.extract_strided_slice %715 {offsets = [3, 0], sizes = [16, 4], strides = [1, 1]} : vector<22x4xf32> to vector<16x4xf32>
      %768 = vector.shape_cast %761 : vector<4xf32> to vector<1x4xf32>
      %769 = vector.broadcast %768 : vector<1x4xf32> to vector<16x4xf32>
      %770 = arith.mulf %767, %769 : vector<16x4xf32>
      %771 = arith.addf %766, %770 : vector<16x4xf32>
      %c0_565 = arith.constant 0 : index
      %c6_566 = arith.constant 6 : index
      %c4_567 = arith.constant 4 : index
      %c0_568 = arith.constant 0 : index
      %772 = vector.load %arg3[%c0_565, %c6_566, %c4_567, %c0_568] : memref<2x7x7x4xf32, #tpu.memory_space<vmem>>, vector<1x1x1x4xf32>
      %773 = vector.shape_cast %772 : vector<1x1x1x4xf32> to vector<4xf32>
      %c1_569 = arith.constant 1 : index
      %c6_570 = arith.constant 6 : index
      %c4_571 = arith.constant 4 : index
      %c0_572 = arith.constant 0 : index
      %774 = vector.load %arg3[%c1_569, %c6_570, %c4_571, %c0_572] : memref<2x7x7x4xf32, #tpu.memory_space<vmem>>, vector<1x1x1x4xf32>
      %775 = vector.shape_cast %774 : vector<1x1x1x4xf32> to vector<4xf32>
      %776 = vector.extract_strided_slice %711 {offsets = [4, 0], sizes = [16, 4], strides = [1, 1]} : vector<22x4xf32> to vector<16x4xf32>
      %777 = vector.shape_cast %773 : vector<4xf32> to vector<1x4xf32>
      %778 = vector.broadcast %777 : vector<1x4xf32> to vector<16x4xf32>
      %779 = arith.mulf %776, %778 : vector<16x4xf32>
      %780 = arith.addf %771, %779 : vector<16x4xf32>
      %781 = vector.extract_strided_slice %715 {offsets = [4, 0], sizes = [16, 4], strides = [1, 1]} : vector<22x4xf32> to vector<16x4xf32>
      %782 = vector.shape_cast %775 : vector<4xf32> to vector<1x4xf32>
      %783 = vector.broadcast %782 : vector<1x4xf32> to vector<16x4xf32>
      %784 = arith.mulf %781, %783 : vector<16x4xf32>
      %785 = arith.addf %780, %784 : vector<16x4xf32>
      %c0_573 = arith.constant 0 : index
      %c6_574 = arith.constant 6 : index
      %c5_575 = arith.constant 5 : index
      %c0_576 = arith.constant 0 : index
      %786 = vector.load %arg3[%c0_573, %c6_574, %c5_575, %c0_576] : memref<2x7x7x4xf32, #tpu.memory_space<vmem>>, vector<1x1x1x4xf32>
      %787 = vector.shape_cast %786 : vector<1x1x1x4xf32> to vector<4xf32>
      %c1_577 = arith.constant 1 : index
      %c6_578 = arith.constant 6 : index
      %c5_579 = arith.constant 5 : index
      %c0_580 = arith.constant 0 : index
      %788 = vector.load %arg3[%c1_577, %c6_578, %c5_579, %c0_580] : memref<2x7x7x4xf32, #tpu.memory_space<vmem>>, vector<1x1x1x4xf32>
      %789 = vector.shape_cast %788 : vector<1x1x1x4xf32> to vector<4xf32>
      %790 = vector.extract_strided_slice %711 {offsets = [5, 0], sizes = [16, 4], strides = [1, 1]} : vector<22x4xf32> to vector<16x4xf32>
      %791 = vector.shape_cast %787 : vector<4xf32> to vector<1x4xf32>
      %792 = vector.broadcast %791 : vector<1x4xf32> to vector<16x4xf32>
      %793 = arith.mulf %790, %792 : vector<16x4xf32>
      %794 = arith.addf %785, %793 : vector<16x4xf32>
      %795 = vector.extract_strided_slice %715 {offsets = [5, 0], sizes = [16, 4], strides = [1, 1]} : vector<22x4xf32> to vector<16x4xf32>
      %796 = vector.shape_cast %789 : vector<4xf32> to vector<1x4xf32>
      %797 = vector.broadcast %796 : vector<1x4xf32> to vector<16x4xf32>
      %798 = arith.mulf %795, %797 : vector<16x4xf32>
      %799 = arith.addf %794, %798 : vector<16x4xf32>
      %c0_581 = arith.constant 0 : index
      %c6_582 = arith.constant 6 : index
      %c6_583 = arith.constant 6 : index
      %c0_584 = arith.constant 0 : index
      %800 = vector.load %arg3[%c0_581, %c6_582, %c6_583, %c0_584] : memref<2x7x7x4xf32, #tpu.memory_space<vmem>>, vector<1x1x1x4xf32>
      %801 = vector.shape_cast %800 : vector<1x1x1x4xf32> to vector<4xf32>
      %c1_585 = arith.constant 1 : index
      %c6_586 = arith.constant 6 : index
      %c6_587 = arith.constant 6 : index
      %c0_588 = arith.constant 0 : index
      %802 = vector.load %arg3[%c1_585, %c6_586, %c6_587, %c0_588] : memref<2x7x7x4xf32, #tpu.memory_space<vmem>>, vector<1x1x1x4xf32>
      %803 = vector.shape_cast %802 : vector<1x1x1x4xf32> to vector<4xf32>
      %804 = vector.extract_strided_slice %711 {offsets = [6, 0], sizes = [16, 4], strides = [1, 1]} : vector<22x4xf32> to vector<16x4xf32>
      %805 = vector.shape_cast %801 : vector<4xf32> to vector<1x4xf32>
      %806 = vector.broadcast %805 : vector<1x4xf32> to vector<16x4xf32>
      %807 = arith.mulf %804, %806 : vector<16x4xf32>
      %808 = arith.addf %799, %807 : vector<16x4xf32>
      %809 = vector.extract_strided_slice %715 {offsets = [6, 0], sizes = [16, 4], strides = [1, 1]} : vector<22x4xf32> to vector<16x4xf32>
      %810 = vector.shape_cast %803 : vector<4xf32> to vector<1x4xf32>
      %811 = vector.broadcast %810 : vector<1x4xf32> to vector<16x4xf32>
      %812 = arith.mulf %809, %811 : vector<16x4xf32>
      %813 = arith.addf %808, %812 : vector<16x4xf32>
      %814 = vector.shape_cast %67 : vector<4xf32> to vector<1x4xf32>
      %815 = vector.broadcast %814 : vector<1x4xf32> to vector<16x4xf32>
      %816 = arith.addf %813, %815 : vector<16x4xf32>
      %817 = arith.negf %816 : vector<16x4xf32>
      %818 = math.exp %817 : vector<16x4xf32>
      %cst_589 = arith.constant 1.000000e+00 : f32
      %819 = vector.broadcast %cst_589 : f32 to vector<16x4xf32>
      %820 = arith.addf %819, %818 : vector<16x4xf32>
      %821 = arith.divf %819, %820 : vector<16x4xf32>
      %c0_590 = arith.constant 0 : index
      %822 = arith.index_cast %70 : i32 to index
      %c0_591 = arith.constant 0 : index
      %c0_592 = arith.constant 0 : index
      %823 = vector.load %arg5[%c0_590, %822, %c0_591, %c0_592] : memref<1x16x16x4xf32, #tpu.memory_space<vmem>>, vector<1x1x16x4xf32>
      %824 = vector.shape_cast %823 : vector<1x1x16x4xf32> to vector<16x4xf32>
      %825 = vector.shape_cast %821 : vector<16x4xf32> to vector<1x1x16x4xf32>
      tpu.vector_store %arg5[%c0_590, %822, %c0_591, %c0_592], %825 {strides = array<i32>} : memref<1x16x16x4xf32, #tpu.memory_space<vmem>>, vector<1x1x16x4xf32>,
    }
    %c16_i32_157 = arith.constant 16 : i32
    return
  }
  func.func @transform_0(%arg0: i32) -> (i32, i32, i32, i32) {
    %c0_i32 = arith.constant 0 : i32
    %c0_i32_0 = arith.constant 0 : i32
    %c0_i32_1 = arith.constant 0 : i32
    %c0_i32_2 = arith.constant 0 : i32
    return %arg0, %c0_i32, %c0_i32_0, %c0_i32_1 : i32, i32, i32, i32
  }
  func.func @transform_1(%arg0: i32) -> (i32, i32, i32, i32) {
    %c0_i32 = arith.constant 0 : i32
    %c0_i32_0 = arith.constant 0 : i32
    %c0_i32_1 = arith.constant 0 : i32
    %c0_i32_2 = arith.constant 0 : i32
    return %arg0, %c0_i32, %c0_i32_0, %c0_i32_1 : i32, i32, i32, i32
  }
  func.func @transform_2(%arg0: i32) -> (i32, i32, i32, i32) {
    %c0_i32 = arith.constant 0 : i32
    %c0_i32_0 = arith.constant 0 : i32
    %c0_i32_1 = arith.constant 0 : i32
    %c0_i32_2 = arith.constant 0 : i32
    %c0_i32_3 = arith.constant 0 : i32
    return %c0_i32, %c0_i32_0, %c0_i32_1, %c0_i32_2 : i32, i32, i32, i32
  }
  func.func @transform_3(%arg0: i32) -> (i32, i32, i32) {
    %c0_i32 = arith.constant 0 : i32
    %c0_i32_0 = arith.constant 0 : i32
    %c0_i32_1 = arith.constant 0 : i32
    %c0_i32_2 = arith.constant 0 : i32
    return %c0_i32, %c0_i32_0, %c0_i32_1 : i32, i32, i32
  }
  func.func @transform_4(%arg0: i32) -> (i32, i32, i32, i32) {
    %c0_i32 = arith.constant 0 : i32
    %c0_i32_0 = arith.constant 0 : i32
    %c0_i32_1 = arith.constant 0 : i32
    %c0_i32_2 = arith.constant 0 : i32
    return %arg0, %c0_i32, %c0_i32_0, %c0_i32_1 : i32, i32, i32, i32
  }
}

</mosaic_0001>

<bundles_post_ra>
// kernel: tpu_custom_call.1
= control target key start
LH: loop header
LB: loop body
LE: loop exit
PB: predicated region body
PF: predicated region fallthrough
CT: control target
= control target key end

     0   :  { %s3321_s15 = smov 0   ;;  %s4662_s0 = inlined_call_operand.vmem [shape: f32[2,16,16,4], index: 0, kind: input, shape index: {}]   ;;  %s4663_s1 = inlined_call_operand.vmem [shape: f32[2,16,16,4], index: 1, kind: input, shape index: {}]   ;;  %s4664_s2 = inlined_call_operand.vmem [shape: f32[2,7,7,4], index: 2, kind: input, shape index: {}]   ;;  %s4665_s3 = inlined_call_operand.vmem [shape: f32[1,1,4], index: 3, kind: input, shape index: {}]   ;;  %s4666_s4 = inlined_call_operand.vmem [shape: f32[2,16,16,4], index: 4, kind: output, shape index: {}]  }
   0x1 LB: > { %s2987_s16 = sadd.s32 4294967295, %s3290_s15   ;;  %p2991_p0 = scmp.ge.s32.totalorder %s3290_s15, 1  ;;  %s3290_s15 = sphi %s3321_s15, %s14_s15  }
   0x2   : > { %p172_p1 = scmp.lt.s32.totalorder %s3290_s15, 3 }
   0x4   : > { %p173_p2 = pnand %p2991_p0, %p172_p1 }
   0x5   : > { %p203_p3 = scmp.lt.s32.totalorder (!%p173_p2), %s2987_s16, 1  ;;  %v3332_v0 = vld [vmem:[%s4665_s3] ss:$0 sm:$0xff] (!%p173_p2)  ;;  %vm251_vm0 = vcmask (!%p173_p2), 31744   ;;  %vm341_vm1 = vcmask (!%p173_p2), 24576   ;;  %s3768_s29 = smov (!%p173_p2), 0  }
   0x6   : > { %176 = sbr.rel (%p173_p2) target bundleno = 490 (0x1ea), region = 36 }
   0xd   : > { %s4668_s16 = smov (!%p203_p3, %s2987_s16), 1 }
   0xe   : > { %s3334_s19 = sshll.u32 %s4668_s16, 8 }
   0xf   : > { %s3340_s22 = scalar_lea.vmem %s4662_s0, %s3334_s19  ;;  %s217_s25 = scalar_lea.vmem %s4666_s4, %s3334_s19 }
  0x10   : > { %v218_v1 = vld [vmem:[%s3340_s22] sm:$0xff]  ;;  %v219_v2 = vld [vmem:[%s3340_s22 + $0x8] sm:$0xff]  ;;  %v220_v3 = vld [vmem:[%s3340_s22 + $0x10] sm:$0xff]  ;;  %s3401_s28 = scalar_lea.vmem %s4663_s1, %s3334_s19 }
  0x11   : > { %252 = vst.msk [vmem:[#allocation2 + $0x4b] sm:$0xff] %vm251_vm0, %v218_v1  ;;  %253 = vst.msk [vmem:[#allocation2 + $0x53] sm:$0xff] %vm251_vm0, %v219_v2  ;;  %v221_v4 = vld [vmem:[%s3340_s22 + $0x18] sm:$0xff]  ;;  %v222_v5 = vld [vmem:[%s3340_s22 + $0x20] sm:$0xff] }
  0x12   : > { %254 = vst.msk [vmem:[#allocation2 + $0x63] sm:$0xff] %vm251_vm0, %v220_v3  ;;  %v223_v6 = vld [vmem:[%s3340_s22 + $0x28] sm:$0xff]  ;;  %311 = vst.msk [vmem:[#allocation2 + $0x33] sm:$0xff] %vm251_vm0, %v220_v3  ;;  %v224_v7 = vld [vmem:[%s3340_s22 + $0x30] sm:$0xff] }
  0x13   : > { %255 = vst.msk [vmem:[#allocation2 + $0x6b] sm:$0xff] %vm251_vm0, %v221_v4  ;;  %256 = vst.msk [vmem:[#allocation2 + $0x7b] sm:$0xff] %vm251_vm0, %v222_v5  ;;  %v225_v8 = vld [vmem:[%s3340_s22 + $0x38] sm:$0xff]  ;;  %v226_v9 = vld [vmem:[%s3340_s22 + $0x40] sm:$0xff] }
  0x14   : > { %257 = vst.msk [vmem:[#allocation2 + $0x83] sm:$0xff] %vm251_vm0, %v223_v6  ;;  %299 = vst.msk [vmem:[#allocation2 + $0x1b] sm:$0xff] %vm251_vm0, %v222_v5  ;;  %v227_v10 = vld [vmem:[%s3340_s22 + $0x48] sm:$0xff]  ;;  %v228_v11 = vld [vmem:[%s3340_s22 + $0x50] sm:$0xff] }
  0x15   : > { %300 = vst.msk [vmem:[#allocation2 + $0x23] sm:$0xff] %vm251_vm0, %v223_v6  ;;  %312 = vst.msk [vmem:[#allocation2 + $0x3b] sm:$0xff] %vm251_vm0, %v221_v4  ;;  %v229_v12 = vld [vmem:[%s3340_s22 + $0x58] sm:$0xff]  ;;  %v230_v13 = vld [vmem:[%s3340_s22 + $0x60] sm:$0xff] }
  0x16   : > { %258 = vst.msk [vmem:[#allocation2 + $0x93] sm:$0xff] %vm251_vm0, %v224_v7  ;;  %259 = vst.msk [vmem:[#allocation2 + $0x9b] sm:$0xff] %vm251_vm0, %v225_v8  ;;  %v231_v14 = vld [vmem:[%s3340_s22 + $0x68] sm:$0xff]  ;;  %v232_v15 = vld [vmem:[%s3340_s22 + $0x70] sm:$0xff] }
  0x17   : > { %260 = vst.msk [vmem:[#allocation2 + $0xab] sm:$0xff] %vm251_vm0, %v226_v9  ;;  %287 = vst.msk [vmem:[#allocation2 + $0x3] sm:$0xff] %vm251_vm0, %v224_v7  ;;  %v233_v16 = vld [vmem:[%s3340_s22 + $0x78] sm:$0xff]  ;;  %v234_v17 = vld [vmem:[%s3340_s22 + $0x80] sm:$0xff] }
  0x18   : > { %288 = vst.msk [vmem:[#allocation2 + $0xb] sm:$0xff] %vm251_vm0, %v225_v8  ;;  %261 = vst.msk [vmem:[#allocation2 + $0xb3] sm:$0xff] %vm251_vm0, %v227_v10  ;;  %v235_v18 = vld [vmem:[%s3340_s22 + $0x88] sm:$0xff]  ;;  %v236_v19 = vld [vmem:[%s3340_s22 + $0x90] sm:$0xff] }
  0x19   : > { %262 = vst.msk [vmem:[#allocation2 + $0xc3] sm:$0xff] %vm251_vm0, %v228_v11  ;;  %263 = vst.msk [vmem:[#allocation2 + $0xcb] sm:$0xff] %vm251_vm0, %v229_v12  ;;  %v237_v20 = vld [vmem:[%s3340_s22 + $0x98] sm:$0xff]  ;;  %v238_v21 = vld [vmem:[%s3340_s22 + $0xa0] sm:$0xff] }
  0x1a   : > { %264 = vst.msk [vmem:[#allocation2 + $0xdb] sm:$0xff] %vm251_vm0, %v230_v13  ;;  %265 = vst.msk [vmem:[#allocation2 + $0xe3] sm:$0xff] %vm251_vm0, %v231_v14  ;;  %v239_v22 = vld [vmem:[%s3340_s22 + $0xa8] sm:$0xff]  ;;  %v240_v23 = vld [vmem:[%s3340_s22 + $0xb0] sm:$0xff] }
  0x1b   : > { %266 = vst.msk [vmem:[#allocation2 + $0xf3] sm:$0xff] %vm251_vm0, %v232_v15  ;;  %267 = vst.msk [vmem:[#allocation2 + $0xfb] sm:$0xff] %vm251_vm0, %v233_v16  ;;  %v241_v24 = vld [vmem:[%s3340_s22 + $0xb8] sm:$0xff]  ;;  %v242_v25 = vld [vmem:[%s3340_s22 + $0xc0] sm:$0xff] }
  0x1c   : > { %268 = vst.msk [vmem:[#allocation2 + $0x10b] sm:$0xff] %vm251_vm0, %v234_v17  ;;  %269 = vst.msk [vmem:[#allocation2 + $0x113] sm:$0xff] %vm251_vm0, %v235_v18  ;;  %v243_v26 = vld [vmem:[%s3340_s22 + $0xc8] sm:$0xff]  ;;  %v244_v27 = vld [vmem:[%s3340_s22 + $0xd0] sm:$0xff] }
  0x1d   : > { %270 = vst.msk [vmem:[#allocation2 + $0x123] sm:$0xff] %vm251_vm0, %v236_v19  ;;  %271 = vst.msk [vmem:[#allocation2 + $0x12b] sm:$0xff] %vm251_vm0, %v237_v20  ;;  %v245_v28 = vld [vmem:[%s3340_s22 + $0xd8] sm:$0xff]  ;;  %v246_v29 = vld [vmem:[%s3340_s22 + $0xe0] sm:$0xff] }
  0x1e   : > { %272 = vst.msk [vmem:[#allocation2 + $0x13b] sm:$0xff] %vm251_vm0, %v238_v21  ;;  %273 = vst.msk [vmem:[#allocation2 + $0x143] sm:$0xff] %vm251_vm0, %v239_v22  ;;  %v247_v30 = vld [vmem:[%s3340_s22 + $0xe8] sm:$0xff]  ;;  %v248_v31 = vld [vmem:[%s3340_s22 + $0xf0] sm:$0xff] }
  0x1f   : > { %274 = vst.msk [vmem:[#allocation2 + $0x153] sm:$0xff] %vm251_vm0, %v240_v23  ;;  %275 = vst.msk [vmem:[#allocation2 + $0x15b] sm:$0xff] %vm251_vm0, %v241_v24  ;;  %v249_v32 = vld [vmem:[%s3340_s22 + $0xf8] sm:$0xff]  ;;  %v584_v33 = vld [vmem:[%s3401_s28] sm:$0xff] }
  0x20   : > { %276 = vst.msk [vmem:[#allocation2 + $0x16b] sm:$0xff] %vm251_vm0, %v242_v25  ;;  %277 = vst.msk [vmem:[#allocation2 + $0x173] sm:$0xff] %vm251_vm0, %v243_v26  ;;  %v585_v34 = vld [vmem:[%s3401_s28 + $0x8] sm:$0xff]  ;;  %v586_v35 = vld [vmem:[%s3401_s28 + $0x10] sm:$0xff] }
  0x21   : > { %278 = vst.msk [vmem:[#allocation2 + $0x183] sm:$0xff] %vm251_vm0, %v244_v27  ;;  %305 = vst.msk [vmem:[#allocation2 + $0x1e3] sm:$0xff] %vm251_vm0, %v244_v27  ;;  %v587_v36 = vld [vmem:[%s3401_s28 + $0x18] sm:$0xff]  ;;  %v588_v37 = vld [vmem:[%s3401_s28 + $0x20] sm:$0xff] }
  0x22   : > { %317 = vst.msk [vmem:[#allocation2 + $0x1fb] sm:$0xff] %vm251_vm0, %v242_v25  ;;  %318 = vst.msk [vmem:[#allocation2 + $0x203] sm:$0xff] %vm251_vm0, %v243_v26  ;;  %v589_v38 = vld [vmem:[%s3401_s28 + $0x28] sm:$0xff]  ;;  %v590_v39 = vld [vmem:[%s3401_s28 + $0x30] sm:$0xff] }
  0x23   : > { %279 = vst.msk [vmem:[#allocation2 + $0x18b] sm:$0xff] %vm251_vm0, %v245_v28  ;;  %280 = vst.msk [vmem:[#allocation2 + $0x19b] sm:$0xff] %vm251_vm0, %v246_v29  ;;  %v591_v40 = vld [vmem:[%s3401_s28 + $0x38] sm:$0xff]  ;;  %v592_v41 = vld [vmem:[%s3401_s28 + $0x40] sm:$0xff] }
  0x24   : > { %281 = vst.msk [vmem:[#allocation2 + $0x1a3] sm:$0xff] %vm251_vm0, %v247_v30  ;;  %293 = vst.msk [vmem:[#allocation2 + $0x1cb] sm:$0xff] %vm251_vm0, %v246_v29  ;;  %v593_v42 = vld [vmem:[%s3401_s28 + $0x48] sm:$0xff]  ;;  %v594_v43 = vld [vmem:[%s3401_s28 + $0x50] sm:$0xff] }
  0x25   : > { %294 = vst.msk [vmem:[#allocation2 + $0x1d3] sm:$0xff] %vm251_vm0, %v247_v30  ;;  %306 = vst.msk [vmem:[#allocation2 + $0x1eb] sm:$0xff] %vm251_vm0, %v245_v28  ;;  %v595_v44 = vld [vmem:[%s3401_s28 + $0x58] sm:$0xff]  ;;  %v596_v45 = vld [vmem:[%s3401_s28 + $0x60] sm:$0xff] }
  0x26   : > { %282 = vst.msk [vmem:[#allocation2 + $0x1b3] sm:$0xff] %vm251_vm0, %v248_v31  ;;  %283 = vst.msk [vmem:[#allocation2 + $0x1bb] sm:$0xff] %vm251_vm0, %v249_v32  ;;  %v597_v46 = vld [vmem:[%s3401_s28 + $0x68] sm:$0xff]  ;;  %v598_v47 = vld [vmem:[%s3401_s28 + $0x70] sm:$0xff] }
  0x27   : > { %617 = vst.msk [vmem:[#allocation3 + $0x4b] sm:$0xff] %vm251_vm0, %v584_v33  ;;  %618 = vst.msk [vmem:[#allocation3 + $0x53] sm:$0xff] %vm251_vm0, %v585_v34  ;;  %v599_v48 = vld [vmem:[%s3401_s28 + $0x78] sm:$0xff]  ;;  %v600_v49 = vld [vmem:[%s3401_s28 + $0x80] sm:$0xff] }
  0x28   : > { %619 = vst.msk [vmem:[#allocation3 + $0x63] sm:$0xff] %vm251_vm0, %v586_v35  ;;  %620 = vst.msk [vmem:[#allocation3 + $0x6b] sm:$0xff] %vm251_vm0, %v587_v36  ;;  %v601_v50 = vld [vmem:[%s3401_s28 + $0x88] sm:$0xff]  ;;  %v602_v51 = vld [vmem:[%s3401_s28 + $0x90] sm:$0xff] }
  0x29   : > { %676 = vst.msk [vmem:[#allocation3 + $0x33] sm:$0xff] %vm251_vm0, %v586_v35  ;;  %677 = vst.msk [vmem:[#allocation3 + $0x3b] sm:$0xff] %vm251_vm0, %v587_v36  ;;  %v603_v52 = vld [vmem:[%s3401_s28 + $0x98] sm:$0xff]  ;;  %v604_v53 = vld [vmem:[%s3401_s28 + $0xa0] sm:$0xff] }
  0x2a   : > { %621 = vst.msk [vmem:[#allocation3 + $0x7b] sm:$0xff] %vm251_vm0, %v588_v37  ;;  %622 = vst.msk [vmem:[#allocation3 + $0x83] sm:$0xff] %vm251_vm0, %v589_v38  ;;  %v605_v54 = vld [vmem:[%s3401_s28 + $0xa8] sm:$0xff]  ;;  %v606_v55 = vld [vmem:[%s3401_s28 + $0xb0] sm:$0xff] }
  0x2b   : > { %623 = vst.msk [vmem:[#allocation3 + $0x93] sm:$0xff] %vm251_vm0, %v590_v39  ;;  %652 = vst.msk [vmem:[#allocation3 + $0x3] sm:$0xff] %vm251_vm0, %v590_v39  ;;  %v607_v56 = vld [vmem:[%s3401_s28 + $0xb8] sm:$0xff]  ;;  %v608_v57 = vld [vmem:[%s3401_s28 + $0xc0] sm:$0xff] }
  0x2c   : > { %664 = vst.msk [vmem:[#allocation3 + $0x1b] sm:$0xff] %vm251_vm0, %v588_v37  ;;  %665 = vst.msk [vmem:[#allocation3 + $0x23] sm:$0xff] %vm251_vm0, %v589_v38  ;;  %v609_v58 = vld [vmem:[%s3401_s28 + $0xc8] sm:$0xff]  ;;  %v610_v59 = vld [vmem:[%s3401_s28 + $0xd0] sm:$0xff] }
  0x2d   : > { %624 = vst.msk [vmem:[#allocation3 + $0x9b] sm:$0xff] %vm251_vm0, %v591_v40  ;;  %625 = vst.msk [vmem:[#allocation3 + $0xab] sm:$0xff] %vm251_vm0, %v592_v41  ;;  %v611_v60 = vld [vmem:[%s3401_s28 + $0xd8] sm:$0xff]  ;;  %v612_v61 = vld [vmem:[%s3401_s28 + $0xe0] sm:$0xff] }
  0x2e   : > { %626 = vst.msk [vmem:[#allocation3 + $0xb3] sm:$0xff] %vm251_vm0, %v593_v42  ;;  %653 = vst.msk [vmem:[#allocation3 + $0xb] sm:$0xff] %vm251_vm0, %v591_v40  ;;  %v613_v62 = vld [vmem:[%s3401_s28 + $0xe8] sm:$0xff]  ;;  %v614_v63 = vld [vmem:[%s3401_s28 + $0xf0] sm:$0xff] }
  0x2f   : > { %627 = vst.msk [vmem:[#allocation3 + $0xc3] sm:$0xff] %vm251_vm0, %v594_v43  ;;  %628 = vst.msk [vmem:[#allocation3 + $0xcb] sm:$0xff] %vm251_vm0, %v595_v44  ;;  %v615_v1 = vld [vmem:[%s3401_s28 + $0xf8] sm:$0xff]  ;;  %v319_v2 = vld [vmem:[#allocation2 + $0x6] sm:$0x1] }
  0x30   : > { %629 = vst.msk [vmem:[#allocation3 + $0xdb] sm:$0xff] %vm251_vm0, %v596_v45  ;;  %630 = vst.msk [vmem:[#allocation3 + $0xe3] sm:$0xff] %vm251_vm0, %v597_v46  ;;  %v320_v3 = vld [vmem:[#allocation2 + $0x1e] sm:$0x1]  ;;  %v321_v4 = vld [vmem:[#allocation2 + $0x36] sm:$0x1] }
  0x31   : > { %631 = vst.msk [vmem:[#allocation3 + $0xf3] sm:$0xff] %vm251_vm0, %v598_v47  ;;  %632 = vst.msk [vmem:[#allocation3 + $0xfb] sm:$0xff] %vm251_vm0, %v599_v48  ;;  %v322_v5 = vld [vmem:[#allocation2 + $0x4e] sm:$0x1]  ;;  %v323_v6 = vld [vmem:[#allocation2 + $0x66] sm:$0x1] }
  0x32   : > { %633 = vst.msk [vmem:[#allocation3 + $0x10b] sm:$0xff] %vm251_vm0, %v600_v49  ;;  %634 = vst.msk [vmem:[#allocation3 + $0x113] sm:$0xff] %vm251_vm0, %v601_v50  ;;  %v324_v7 = vld [vmem:[#allocation2 + $0x7e] sm:$0x1]  ;;  %v325_v8 = vld [vmem:[#allocation2 + $0x96] sm:$0x1] }
  0x33   : > { %635 = vst.msk [vmem:[#allocation3 + $0x123] sm:$0xff] %vm251_vm0, %v602_v51  ;;  %636 = vst.msk [vmem:[#allocation3 + $0x12b] sm:$0xff] %vm251_vm0, %v603_v52  ;;  %v326_v9 = vld [vmem:[#allocation2 + $0xae] sm:$0x1]  ;;  %v327_v10 = vld [vmem:[#allocation2 + $0xc6] sm:$0x1] }
  0x34   : > { %637 = vst.msk [vmem:[#allocation3 + $0x13b] sm:$0xff] %vm251_vm0, %v604_v53  ;;  %638 = vst.msk [vmem:[#allocation3 + $0x143] sm:$0xff] %vm251_vm0, %v605_v54  ;;  %v328_v11 = vld [vmem:[#allocation2 + $0xde] sm:$0x1]  ;;  %v329_v12 = vld [vmem:[#allocation2 + $0xf6] sm:$0x1] }
  0x35   : > { %639 = vst.msk [vmem:[#allocation3 + $0x153] sm:$0xff] %vm251_vm0, %v606_v55  ;;  %640 = vst.msk [vmem:[#allocation3 + $0x15b] sm:$0xff] %vm251_vm0, %v607_v56  ;;  %v330_v13 = vld [vmem:[#allocation2 + $0x10e] sm:$0x1]  ;;  %v331_v14 = vld [vmem:[#allocation2 + $0x126] sm:$0x1] }
  0x36   : > { %641 = vst.msk [vmem:[#allocation3 + $0x16b] sm:$0xff] %vm251_vm0, %v608_v57  ;;  %682 = vst.msk [vmem:[#allocation3 + $0x1fb] sm:$0xff] %vm251_vm0, %v608_v57  ;;  %v332_v15 = vld [vmem:[#allocation2 + $0x13e] sm:$0x1]  ;;  %v333_v16 = vld [vmem:[#allocation2 + $0x156] sm:$0x1] }
  0x37   : > { %642 = vst.msk [vmem:[#allocation3 + $0x173] sm:$0xff] %vm251_vm0, %v609_v58  ;;  %643 = vst.msk [vmem:[#allocation3 + $0x183] sm:$0xff] %vm251_vm0, %v610_v59  ;;  %v334_v17 = vld [vmem:[#allocation2 + $0x16e] sm:$0x1]  ;;  %v335_v18 = vld [vmem:[#allocation2 + $0x186] sm:$0x1] }
  0x38   : > { %644 = vst.msk [vmem:[#allocation3 + $0x18b] sm:$0xff] %vm251_vm0, %v611_v60  ;;  %670 = vst.msk [vmem:[#allocation3 + $0x1e3] sm:$0xff] %vm251_vm0, %v610_v59  ;;  %v336_v19 = vld [vmem:[#allocation2 + $0x19e] sm:$0x1]  ;;  %v337_v20 = vld [vmem:[#allocation2 + $0x1b6] sm:$0x1] }
  0x39   : > { %671 = vst.msk [vmem:[#allocation3 + $0x1eb] sm:$0xff] %vm251_vm0, %v611_v60  ;;  %683 = vst.msk [vmem:[#allocation3 + $0x203] sm:$0xff] %vm251_vm0, %v609_v58  ;;  %v338_v21 = vld [vmem:[#allocation2 + $0x1ce] sm:$0x1]  ;;  %v339_v22 = vld [vmem:[#allocation2 + $0x1e6] sm:$0x1] }
  0x3a   : > { %645 = vst.msk [vmem:[#allocation3 + $0x19b] sm:$0xff] %vm251_vm0, %v612_v61  ;;  %646 = vst.msk [vmem:[#allocation3 + $0x1a3] sm:$0xff] %vm251_vm0, %v613_v62  ;;  %v340_v23 = vld [vmem:[#allocation2 + $0x1fe] sm:$0x1]  ;;  %v364_v24 = vld [vmem:[#allocation2 + $0x11] sm:$0x1] }
  0x3b   : > { %647 = vst.msk [vmem:[#allocation3 + $0x1b3] sm:$0xff] %vm251_vm0, %v614_v63  ;;  %658 = vst.msk [vmem:[#allocation3 + $0x1cb] sm:$0xff] %vm251_vm0, %v612_v61  ;;  %v365_v25 = vld [vmem:[#allocation2 + $0x29] sm:$0x1]  ;;  %v366_v26 = vld [vmem:[#allocation2 + $0x41] sm:$0x1] }
  0x3c   : > { %659 = vst.msk [vmem:[#allocation3 + $0x1d3] sm:$0xff] %vm251_vm0, %v613_v62  ;;  %648 = vst.msk [vmem:[#allocation3 + $0x1bb] sm:$0xff] %vm251_vm0, %v615_v1  ;;  %v367_v27 = vld [vmem:[#allocation2 + $0x59] sm:$0x1]  ;;  %v368_v28 = vld [vmem:[#allocation2 + $0x71] sm:$0x1] }
  0x3d   : > { %342 = vst.msk [vmem:[#allocation2] sm:$0x1] %vm341_vm1, %v319_v2  ;;  %343 = vst.msk [vmem:[#allocation2 + $0x18] sm:$0x1] %vm341_vm1, %v320_v3  ;;  %v369_v29 = vld [vmem:[#allocation2 + $0x89] sm:$0x1] }
  0x3e   : > { %344 = vst.msk [vmem:[#allocation2 + $0x30] sm:$0x1] %vm341_vm1, %v321_v4  ;;  %345 = vst.msk [vmem:[#allocation2 + $0x48] sm:$0x1] %vm341_vm1, %v322_v5  ;;  %v370_v30 = vld [vmem:[#allocation2 + $0xa1] sm:$0x1] }
  0x3f   : > { %346 = vst.msk [vmem:[#allocation2 + $0x60] sm:$0x1] %vm341_vm1, %v323_v6  ;;  %347 = vst.msk [vmem:[#allocation2 + $0x78] sm:$0x1] %vm341_vm1, %v324_v7  ;;  %v371_v31 = vld [vmem:[#allocation2 + $0xb9] sm:$0x1] }
  0x40   : > { %348 = vst.msk [vmem:[#allocation2 + $0x90] sm:$0x1] %vm341_vm1, %v325_v8  ;;  %349 = vst.msk [vmem:[#allocation2 + $0xa8] sm:$0x1] %vm341_vm1, %v326_v9  ;;  %v372_v32 = vld [vmem:[#allocation2 + $0xd1] sm:$0x1] }
  0x41   : > { %350 = vst.msk [vmem:[#allocation2 + $0xc0] sm:$0x1] %vm341_vm1, %v327_v10  ;;  %351 = vst.msk [vmem:[#allocation2 + $0xd8] sm:$0x1] %vm341_vm1, %v328_v11  ;;  %v373_v33 = vld [vmem:[#allocation2 + $0xe9] sm:$0x1] }
  0x42   : > { %352 = vst.msk [vmem:[#allocation2 + $0xf0] sm:$0x1] %vm341_vm1, %v329_v12  ;;  %353 = vst.msk [vmem:[#allocation2 + $0x108] sm:$0x1] %vm341_vm1, %v330_v13  ;;  %v374_v34 = vld [vmem:[#allocation2 + $0x101] sm:$0x1] }
  0x43   : > { %354 = vst.msk [vmem:[#allocation2 + $0x120] sm:$0x1] %vm341_vm1, %v331_v14  ;;  %355 = vst.msk [vmem:[#allocation2 + $0x138] sm:$0x1] %vm341_vm1, %v332_v15  ;;  %v375_v35 = vld [vmem:[#allocation2 + $0x119] sm:$0x1] }
  0x44   : > { %356 = vst.msk [vmem:[#allocation2 + $0x150] sm:$0x1] %vm341_vm1, %v333_v16  ;;  %357 = vst.msk [vmem:[#allocation2 + $0x168] sm:$0x1] %vm341_vm1, %v334_v17  ;;  %v376_v36 = vld [vmem:[#allocation2 + $0x131] sm:$0x1] }
  0x45   : > { %358 = vst.msk [vmem:[#allocation2 + $0x180] sm:$0x1] %vm341_vm1, %v335_v18  ;;  %359 = vst.msk [vmem:[#allocation2 + $0x198] sm:$0x1] %vm341_vm1, %v336_v19  ;;  %v377_v37 = vld [vmem:[#allocation2 + $0x149] sm:$0x1] }
  0x46   : > { %360 = vst.msk [vmem:[#allocation2 + $0x1b0] sm:$0x1] %vm341_vm1, %v337_v20  ;;  %361 = vst.msk [vmem:[#allocation2 + $0x1c8] sm:$0x1] %vm341_vm1, %v338_v21  ;;  %v378_v38 = vld [vmem:[#allocation2 + $0x161] sm:$0x1] }
  0x47   : > { %362 = vst.msk [vmem:[#allocation2 + $0x1e0] sm:$0x1] %vm341_vm1, %v339_v22  ;;  %363 = vst.msk [vmem:[#allocation2 + $0x1f8] sm:$0x1] %vm341_vm1, %v340_v23  ;;  %v379_v39 = vld [vmem:[#allocation2 + $0x179] sm:$0x1] }
  0x48   : > { %386 = vst.msk [vmem:[#allocation2 + $0x13] sm:$0x1] %vm341_vm1, %v364_v24  ;;  %387 = vst.msk [vmem:[#allocation2 + $0x2b] sm:$0x1] %vm341_vm1, %v365_v25  ;;  %v380_v40 = vld [vmem:[#allocation2 + $0x191] sm:$0x1] }
  0x49   : > { %388 = vst.msk [vmem:[#allocation2 + $0x43] sm:$0x1] %vm341_vm1, %v366_v26  ;;  %389 = vst.msk [vmem:[#allocation2 + $0x5b] sm:$0x1] %vm341_vm1, %v367_v27  ;;  %v381_v41 = vld [vmem:[#allocation2 + $0x1a9] sm:$0x1] }
  0x4a   : > { %390 = vst.msk [vmem:[#allocation2 + $0x73] sm:$0x1] %vm341_vm1, %v368_v28  ;;  %391 = vst.msk [vmem:[#allocation2 + $0x8b] sm:$0x1] %vm341_vm1, %v369_v29  ;;  %v382_v42 = vld [vmem:[#allocation2 + $0x1c1] sm:$0x1] }
  0x4b   : > { %392 = vst.msk [vmem:[#allocation2 + $0xa3] sm:$0x1] %vm341_vm1, %v370_v30  ;;  %393 = vst.msk [vmem:[#allocation2 + $0xbb] sm:$0x1] %vm341_vm1, %v371_v31  ;;  %v383_v43 = vld [vmem:[#allocation2 + $0x1d9] sm:$0x1] }
  0x4c   : > { %394 = vst.msk [vmem:[#allocation2 + $0xd3] sm:$0x1] %vm341_vm1, %v372_v32  ;;  %395 = vst.msk [vmem:[#allocation2 + $0xeb] sm:$0x1] %vm341_vm1, %v373_v33  ;;  %v384_v44 = vld [vmem:[#allocation2 + $0x1f1] sm:$0x1] }
  0x4d   : > { %396 = vst.msk [vmem:[#allocation2 + $0x103] sm:$0x1] %vm341_vm1, %v374_v34  ;;  %397 = vst.msk [vmem:[#allocation2 + $0x11b] sm:$0x1] %vm341_vm1, %v375_v35  ;;  %v385_v45 = vld [vmem:[#allocation2 + $0x209] sm:$0x1] }
  0x4e   : > { %398 = vst.msk [vmem:[#allocation2 + $0x133] sm:$0x1] %vm341_vm1, %v376_v36  ;;  %399 = vst.msk [vmem:[#allocation2 + $0x14b] sm:$0x1] %vm341_vm1, %v377_v37  ;;  %v408_v46 = vld [vmem:[#allocation2 + $0x5] sm:$0x1] }
  0x4f   : > { %400 = vst.msk [vmem:[#allocation2 + $0x163] sm:$0x1] %vm341_vm1, %v378_v38  ;;  %401 = vst.msk [vmem:[#allocation2 + $0x17b] sm:$0x1] %vm341_vm1, %v379_v39  ;;  %v409_v47 = vld [vmem:[#allocation2 + $0x1d] sm:$0x1] }
  0x50   : > { %402 = vst.msk [vmem:[#allocation2 + $0x193] sm:$0x1] %vm341_vm1, %v380_v40  ;;  %403 = vst.msk [vmem:[#allocation2 + $0x1ab] sm:$0x1] %vm341_vm1, %v381_v41  ;;  %v410_v48 = vld [vmem:[#allocation2 + $0x35] sm:$0x1] }
  0x51   : > { %404 = vst.msk [vmem:[#allocation2 + $0x1c3] sm:$0x1] %vm341_vm1, %v382_v42  ;;  %405 = vst.msk [vmem:[#allocation2 + $0x1db] sm:$0x1] %vm341_vm1, %v383_v43  ;;  %v411_v49 = vld [vmem:[#allocation2 + $0x4d] sm:$0x1] }
  0x52   : > { %406 = vst.msk [vmem:[#allocation2 + $0x1f3] sm:$0x1] %vm341_vm1, %v384_v44  ;;  %407 = vst.msk [vmem:[#allocation2 + $0x20b] sm:$0x1] %vm341_vm1, %v385_v45  ;;  %v412_v50 = vld [vmem:[#allocation2 + $0x65] sm:$0x1] }
  0x53   : > { %430 = vst.msk [vmem:[#allocation2 + $0x1] sm:$0x1] %vm341_vm1, %v408_v46  ;;  %431 = vst.msk [vmem:[#allocation2 + $0x19] sm:$0x1] %vm341_vm1, %v409_v47  ;;  %v413_v51 = vld [vmem:[#allocation2 + $0x7d] sm:$0x1] }
  0x54   : > { %432 = vst.msk [vmem:[#allocation2 + $0x31] sm:$0x1] %vm341_vm1, %v410_v48  ;;  %433 = vst.msk [vmem:[#allocation2 + $0x49] sm:$0x1] %vm341_vm1, %v411_v49  ;;  %v414_v52 = vld [vmem:[#allocation2 + $0x95] sm:$0x1] }
  0x55   : > { %434 = vst.msk [vmem:[#allocation2 + $0x61] sm:$0x1] %vm341_vm1, %v412_v50  ;;  %435 = vst.msk [vmem:[#allocation2 + $0x79] sm:$0x1] %vm341_vm1, %v413_v51  ;;  %v415_v53 = vld [vmem:[#allocation2 + $0xad] sm:$0x1] }
  0x56   : > { %v416_v54 = vld [vmem:[#allocation2 + $0xc5] sm:$0x1]  ;;  %436 = vst.msk [vmem:[#allocation2 + $0x91] sm:$0x1] %vm341_vm1, %v414_v52  ;;  %437 = vst.msk [vmem:[#allocation2 + $0xa9] sm:$0x1] %vm341_vm1, %v415_v53 }
  0x57   : > { %438 = vst.msk [vmem:[#allocation2 + $0xc1] sm:$0x1] %vm341_vm1, %v416_v54  ;;  %v417_v55 = vld [vmem:[#allocation2 + $0xdd] sm:$0x1]  ;;  %v418_v56 = vld [vmem:[#allocation2 + $0xf5] sm:$0x1] }
  0x58   : > { %v419_v57 = vld [vmem:[#allocation2 + $0x10d] sm:$0x1]  ;;  %439 = vst.msk [vmem:[#allocation2 + $0xd9] sm:$0x1] %vm341_vm1, %v417_v55  ;;  %440 = vst.msk [vmem:[#allocation2 + $0xf1] sm:$0x1] %vm341_vm1, %v418_v56 }
  0x59   : > { %441 = vst.msk [vmem:[#allocation2 + $0x109] sm:$0x1] %vm341_vm1, %v419_v57  ;;  %v420_v58 = vld [vmem:[#allocation2 + $0x125] sm:$0x1]  ;;  %v421_v59 = vld [vmem:[#allocation2 + $0x13d] sm:$0x1] }
  0x5a   : > { %v422_v60 = vld [vmem:[#allocation2 + $0x155] sm:$0x1]  ;;  %442 = vst.msk [vmem:[#allocation2 + $0x121] sm:$0x1] %vm341_vm1, %v420_v58  ;;  %443 = vst.msk [vmem:[#allocation2 + $0x139] sm:$0x1] %vm341_vm1, %v421_v59 }
  0x5b   : > { %444 = vst.msk [vmem:[#allocation2 + $0x151] sm:$0x1] %vm341_vm1, %v422_v60  ;;  %v423_v61 = vld [vmem:[#allocation2 + $0x16d] sm:$0x1]  ;;  %v424_v62 = vld [vmem:[#allocation2 + $0x185] sm:$0x1] }
  0x5c   : > { %v425_v63 = vld [vmem:[#allocation2 + $0x19d] sm:$0x1]  ;;  %445 = vst.msk [vmem:[#allocation2 + $0x169] sm:$0x1] %vm341_vm1, %v423_v61  ;;  %446 = vst.msk [vmem:[#allocation2 + $0x181] sm:$0x1] %vm341_vm1, %v424_v62 }
  0x5d   : > { %447 = vst.msk [vmem:[#allocation2 + $0x199] sm:$0x1] %vm341_vm1, %v425_v63  ;;  %v426_v1 = vld [vmem:[#allocation2 + $0x1b5] sm:$0x1]  ;;  %v427_v2 = vld [vmem:[#allocation2 + $0x1cd] sm:$0x1] }
  0x5e   : > { %v428_v3 = vld [vmem:[#allocation2 + $0x1e5] sm:$0x1]  ;;  %448 = vst.msk [vmem:[#allocation2 + $0x1b1] sm:$0x1] %vm341_vm1, %v426_v1  ;;  %449 = vst.msk [vmem:[#allocation2 + $0x1c9] sm:$0x1] %vm341_vm1, %v427_v2 }
  0x5f   : > { %450 = vst.msk [vmem:[#allocation2 + $0x1e1] sm:$0x1] %vm341_vm1, %v428_v3  ;;  %v429_v4 = vld [vmem:[#allocation2 + $0x1fd] sm:$0x1]  ;;  %v452_v5 = vld [vmem:[#allocation2 + $0x10] sm:$0x1] }
  0x60   : > { %v453_v6 = vld [vmem:[#allocation2 + $0x28] sm:$0x1]  ;;  %451 = vst.msk [vmem:[#allocation2 + $0x1f9] sm:$0x1] %vm341_vm1, %v429_v4  ;;  %474 = vst.msk [vmem:[#allocation2 + $0x14] sm:$0x1] %vm341_vm1, %v452_v5 }
  0x61   : > { %475 = vst.msk [vmem:[#allocation2 + $0x2c] sm:$0x1] %vm341_vm1, %v453_v6  ;;  %v454_v7 = vld [vmem:[#allocation2 + $0x40] sm:$0x1]  ;;  %v455_v8 = vld [vmem:[#allocation2 + $0x58] sm:$0x1] }
  0x62   : > { %v456_v9 = vld [vmem:[#allocation2 + $0x70] sm:$0x1]  ;;  %476 = vst.msk [vmem:[#allocation2 + $0x44] sm:$0x1] %vm341_vm1, %v454_v7  ;;  %477 = vst.msk [vmem:[#allocation2 + $0x5c] sm:$0x1] %vm341_vm1, %v455_v8 }
  0x63   : > { %478 = vst.msk [vmem:[#allocation2 + $0x74] sm:$0x1] %vm341_vm1, %v456_v9  ;;  %v457_v10 = vld [vmem:[#allocation2 + $0x88] sm:$0x1]  ;;  %v458_v11 = vld [vmem:[#allocation2 + $0xa0] sm:$0x1] }
  0x64   : > { %v459_v12 = vld [vmem:[#allocation2 + $0xb8] sm:$0x1]  ;;  %479 = vst.msk [vmem:[#allocation2 + $0x8c] sm:$0x1] %vm341_vm1, %v457_v10  ;;  %480 = vst.msk [vmem:[#allocation2 + $0xa4] sm:$0x1] %vm341_vm1, %v458_v11 }
  0x65   : > { %481 = vst.msk [vmem:[#allocation2 + $0xbc] sm:$0x1] %vm341_vm1, %v459_v12  ;;  %v460_v13 = vld [vmem:[#allocation2 + $0xd0] sm:$0x1]  ;;  %v461_v14 = vld [vmem:[#allocation2 + $0xe8] sm:$0x1] }
  0x66   : > { %v462_v15 = vld [vmem:[#allocation2 + $0x100] sm:$0x1]  ;;  %482 = vst.msk [vmem:[#allocation2 + $0xd4] sm:$0x1] %vm341_vm1, %v460_v13  ;;  %483 = vst.msk [vmem:[#allocation2 + $0xec] sm:$0x1] %vm341_vm1, %v461_v14 }
  0x67   : > { %484 = vst.msk [vmem:[#allocation2 + $0x104] sm:$0x1] %vm341_vm1, %v462_v15  ;;  %v463_v16 = vld [vmem:[#allocation2 + $0x118] sm:$0x1]  ;;  %v464_v17 = vld [vmem:[#allocation2 + $0x130] sm:$0x1] }
  0x68   : > { %v465_v18 = vld [vmem:[#allocation2 + $0x148] sm:$0x1]  ;;  %485 = vst.msk [vmem:[#allocation2 + $0x11c] sm:$0x1] %vm341_vm1, %v463_v16  ;;  %486 = vst.msk [vmem:[#allocation2 + $0x134] sm:$0x1] %vm341_vm1, %v464_v17 }
  0x69   : > { %487 = vst.msk [vmem:[#allocation2 + $0x14c] sm:$0x1] %vm341_vm1, %v465_v18  ;;  %v466_v19 = vld [vmem:[#allocation2 + $0x160] sm:$0x1]  ;;  %v467_v20 = vld [vmem:[#allocation2 + $0x178] sm:$0x1] }
  0x6a   : > { %v468_v21 = vld [vmem:[#allocation2 + $0x190] sm:$0x1]  ;;  %488 = vst.msk [vmem:[#allocation2 + $0x164] sm:$0x1] %vm341_vm1, %v466_v19  ;;  %489 = vst.msk [vmem:[#allocation2 + $0x17c] sm:$0x1] %vm341_vm1, %v467_v20 }
  0x6b   : > { %490 = vst.msk [vmem:[#allocation2 + $0x194] sm:$0x1] %vm341_vm1, %v468_v21  ;;  %v469_v22 = vld [vmem:[#allocation2 + $0x1a8] sm:$0x1]  ;;  %v470_v23 = vld [vmem:[#allocation2 + $0x1c0] sm:$0x1] }
  0x6c   : > { %v471_v24 = vld [vmem:[#allocation2 + $0x1d8] sm:$0x1]  ;;  %491 = vst.msk [vmem:[#allocation2 + $0x1ac] sm:$0x1] %vm341_vm1, %v469_v22  ;;  %492 = vst.msk [vmem:[#allocation2 + $0x1c4] sm:$0x1] %vm341_vm1, %v470_v23 }
  0x6d   : > { %493 = vst.msk [vmem:[#allocation2 + $0x1dc] sm:$0x1] %vm341_vm1, %v471_v24  ;;  %v472_v25 = vld [vmem:[#allocation2 + $0x1f0] sm:$0x1]  ;;  %v473_v26 = vld [vmem:[#allocation2 + $0x208] sm:$0x1] }
  0x6e   : > { %v496_v27 = vld [vmem:[#allocation2 + $0x4] sm:$0x1]  ;;  %494 = vst.msk [vmem:[#allocation2 + $0x1f4] sm:$0x1] %vm341_vm1, %v472_v25  ;;  %495 = vst.msk [vmem:[#allocation2 + $0x20c] sm:$0x1] %vm341_vm1, %v473_v26 }
  0x6f   : > { %518 = vst.msk [vmem:[#allocation2 + $0x2] sm:$0x1] %vm341_vm1, %v496_v27  ;;  %v497_v28 = vld [vmem:[#allocation2 + $0x1c] sm:$0x1]  ;;  %v498_v29 = vld [vmem:[#allocation2 + $0x34] sm:$0x1] }
  0x70   : > { %v499_v30 = vld [vmem:[#allocation2 + $0x4c] sm:$0x1]  ;;  %519 = vst.msk [vmem:[#allocation2 + $0x1a] sm:$0x1] %vm341_vm1, %v497_v28  ;;  %520 = vst.msk [vmem:[#allocation2 + $0x32] sm:$0x1] %vm341_vm1, %v498_v29 }
  0x71   : > { %521 = vst.msk [vmem:[#allocation2 + $0x4a] sm:$0x1] %vm341_vm1, %v499_v30  ;;  %v500_v31 = vld [vmem:[#allocation2 + $0x64] sm:$0x1]  ;;  %v501_v32 = vld [vmem:[#allocation2 + $0x7c] sm:$0x1] }
  0x72   : > { %v502_v33 = vld [vmem:[#allocation2 + $0x94] sm:$0x1]  ;;  %522 = vst.msk [vmem:[#allocation2 + $0x62] sm:$0x1] %vm341_vm1, %v500_v31  ;;  %523 = vst.msk [vmem:[#allocation2 + $0x7a] sm:$0x1] %vm341_vm1, %v501_v32 }
  0x73   : > { %524 = vst.msk [vmem:[#allocation2 + $0x92] sm:$0x1] %vm341_vm1, %v502_v33  ;;  %v503_v34 = vld [vmem:[#allocation2 + $0xac] sm:$0x1]  ;;  %v504_v35 = vld [vmem:[#allocation2 + $0xc4] sm:$0x1] }
  0x74   : > { %v505_v36 = vld [vmem:[#allocation2 + $0xdc] sm:$0x1]  ;;  %525 = vst.msk [vmem:[#allocation2 + $0xaa] sm:$0x1] %vm341_vm1, %v503_v34  ;;  %526 = vst.msk [vmem:[#allocation2 + $0xc2] sm:$0x1] %vm341_vm1, %v504_v35 }
  0x75   : > { %527 = vst.msk [vmem:[#allocation2 + $0xda] sm:$0x1] %vm341_vm1, %v505_v36  ;;  %v506_v37 = vld [vmem:[#allocation2 + $0xf4] sm:$0x1]  ;;  %v507_v38 = vld [vmem:[#allocation2 + $0x10c] sm:$0x1] }
  0x76   : > { %v508_v39 = vld [vmem:[#allocation2 + $0x124] sm:$0x1]  ;;  %528 = vst.msk [vmem:[#allocation2 + $0xf2] sm:$0x1] %vm341_vm1, %v506_v37  ;;  %529 = vst.msk [vmem:[#allocation2 + $0x10a] sm:$0x1] %vm341_vm1, %v507_v38 }
  0x77   : > { %530 = vst.msk [vmem:[#allocation2 + $0x122] sm:$0x1] %vm341_vm1, %v508_v39  ;;  %v509_v40 = vld [vmem:[#allocation2 + $0x13c] sm:$0x1]  ;;  %v510_v41 = vld [vmem:[#allocation2 + $0x154] sm:$0x1] }
  0x78   : > { %v511_v42 = vld [vmem:[#allocation2 + $0x16c] sm:$0x1]  ;;  %531 = vst.msk [vmem:[#allocation2 + $0x13a] sm:$0x1] %vm341_vm1, %v509_v40  ;;  %532 = vst.msk [vmem:[#allocation2 + $0x152] sm:$0x1] %vm341_vm1, %v510_v41 }
  0x79   : > { %533 = vst.msk [vmem:[#allocation2 + $0x16a] sm:$0x1] %vm341_vm1, %v511_v42  ;;  %v512_v43 = vld [vmem:[#allocation2 + $0x184] sm:$0x1]  ;;  %v513_v44 = vld [vmem:[#allocation2 + $0x19c] sm:$0x1] }
  0x7a   : > { %v514_v45 = vld [vmem:[#allocation2 + $0x1b4] sm:$0x1]  ;;  %534 = vst.msk [vmem:[#allocation2 + $0x182] sm:$0x1] %vm341_vm1, %v512_v43  ;;  %535 = vst.msk [vmem:[#allocation2 + $0x19a] sm:$0x1] %vm341_vm1, %v513_v44 }
  0x7b   : > { %536 = vst.msk [vmem:[#allocation2 + $0x1b2] sm:$0x1] %vm341_vm1, %v514_v45  ;;  %v515_v46 = vld [vmem:[#allocation2 + $0x1cc] sm:$0x1]  ;;  %v516_v47 = vld [vmem:[#allocation2 + $0x1e4] sm:$0x1] }
  0x7c   : > { %v517_v48 = vld [vmem:[#allocation2 + $0x1fc] sm:$0x1]  ;;  %537 = vst.msk [vmem:[#allocation2 + $0x1ca] sm:$0x1] %vm341_vm1, %v515_v46  ;;  %538 = vst.msk [vmem:[#allocation2 + $0x1e2] sm:$0x1] %vm341_vm1, %v516_v47 }
  0x7d   : > { %539 = vst.msk [vmem:[#allocation2 + $0x1fa] sm:$0x1] %vm341_vm1, %v517_v48  ;;  %v540_v49 = vld [vmem:[#allocation2 + $0xf] sm:$0x1]  ;;  %v541_v50 = vld [vmem:[#allocation2 + $0x27] sm:$0x1] }
  0x7e   : > { %v542_v51 = vld [vmem:[#allocation2 + $0x3f] sm:$0x1]  ;;  %562 = vst.msk [vmem:[#allocation2 + $0x15] sm:$0x1] %vm341_vm1, %v540_v49  ;;  %563 = vst.msk [vmem:[#allocation2 + $0x2d] sm:$0x1] %vm341_vm1, %v541_v50 }
  0x7f   : > { %564 = vst.msk [vmem:[#allocation2 + $0x45] sm:$0x1] %vm341_vm1, %v542_v51  ;;  %v543_v52 = vld [vmem:[#allocation2 + $0x57] sm:$0x1]  ;;  %v544_v53 = vld [vmem:[#allocation2 + $0x6f] sm:$0x1] }
  0x80   : > { %v545_v54 = vld [vmem:[#allocation2 + $0x87] sm:$0x1]  ;;  %565 = vst.msk [vmem:[#allocation2 + $0x5d] sm:$0x1] %vm341_vm1, %v543_v52  ;;  %566 = vst.msk [vmem:[#allocation2 + $0x75] sm:$0x1] %vm341_vm1, %v544_v53 }
  0x81   : > { %567 = vst.msk [vmem:[#allocation2 + $0x8d] sm:$0x1] %vm341_vm1, %v545_v54  ;;  %v546_v55 = vld [vmem:[#allocation2 + $0x9f] sm:$0x1]  ;;  %v547_v56 = vld [vmem:[#allocation2 + $0xb7] sm:$0x1] }
  0x82   : > { %v548_v57 = vld [vmem:[#allocation2 + $0xcf] sm:$0x1]  ;;  %568 = vst.msk [vmem:[#allocation2 + $0xa5] sm:$0x1] %vm341_vm1, %v546_v55  ;;  %569 = vst.msk [vmem:[#allocation2 + $0xbd] sm:$0x1] %vm341_vm1, %v547_v56 }
  0x83   : > { %570 = vst.msk [vmem:[#allocation2 + $0xd5] sm:$0x1] %vm341_vm1, %v548_v57  ;;  %v549_v58 = vld [vmem:[#allocation2 + $0xe7] sm:$0x1]  ;;  %v550_v59 = vld [vmem:[#allocation2 + $0xff] sm:$0x1] }
  0x84   : > { %v551_v60 = vld [vmem:[#allocation2 + $0x117] sm:$0x1]  ;;  %571 = vst.msk [vmem:[#allocation2 + $0xed] sm:$0x1] %vm341_vm1, %v549_v58  ;;  %572 = vst.msk [vmem:[#allocation2 + $0x105] sm:$0x1] %vm341_vm1, %v550_v59 }
  0x85   : > { %573 = vst.msk [vmem:[#allocation2 + $0x11d] sm:$0x1] %vm341_vm1, %v551_v60  ;;  %v552_v61 = vld [vmem:[#allocation2 + $0x12f] sm:$0x1]  ;;  %v553_v62 = vld [vmem:[#allocation2 + $0x147] sm:$0x1] }
  0x86   : > { %v554_v63 = vld [vmem:[#allocation2 + $0x15f] sm:$0x1]  ;;  %574 = vst.msk [vmem:[#allocation2 + $0x135] sm:$0x1] %vm341_vm1, %v552_v61  ;;  %575 = vst.msk [vmem:[#allocation2 + $0x14d] sm:$0x1] %vm341_vm1, %v553_v62 }
  0x87   : > { %576 = vst.msk [vmem:[#allocation2 + $0x165] sm:$0x1] %vm341_vm1, %v554_v63  ;;  %v555_v1 = vld [vmem:[#allocation2 + $0x177] sm:$0x1]  ;;  %v556_v2 = vld [vmem:[#allocation2 + $0x18f] sm:$0x1] }
  0x88   : > { %v557_v3 = vld [vmem:[#allocation2 + $0x1a7] sm:$0x1]  ;;  %577 = vst.msk [vmem:[#allocation2 + $0x17d] sm:$0x1] %vm341_vm1, %v555_v1  ;;  %578 = vst.msk [vmem:[#allocation2 + $0x195] sm:$0x1] %vm341_vm1, %v556_v2 }
  0x89   : > { %579 = vst.msk [vmem:[#allocation2 + $0x1ad] sm:$0x1] %vm341_vm1, %v557_v3  ;;  %v558_v4 = vld [vmem:[#allocation2 + $0x1bf] sm:$0x1]  ;;  %v559_v5 = vld [vmem:[#allocation2 + $0x1d7] sm:$0x1] }
  0x8a   : > { %v560_v6 = vld [vmem:[#allocation2 + $0x1ef] sm:$0x1]  ;;  %580 = vst.msk [vmem:[#allocation2 + $0x1c5] sm:$0x1] %vm341_vm1, %v558_v4  ;;  %581 = vst.msk [vmem:[#allocation2 + $0x1dd] sm:$0x1] %vm341_vm1, %v559_v5 }
  0x8b   : > { %582 = vst.msk [vmem:[#allocation2 + $0x1f5] sm:$0x1] %vm341_vm1, %v560_v6  ;;  %v561_v7 = vld [vmem:[#allocation2 + $0x207] sm:$0x1]  ;;  %v684_v8 = vld [vmem:[#allocation3 + $0x6] sm:$0x1] }
  0x8c   : > { %v685_v9 = vld [vmem:[#allocation3 + $0x1e] sm:$0x1]  ;;  %583 = vst.msk [vmem:[#allocation2 + $0x20d] sm:$0x1] %vm341_vm1, %v561_v7  ;;  %706 = vst.msk [vmem:[#allocation3] sm:$0x1] %vm341_vm1, %v684_v8 }
  0x8d   : > { %707 = vst.msk [vmem:[#allocation3 + $0x18] sm:$0x1] %vm341_vm1, %v685_v9  ;;  %v686_v10 = vld [vmem:[#allocation3 + $0x36] sm:$0x1]  ;;  %v687_v11 = vld [vmem:[#allocation3 + $0x4e] sm:$0x1] }
  0x8e   : > { %v688_v12 = vld [vmem:[#allocation3 + $0x66] sm:$0x1]  ;;  %708 = vst.msk [vmem:[#allocation3 + $0x30] sm:$0x1] %vm341_vm1, %v686_v10  ;;  %709 = vst.msk [vmem:[#allocation3 + $0x48] sm:$0x1] %vm341_vm1, %v687_v11 }
  0x8f   : > { %710 = vst.msk [vmem:[#allocation3 + $0x60] sm:$0x1] %vm341_vm1, %v688_v12  ;;  %v689_v13 = vld [vmem:[#allocation3 + $0x7e] sm:$0x1]  ;;  %v690_v14 = vld [vmem:[#allocation3 + $0x96] sm:$0x1] }
  0x90   : > { %v691_v15 = vld [vmem:[#allocation3 + $0xae] sm:$0x1]  ;;  %711 = vst.msk [vmem:[#allocation3 + $0x78] sm:$0x1] %vm341_vm1, %v689_v13  ;;  %712 = vst.msk [vmem:[#allocation3 + $0x90] sm:$0x1] %vm341_vm1, %v690_v14 }
  0x91   : > { %713 = vst.msk [vmem:[#allocation3 + $0xa8] sm:$0x1] %vm341_vm1, %v691_v15  ;;  %v692_v16 = vld [vmem:[#allocation3 + $0xc6] sm:$0x1]  ;;  %v693_v17 = vld [vmem:[#allocation3 + $0xde] sm:$0x1] }
  0x92   : > { %v694_v18 = vld [vmem:[#allocation3 + $0xf6] sm:$0x1]  ;;  %714 = vst.msk [vmem:[#allocation3 + $0xc0] sm:$0x1] %vm341_vm1, %v692_v16  ;;  %715 = vst.msk [vmem:[#allocation3 + $0xd8] sm:$0x1] %vm341_vm1, %v693_v17 }
  0x93   : > { %716 = vst.msk [vmem:[#allocation3 + $0xf0] sm:$0x1] %vm341_vm1, %v694_v18  ;;  %v695_v19 = vld [vmem:[#allocation3 + $0x10e] sm:$0x1]  ;;  %v696_v20 = vld [vmem:[#allocation3 + $0x126] sm:$0x1] }
  0x94   : > { %v697_v21 = vld [vmem:[#allocation3 + $0x13e] sm:$0x1]  ;;  %717 = vst.msk [vmem:[#allocation3 + $0x108] sm:$0x1] %vm341_vm1, %v695_v19  ;;  %718 = vst.msk [vmem:[#allocation3 + $0x120] sm:$0x1] %vm341_vm1, %v696_v20 }
  0x95   : > { %719 = vst.msk [vmem:[#allocation3 + $0x138] sm:$0x1] %vm341_vm1, %v697_v21  ;;  %v698_v22 = vld [vmem:[#allocation3 + $0x156] sm:$0x1]  ;;  %v699_v23 = vld [vmem:[#allocation3 + $0x16e] sm:$0x1] }
  0x96   : > { %v700_v24 = vld [vmem:[#allocation3 + $0x186] sm:$0x1]  ;;  %720 = vst.msk [vmem:[#allocation3 + $0x150] sm:$0x1] %vm341_vm1, %v698_v22  ;;  %721 = vst.msk [vmem:[#allocation3 + $0x168] sm:$0x1] %vm341_vm1, %v699_v23 }
  0x97   : > { %722 = vst.msk [vmem:[#allocation3 + $0x180] sm:$0x1] %vm341_vm1, %v700_v24  ;;  %v701_v25 = vld [vmem:[#allocation3 + $0x19e] sm:$0x1]  ;;  %v702_v26 = vld [vmem:[#allocation3 + $0x1b6] sm:$0x1] }
  0x98   : > { %v703_v27 = vld [vmem:[#allocation3 + $0x1ce] sm:$0x1]  ;;  %723 = vst.msk [vmem:[#allocation3 + $0x198] sm:$0x1] %vm341_vm1, %v701_v25  ;;  %724 = vst.msk [vmem:[#allocation3 + $0x1b0] sm:$0x1] %vm341_vm1, %v702_v26 }
  0x99   : > { %725 = vst.msk [vmem:[#allocation3 + $0x1c8] sm:$0x1] %vm341_vm1, %v703_v27  ;;  %v704_v28 = vld [vmem:[#allocation3 + $0x1e6] sm:$0x1]  ;;  %v705_v29 = vld [vmem:[#allocation3 + $0x1fe] sm:$0x1] }
  0x9a   : > { %v728_v30 = vld [vmem:[#allocation3 + $0x11] sm:$0x1]  ;;  %726 = vst.msk [vmem:[#allocation3 + $0x1e0] sm:$0x1] %vm341_vm1, %v704_v28  ;;  %727 = vst.msk [vmem:[#allocation3 + $0x1f8] sm:$0x1] %vm341_vm1, %v705_v29 }
  0x9b   : > { %750 = vst.msk [vmem:[#allocation3 + $0x13] sm:$0x1] %vm341_vm1, %v728_v30  ;;  %v729_v31 = vld [vmem:[#allocation3 + $0x29] sm:$0x1]  ;;  %v730_v32 = vld [vmem:[#allocation3 + $0x41] sm:$0x1] }
  0x9c   : > { %v731_v33 = vld [vmem:[#allocation3 + $0x59] sm:$0x1]  ;;  %751 = vst.msk [vmem:[#allocation3 + $0x2b] sm:$0x1] %vm341_vm1, %v729_v31  ;;  %752 = vst.msk [vmem:[#allocation3 + $0x43] sm:$0x1] %vm341_vm1, %v730_v32 }
  0x9d   : > { %753 = vst.msk [vmem:[#allocation3 + $0x5b] sm:$0x1] %vm341_vm1, %v731_v33  ;;  %v732_v34 = vld [vmem:[#allocation3 + $0x71] sm:$0x1]  ;;  %v733_v35 = vld [vmem:[#allocation3 + $0x89] sm:$0x1] }
  0x9e   : > { %v734_v36 = vld [vmem:[#allocation3 + $0xa1] sm:$0x1]  ;;  %754 = vst.msk [vmem:[#allocation3 + $0x73] sm:$0x1] %vm341_vm1, %v732_v34  ;;  %755 = vst.msk [vmem:[#allocation3 + $0x8b] sm:$0x1] %vm341_vm1, %v733_v35 }
  0x9f   : > { %756 = vst.msk [vmem:[#allocation3 + $0xa3] sm:$0x1] %vm341_vm1, %v734_v36  ;;  %v735_v37 = vld [vmem:[#allocation3 + $0xb9] sm:$0x1]  ;;  %v736_v38 = vld [vmem:[#allocation3 + $0xd1] sm:$0x1] }
  0xa0   : > { %v737_v39 = vld [vmem:[#allocation3 + $0xe9] sm:$0x1]  ;;  %757 = vst.msk [vmem:[#allocation3 + $0xbb] sm:$0x1] %vm341_vm1, %v735_v37  ;;  %758 = vst.msk [vmem:[#allocation3 + $0xd3] sm:$0x1] %vm341_vm1, %v736_v38 }
  0xa1   : > { %759 = vst.msk [vmem:[#allocation3 + $0xeb] sm:$0x1] %vm341_vm1, %v737_v39  ;;  %v738_v40 = vld [vmem:[#allocation3 + $0x101] sm:$0x1]  ;;  %v739_v41 = vld [vmem:[#allocation3 + $0x119] sm:$0x1] }
  0xa2   : > { %v740_v42 = vld [vmem:[#allocation3 + $0x131] sm:$0x1]  ;;  %760 = vst.msk [vmem:[#allocation3 + $0x103] sm:$0x1] %vm341_vm1, %v738_v40  ;;  %761 = vst.msk [vmem:[#allocation3 + $0x11b] sm:$0x1] %vm341_vm1, %v739_v41 }
  0xa3   : > { %762 = vst.msk [vmem:[#allocation3 + $0x133] sm:$0x1] %vm341_vm1, %v740_v42  ;;  %v741_v43 = vld [vmem:[#allocation3 + $0x149] sm:$0x1]  ;;  %v742_v44 = vld [vmem:[#allocation3 + $0x161] sm:$0x1] }
  0xa4   : > { %v743_v45 = vld [vmem:[#allocation3 + $0x179] sm:$0x1]  ;;  %763 = vst.msk [vmem:[#allocation3 + $0x14b] sm:$0x1] %vm341_vm1, %v741_v43  ;;  %764 = vst.msk [vmem:[#allocation3 + $0x163] sm:$0x1] %vm341_vm1, %v742_v44 }
  0xa5   : > { %765 = vst.msk [vmem:[#allocation3 + $0x17b] sm:$0x1] %vm341_vm1, %v743_v45  ;;  %v744_v46 = vld [vmem:[#allocation3 + $0x191] sm:$0x1]  ;;  %v745_v47 = vld [vmem:[#allocation3 + $0x1a9] sm:$0x1] }
  0xa6   : > { %v746_v48 = vld [vmem:[#allocation3 + $0x1c1] sm:$0x1]  ;;  %766 = vst.msk [vmem:[#allocation3 + $0x193] sm:$0x1] %vm341_vm1, %v744_v46  ;;  %767 = vst.msk [vmem:[#allocation3 + $0x1ab] sm:$0x1] %vm341_vm1, %v745_v47 }
  0xa7   : > { %768 = vst.msk [vmem:[#allocation3 + $0x1c3] sm:$0x1] %vm341_vm1, %v746_v48  ;;  %v747_v49 = vld [vmem:[#allocation3 + $0x1d9] sm:$0x1]  ;;  %v748_v50 = vld [vmem:[#allocation3 + $0x1f1] sm:$0x1] }
  0xa8   : > { %v749_v51 = vld [vmem:[#allocation3 + $0x209] sm:$0x1]  ;;  %769 = vst.msk [vmem:[#allocation3 + $0x1db] sm:$0x1] %vm341_vm1, %v747_v49  ;;  %770 = vst.msk [vmem:[#allocation3 + $0x1f3] sm:$0x1] %vm341_vm1, %v748_v50 }
  0xa9   : > { %771 = vst.msk [vmem:[#allocation3 + $0x20b] sm:$0x1] %vm341_vm1, %v749_v51  ;;  %v772_v52 = vld [vmem:[#allocation3 + $0x5] sm:$0x1]  ;;  %v773_v53 = vld [vmem:[#allocation3 + $0x1d] sm:$0x1] }
  0xaa   : > { %v774_v54 = vld [vmem:[#allocation3 + $0x35] sm:$0x1]  ;;  %794 = vst.msk [vmem:[#allocation3 + $0x1] sm:$0x1] %vm341_vm1, %v772_v52  ;;  %795 = vst.msk [vmem:[#allocation3 + $0x19] sm:$0x1] %vm341_vm1, %v773_v53 }
  0xab   : > { %796 = vst.msk [vmem:[#allocation3 + $0x31] sm:$0x1] %vm341_vm1, %v774_v54  ;;  %v775_v55 = vld [vmem:[#allocation3 + $0x4d] sm:$0x1]  ;;  %v776_v56 = vld [vmem:[#allocation3 + $0x65] sm:$0x1] }
  0xac   : > { %v777_v57 = vld [vmem:[#allocation3 + $0x7d] sm:$0x1]  ;;  %797 = vst.msk [vmem:[#allocation3 + $0x49] sm:$0x1] %vm341_vm1, %v775_v55  ;;  %798 = vst.msk [vmem:[#allocation3 + $0x61] sm:$0x1] %vm341_vm1, %v776_v56 }
  0xad   : > { %799 = vst.msk [vmem:[#allocation3 + $0x79] sm:$0x1] %vm341_vm1, %v777_v57  ;;  %v778_v58 = vld [vmem:[#allocation3 + $0x95] sm:$0x1]  ;;  %v779_v59 = vld [vmem:[#allocation3 + $0xad] sm:$0x1] }
  0xae   : > { %v780_v60 = vld [vmem:[#allocation3 + $0xc5] sm:$0x1]  ;;  %800 = vst.msk [vmem:[#allocation3 + $0x91] sm:$0x1] %vm341_vm1, %v778_v58  ;;  %801 = vst.msk [vmem:[#allocation3 + $0xa9] sm:$0x1] %vm341_vm1, %v779_v59 }
  0xaf   : > { %802 = vst.msk [vmem:[#allocation3 + $0xc1] sm:$0x1] %vm341_vm1, %v780_v60  ;;  %v781_v61 = vld [vmem:[#allocation3 + $0xdd] sm:$0x1]  ;;  %v782_v62 = vld [vmem:[#allocation3 + $0xf5] sm:$0x1] }
  0xb0   : > { %v783_v63 = vld [vmem:[#allocation3 + $0x10d] sm:$0x1]  ;;  %803 = vst.msk [vmem:[#allocation3 + $0xd9] sm:$0x1] %vm341_vm1, %v781_v61  ;;  %804 = vst.msk [vmem:[#allocation3 + $0xf1] sm:$0x1] %vm341_vm1, %v782_v62 }
  0xb1   : > { %805 = vst.msk [vmem:[#allocation3 + $0x109] sm:$0x1] %vm341_vm1, %v783_v63  ;;  %v784_v1 = vld [vmem:[#allocation3 + $0x125] sm:$0x1]  ;;  %v785_v2 = vld [vmem:[#allocation3 + $0x13d] sm:$0x1] }
  0xb2   : > { %v786_v3 = vld [vmem:[#allocation3 + $0x155] sm:$0x1]  ;;  %806 = vst.msk [vmem:[#allocation3 + $0x121] sm:$0x1] %vm341_vm1, %v784_v1  ;;  %807 = vst.msk [vmem:[#allocation3 + $0x139] sm:$0x1] %vm341_vm1, %v785_v2 }
  0xb3   : > { %808 = vst.msk [vmem:[#allocation3 + $0x151] sm:$0x1] %vm341_vm1, %v786_v3  ;;  %v787_v4 = vld [vmem:[#allocation3 + $0x16d] sm:$0x1]  ;;  %v788_v5 = vld [vmem:[#allocation3 + $0x185] sm:$0x1] }
  0xb4   : > { %v789_v6 = vld [vmem:[#allocation3 + $0x19d] sm:$0x1]  ;;  %809 = vst.msk [vmem:[#allocation3 + $0x169] sm:$0x1] %vm341_vm1, %v787_v4  ;;  %810 = vst.msk [vmem:[#allocation3 + $0x181] sm:$0x1] %vm341_vm1, %v788_v5 }
  0xb5   : > { %811 = vst.msk [vmem:[#allocation3 + $0x199] sm:$0x1] %vm341_vm1, %v789_v6  ;;  %v790_v7 = vld [vmem:[#allocation3 + $0x1b5] sm:$0x1]  ;;  %v791_v8 = vld [vmem:[#allocation3 + $0x1cd] sm:$0x1] }
  0xb6   : > { %v792_v9 = vld [vmem:[#allocation3 + $0x1e5] sm:$0x1]  ;;  %812 = vst.msk [vmem:[#allocation3 + $0x1b1] sm:$0x1] %vm341_vm1, %v790_v7  ;;  %813 = vst.msk [vmem:[#allocation3 + $0x1c9] sm:$0x1] %vm341_vm1, %v791_v8 }
  0xb7   : > { %814 = vst.msk [vmem:[#allocation3 + $0x1e1] sm:$0x1] %vm341_vm1, %v792_v9  ;;  %v793_v10 = vld [vmem:[#allocation3 + $0x1fd] sm:$0x1]  ;;  %v816_v11 = vld [vmem:[#allocation3 + $0x10] sm:$0x1] }
  0xb8   : > { %v817_v12 = vld [vmem:[#allocation3 + $0x28] sm:$0x1]  ;;  %815 = vst.msk [vmem:[#allocation3 + $0x1f9] sm:$0x1] %vm341_vm1, %v793_v10  ;;  %838 = vst.msk [vmem:[#allocation3 + $0x14] sm:$0x1] %vm341_vm1, %v816_v11 }
  0xb9   : > { %839 = vst.msk [vmem:[#allocation3 + $0x2c] sm:$0x1] %vm341_vm1, %v817_v12  ;;  %v818_v13 = vld [vmem:[#allocation3 + $0x40] sm:$0x1]  ;;  %v819_v14 = vld [vmem:[#allocation3 + $0x58] sm:$0x1] }
  0xba   : > { %v820_v15 = vld [vmem:[#allocation3 + $0x70] sm:$0x1]  ;;  %840 = vst.msk [vmem:[#allocation3 + $0x44] sm:$0x1] %vm341_vm1, %v818_v13  ;;  %841 = vst.msk [vmem:[#allocation3 + $0x5c] sm:$0x1] %vm341_vm1, %v819_v14 }
  0xbb   : > { %842 = vst.msk [vmem:[#allocation3 + $0x74] sm:$0x1] %vm341_vm1, %v820_v15  ;;  %v821_v16 = vld [vmem:[#allocation3 + $0x88] sm:$0x1]  ;;  %v822_v17 = vld [vmem:[#allocation3 + $0xa0] sm:$0x1] }
  0xbc   : > { %v823_v18 = vld [vmem:[#allocation3 + $0xb8] sm:$0x1]  ;;  %843 = vst.msk [vmem:[#allocation3 + $0x8c] sm:$0x1] %vm341_vm1, %v821_v16  ;;  %844 = vst.msk [vmem:[#allocation3 + $0xa4] sm:$0x1] %vm341_vm1, %v822_v17 }
  0xbd   : > { %845 = vst.msk [vmem:[#allocation3 + $0xbc] sm:$0x1] %vm341_vm1, %v823_v18  ;;  %v824_v19 = vld [vmem:[#allocation3 + $0xd0] sm:$0x1]  ;;  %v825_v20 = vld [vmem:[#allocation3 + $0xe8] sm:$0x1] }
  0xbe   : > { %v826_v21 = vld [vmem:[#allocation3 + $0x100] sm:$0x1]  ;;  %846 = vst.msk [vmem:[#allocation3 + $0xd4] sm:$0x1] %vm341_vm1, %v824_v19  ;;  %847 = vst.msk [vmem:[#allocation3 + $0xec] sm:$0x1] %vm341_vm1, %v825_v20 }
  0xbf   : > { %848 = vst.msk [vmem:[#allocation3 + $0x104] sm:$0x1] %vm341_vm1, %v826_v21  ;;  %v827_v22 = vld [vmem:[#allocation3 + $0x118] sm:$0x1]  ;;  %v828_v23 = vld [vmem:[#allocation3 + $0x130] sm:$0x1] }
  0xc0   : > { %v829_v24 = vld [vmem:[#allocation3 + $0x148] sm:$0x1]  ;;  %849 = vst.msk [vmem:[#allocation3 + $0x11c] sm:$0x1] %vm341_vm1, %v827_v22  ;;  %850 = vst.msk [vmem:[#allocation3 + $0x134] sm:$0x1] %vm341_vm1, %v828_v23 }
  0xc1   : > { %851 = vst.msk [vmem:[#allocation3 + $0x14c] sm:$0x1] %vm341_vm1, %v829_v24  ;;  %v830_v25 = vld [vmem:[#allocation3 + $0x160] sm:$0x1]  ;;  %v831_v26 = vld [vmem:[#allocation3 + $0x178] sm:$0x1] }
  0xc2   : > { %v832_v27 = vld [vmem:[#allocation3 + $0x190] sm:$0x1]  ;;  %852 = vst.msk [vmem:[#allocation3 + $0x164] sm:$0x1] %vm341_vm1, %v830_v25  ;;  %853 = vst.msk [vmem:[#allocation3 + $0x17c] sm:$0x1] %vm341_vm1, %v831_v26 }
  0xc3   : > { %854 = vst.msk [vmem:[#allocation3 + $0x194] sm:$0x1] %vm341_vm1, %v832_v27  ;;  %v833_v28 = vld [vmem:[#allocation3 + $0x1a8] sm:$0x1]  ;;  %v834_v29 = vld [vmem:[#allocation3 + $0x1c0] sm:$0x1] }
  0xc4   : > { %v835_v30 = vld [vmem:[#allocation3 + $0x1d8] sm:$0x1]  ;;  %855 = vst.msk [vmem:[#allocation3 + $0x1ac] sm:$0x1] %vm341_vm1, %v833_v28  ;;  %856 = vst.msk [vmem:[#allocation3 + $0x1c4] sm:$0x1] %vm341_vm1, %v834_v29 }
  0xc5   : > { %857 = vst.msk [vmem:[#allocation3 + $0x1dc] sm:$0x1] %vm341_vm1, %v835_v30  ;;  %v836_v31 = vld [vmem:[#allocation3 + $0x1f0] sm:$0x1]  ;;  %v837_v32 = vld [vmem:[#allocation3 + $0x208] sm:$0x1] }
  0xc6   : > { %v860_v33 = vld [vmem:[#allocation3 + $0x4] sm:$0x1]  ;;  %858 = vst.msk [vmem:[#allocation3 + $0x1f4] sm:$0x1] %vm341_vm1, %v836_v31  ;;  %859 = vst.msk [vmem:[#allocation3 + $0x20c] sm:$0x1] %vm341_vm1, %v837_v32 }
  0xc7   : > { %882 = vst.msk [vmem:[#allocation3 + $0x2] sm:$0x1] %vm341_vm1, %v860_v33  ;;  %v861_v34 = vld [vmem:[#allocation3 + $0x1c] sm:$0x1]  ;;  %v862_v35 = vld [vmem:[#allocation3 + $0x34] sm:$0x1] }
  0xc8   : > { %v863_v36 = vld [vmem:[#allocation3 + $0x4c] sm:$0x1]  ;;  %883 = vst.msk [vmem:[#allocation3 + $0x1a] sm:$0x1] %vm341_vm1, %v861_v34  ;;  %884 = vst.msk [vmem:[#allocation3 + $0x32] sm:$0x1] %vm341_vm1, %v862_v35 }
  0xc9   : > { %885 = vst.msk [vmem:[#allocation3 + $0x4a] sm:$0x1] %vm341_vm1, %v863_v36  ;;  %v864_v37 = vld [vmem:[#allocation3 + $0x64] sm:$0x1]  ;;  %v865_v38 = vld [vmem:[#allocation3 + $0x7c] sm:$0x1] }
  0xca   : > { %v866_v39 = vld [vmem:[#allocation3 + $0x94] sm:$0x1]  ;;  %886 = vst.msk [vmem:[#allocation3 + $0x62] sm:$0x1] %vm341_vm1, %v864_v37  ;;  %887 = vst.msk [vmem:[#allocation3 + $0x7a] sm:$0x1] %vm341_vm1, %v865_v38 }
  0xcb   : > { %888 = vst.msk [vmem:[#allocation3 + $0x92] sm:$0x1] %vm341_vm1, %v866_v39  ;;  %v867_v40 = vld [vmem:[#allocation3 + $0xac] sm:$0x1]  ;;  %v868_v41 = vld [vmem:[#allocation3 + $0xc4] sm:$0x1] }
  0xcc   : > { %v869_v42 = vld [vmem:[#allocation3 + $0xdc] sm:$0x1]  ;;  %889 = vst.msk [vmem:[#allocation3 + $0xaa] sm:$0x1] %vm341_vm1, %v867_v40  ;;  %890 = vst.msk [vmem:[#allocation3 + $0xc2] sm:$0x1] %vm341_vm1, %v868_v41 }
  0xcd   : > { %891 = vst.msk [vmem:[#allocation3 + $0xda] sm:$0x1] %vm341_vm1, %v869_v42  ;;  %v870_v43 = vld [vmem:[#allocation3 + $0xf4] sm:$0x1]  ;;  %v871_v44 = vld [vmem:[#allocation3 + $0x10c] sm:$0x1] }
  0xce   : > { %v872_v45 = vld [vmem:[#allocation3 + $0x124] sm:$0x1]  ;;  %892 = vst.msk [vmem:[#allocation3 + $0xf2] sm:$0x1] %vm341_vm1, %v870_v43  ;;  %893 = vst.msk [vmem:[#allocation3 + $0x10a] sm:$0x1] %vm341_vm1, %v871_v44 }
  0xcf   : > { %894 = vst.msk [vmem:[#allocation3 + $0x122] sm:$0x1] %vm341_vm1, %v872_v45  ;;  %v873_v46 = vld [vmem:[#allocation3 + $0x13c] sm:$0x1]  ;;  %v874_v47 = vld [vmem:[#allocation3 + $0x154] sm:$0x1] }
  0xd0   : > { %v875_v48 = vld [vmem:[#allocation3 + $0x16c] sm:$0x1]  ;;  %895 = vst.msk [vmem:[#allocation3 + $0x13a] sm:$0x1] %vm341_vm1, %v873_v46  ;;  %896 = vst.msk [vmem:[#allocation3 + $0x152] sm:$0x1] %vm341_vm1, %v874_v47 }
  0xd1   : > { %897 = vst.msk [vmem:[#allocation3 + $0x16a] sm:$0x1] %vm341_vm1, %v875_v48  ;;  %v876_v49 = vld [vmem:[#allocation3 + $0x184] sm:$0x1]  ;;  %v877_v50 = vld [vmem:[#allocation3 + $0x19c] sm:$0x1] }
  0xd2   : > { %v878_v51 = vld [vmem:[#allocation3 + $0x1b4] sm:$0x1]  ;;  %898 = vst.msk [vmem:[#allocation3 + $0x182] sm:$0x1] %vm341_vm1, %v876_v49  ;;  %899 = vst.msk [vmem:[#allocation3 + $0x19a] sm:$0x1] %vm341_vm1, %v877_v50 }
  0xd3   : > { %900 = vst.msk [vmem:[#allocation3 + $0x1b2] sm:$0x1] %vm341_vm1, %v878_v51  ;;  %v879_v52 = vld [vmem:[#allocation3 + $0x1cc] sm:$0x1]  ;;  %v880_v53 = vld [vmem:[#allocation3 + $0x1e4] sm:$0x1] }
  0xd4   : > { %v881_v54 = vld [vmem:[#allocation3 + $0x1fc] sm:$0x1]  ;;  %901 = vst.msk [vmem:[#allocation3 + $0x1ca] sm:$0x1] %vm341_vm1, %v879_v52  ;;  %902 = vst.msk [vmem:[#allocation3 + $0x1e2] sm:$0x1] %vm341_vm1, %v880_v53 }
  0xd5   : > { %903 = vst.msk [vmem:[#allocation3 + $0x1fa] sm:$0x1] %vm341_vm1, %v881_v54  ;;  %v904_v55 = vld [vmem:[#allocation3 + $0xf] sm:$0x1]  ;;  %v905_v56 = vld [vmem:[#allocation3 + $0x27] sm:$0x1] }
  0xd6   : > { %v906_v57 = vld [vmem:[#allocation3 + $0x3f] sm:$0x1]  ;;  %926 = vst.msk [vmem:[#allocation3 + $0x15] sm:$0x1] %vm341_vm1, %v904_v55  ;;  %927 = vst.msk [vmem:[#allocation3 + $0x2d] sm:$0x1] %vm341_vm1, %v905_v56 }
  0xd7   : > { %928 = vst.msk [vmem:[#allocation3 + $0x45] sm:$0x1] %vm341_vm1, %v906_v57  ;;  %v907_v58 = vld [vmem:[#allocation3 + $0x57] sm:$0x1]  ;;  %v908_v59 = vld [vmem:[#allocation3 + $0x6f] sm:$0x1] }
  0xd8   : > { %v909_v60 = vld [vmem:[#allocation3 + $0x87] sm:$0x1]  ;;  %929 = vst.msk [vmem:[#allocation3 + $0x5d] sm:$0x1] %vm341_vm1, %v907_v58  ;;  %930 = vst.msk [vmem:[#allocation3 + $0x75] sm:$0x1] %vm341_vm1, %v908_v59 }
  0xd9   : > { %931 = vst.msk [vmem:[#allocation3 + $0x8d] sm:$0x1] %vm341_vm1, %v909_v60  ;;  %v910_v61 = vld [vmem:[#allocation3 + $0x9f] sm:$0x1]  ;;  %v911_v62 = vld [vmem:[#allocation3 + $0xb7] sm:$0x1] }
  0xda   : > { %v912_v63 = vld [vmem:[#allocation3 + $0xcf] sm:$0x1]  ;;  %932 = vst.msk [vmem:[#allocation3 + $0xa5] sm:$0x1] %vm341_vm1, %v910_v61  ;;  %933 = vst.msk [vmem:[#allocation3 + $0xbd] sm:$0x1] %vm341_vm1, %v911_v62 }
  0xdb   : > { %934 = vst.msk [vmem:[#allocation3 + $0xd5] sm:$0x1] %vm341_vm1, %v912_v63  ;;  %v913_v1 = vld [vmem:[#allocation3 + $0xe7] sm:$0x1]  ;;  %v914_v2 = vld [vmem:[#allocation3 + $0xff] sm:$0x1] }
  0xdc   : > { %v915_v3 = vld [vmem:[#allocation3 + $0x117] sm:$0x1]  ;;  %935 = vst.msk [vmem:[#allocation3 + $0xed] sm:$0x1] %vm341_vm1, %v913_v1  ;;  %936 = vst.msk [vmem:[#allocation3 + $0x105] sm:$0x1] %vm341_vm1, %v914_v2 }
  0xdd   : > { %937 = vst.msk [vmem:[#allocation3 + $0x11d] sm:$0x1] %vm341_vm1, %v915_v3  ;;  %v916_v4 = vld [vmem:[#allocation3 + $0x12f] sm:$0x1]  ;;  %v917_v5 = vld [vmem:[#allocation3 + $0x147] sm:$0x1] }
  0xde   : > { %v918_v6 = vld [vmem:[#allocation3 + $0x15f] sm:$0x1]  ;;  %938 = vst.msk [vmem:[#allocation3 + $0x135] sm:$0x1] %vm341_vm1, %v916_v4  ;;  %939 = vst.msk [vmem:[#allocation3 + $0x14d] sm:$0x1] %vm341_vm1, %v917_v5 }
  0xdf   : > { %940 = vst.msk [vmem:[#allocation3 + $0x165] sm:$0x1] %vm341_vm1, %v918_v6  ;;  %v919_v7 = vld [vmem:[#allocation3 + $0x177] sm:$0x1]  ;;  %v920_v8 = vld [vmem:[#allocation3 + $0x18f] sm:$0x1] }
  0xe0   : > { %v921_v9 = vld [vmem:[#allocation3 + $0x1a7] sm:$0x1]  ;;  %941 = vst.msk [vmem:[#allocation3 + $0x17d] sm:$0x1] %vm341_vm1, %v919_v7  ;;  %942 = vst.msk [vmem:[#allocation3 + $0x195] sm:$0x1] %vm341_vm1, %v920_v8 }
  0xe1   : > { %943 = vst.msk [vmem:[#allocation3 + $0x1ad] sm:$0x1] %vm341_vm1, %v921_v9  ;;  %v922_v10 = vld [vmem:[#allocation3 + $0x1bf] sm:$0x1]  ;;  %v923_v11 = vld [vmem:[#allocation3 + $0x1d7] sm:$0x1] }
  0xe2   : > { %v924_v12 = vld [vmem:[#allocation3 + $0x1ef] sm:$0x1]  ;;  %944 = vst.msk [vmem:[#allocation3 + $0x1c5] sm:$0x1] %vm341_vm1, %v922_v10  ;;  %945 = vst.msk [vmem:[#allocation3 + $0x1dd] sm:$0x1] %vm341_vm1, %v923_v11 }
  0xe3   : > { %946 = vst.msk [vmem:[#allocation3 + $0x1f5] sm:$0x1] %vm341_vm1, %v924_v12  ;;  %v925_v13 = vld [vmem:[#allocation3 + $0x207] sm:$0x1] }
  0xe4   : > { %947 = vst.msk [vmem:[#allocation3 + $0x20d] sm:$0x1] %vm341_vm1, %v925_v13 }
  0xe5 LB: >> { %s955_s30 = smul.u32 24, %s3294_s29  ;;  %v3023_v14 = vld [vmem:[%s4664_s2] ss:$0 sm:$0xff]  ;;  %v3026_v15 = vld [vmem:[%s4664_s2 + $0x1] ss:$0 sm:$0xff]  ;;  %vm995_vm2 = vcmask 1046528   ;;  %s3294_s29 = sphi %s3768_s29, %s954_s29  }
  0xe6   : >> { %v3024_v16 = vld [vmem:[%s4664_s2 + $0x38] ss:$0 sm:$0xff]  ;;  %v3027_v17 = vld [vmem:[%s4664_s2 + $0x39] ss:$0 sm:$0xff]  ;;  %vm1036_vm3 = vcmask 1045504   ;;  %vm1077_vm4 = vcmask 1044480  }
  0xe7   : >> { %s3786_s13 = scalar_lea.vmem [#allocation2], %s955_s30  ;;  %s3797_s14 = scalar_lea.vmem [#allocation3], %s955_s30  ;;  %v3029_v32 = vld [vmem:[%s4664_s2 + $0x2] ss:$0 sm:$0xff]  ;;  %v3030_v44 = vld [vmem:[%s4664_s2 + $0x3a] ss:$0 sm:$0xff] }
  0xe8   : >> { %v3789_v18 = vld [vmem:[%s3786_s13] sm:$0xff]  ;;  %v3792_v19 = vld [vmem:[%s3786_s13 + $0x8] sm:$0xff]  ;;  %v3795_v20 = vld [vmem:[%s3786_s13 + $0x10] sm:$0x3f]  ;;  %vm1118_vm5 = vcmask 1043456   ;;  %vm1159_vm6 = vcmask 1042432  }
  0xe9   : >> { %v971_v24 = vmul.f32 %v3023_v14, %v3789_v18  ;;  %v972_v25 = vmul.f32 %v3023_v14, %v3792_v19  ;;  %v989_v26 = vmul.f32 %v3026_v15, %v3789_v18  ;;  %v990_v27 = vmul.f32 %v3026_v15, %v3792_v19  ;;  %v3032_v50 = vld [vmem:[%s4664_s2 + $0x3] ss:$0 sm:$0xff]  ;;  %v3033_v62 = vld [vmem:[%s4664_s2 + $0x3b] ss:$0 sm:$0xff]  ;;  %v3035_v13 = vld [vmem:[%s4664_s2 + $0x4] ss:$0 sm:$0xff] }
  0xea   : >> { %v991_v30 = vmul.f32 %v3026_v15, %v3795_v20  ;;  %v1030_v45 = vmul.f32 %v3029_v32, %v3789_v18  ;;  %v1031_v48 = vmul.f32 %v3029_v32, %v3792_v19  ;;  %v1032_v49 = vmul.f32 %v3029_v32, %v3795_v20 }
  0xeb   : >> { %v3800_v21 = vld [vmem:[%s3797_s14] sm:$0xff]  ;;  %v3803_v22 = vld [vmem:[%s3797_s14 + $0x8] sm:$0xff]  ;;  %v3806_v23 = vld [vmem:[%s3797_s14 + $0x10] sm:$0x3f]  ;;  %v996_v33 = vrot.slane %v989_v26, 1  ;;  %v997_v34 = vrot.slane %v990_v27, 1  ;;  %v1071_v63 = vmul.f32 %v3032_v50, %v3789_v18  ;;  %v1072_v4 = vmul.f32 %v3032_v50, %v3792_v19 }
  0xec   : >> { %v979_v28 = vmul.f32 %v3024_v16, %v3800_v21  ;;  %v980_v29 = vmul.f32 %v3024_v16, %v3803_v22  ;;  %v1009_v31 = vmul.f32 %v3027_v17, %v3800_v21  ;;  %v1010_v35 = vmul.f32 %v3027_v17, %v3803_v22 }
  0xed   : >> { %v1011_v36 = vmul.f32 %v3027_v17, %v3806_v23  ;;  %v999_v39 = vrot.slane %v991_v30, 1  ;;  %v998_v41 = vsel %vm995_vm2, %v996_v33, %v997_v34  ;;  %v1037_v54 = vrot.slane %v1030_v45, 2 }
  0xee   : >> { %v981_v37 = vadd.f32 %v979_v28, %v971_v24  ;;  %v982_v38 = vadd.f32 %v980_v29, %v972_v25  ;;  %v1015_v40 = vrot.slane %v1009_v31, 1  ;;  %v1016_v42 = vrot.slane %v1010_v35, 1  ;;  %v3036_v31 = vld [vmem:[%s4664_s2 + $0x3c] ss:$0 sm:$0xff] }
  0xef   : >> { %v1018_v43 = vrot.slane %v1011_v36, 1  ;;  %v1000_v46 = vsel %vm995_vm2, %v997_v34, %v999_v39  ;;  %v1038_v56 = vrot.slane %v1031_v48, 2  ;;  %v1040_v57 = vrot.slane %v1032_v49, 2  ;;  %v3039_v49 = vld [vmem:[%s4664_s2 + $0x3d] ss:$0 sm:$0xff] }
  0xf0   : >> { %v1003_v47 = vadd.f32 %v998_v41, %v981_v37  ;;  %v1004_v51 = vadd.f32 %v1000_v46, %v982_v38  ;;  %v1017_v52 = vsel %vm995_vm2, %v1015_v40, %v1016_v42  ;;  %v1050_v58 = vmul.f32 %v3030_v44, %v3800_v21  ;;  %v3038_v37 = vld [vmem:[%s4664_s2 + $0x5] ss:$0 sm:$0xff] }
  0xf1   : >> { %v1019_v53 = vsel %vm995_vm2, %v1016_v42, %v1018_v43  ;;  %v1051_v60 = vmul.f32 %v3030_v44, %v3803_v22  ;;  %v1052_v61 = vmul.f32 %v3030_v44, %v3806_v23  ;;  %v1039_v1 = vsel %vm1036_vm3, %v1037_v54, %v1038_v56 }
  0xf2   : >> { %v1022_v55 = vadd.f32 %v1017_v52, %v1003_v47  ;;  %v1023_v59 = vadd.f32 %v1019_v53, %v1004_v51  ;;  %v1041_v2 = vsel %vm1036_vm3, %v1038_v56, %v1040_v57  ;;  %v1056_v3 = vrot.slane %v1050_v58, 2 }
  0xf3   : >> { %v1057_v7 = vrot.slane %v1051_v60, 2  ;;  %v1059_v8 = vrot.slane %v1052_v61, 2  ;;  %v1073_v9 = vmul.f32 %v3032_v50, %v3795_v20  ;;  %v1078_v10 = vrot.slane %v1071_v63, 3  ;;  %v3041_v63 = vld [vmem:[%s4664_s2 + $0x6] ss:$0 sm:$0xff] }
  0xf4   : >> { %v1044_v5 = vadd.f32 %v1039_v1, %v1022_v55  ;;  %v1045_v6 = vadd.f32 %v1041_v2, %v1023_v59  ;;  %v1079_v11 = vrot.slane %v1072_v4, 3  ;;  %v1091_v12 = vmul.f32 %v3033_v62, %v3800_v21 }
  0xf5   : >> { %v1058_v14 = vsel %vm1036_vm3, %v1056_v3, %v1057_v7  ;;  %v1060_v15 = vsel %vm1036_vm3, %v1057_v7, %v1059_v8  ;;  %v1092_v16 = vmul.f32 %v3033_v62, %v3803_v22  ;;  %v1093_v17 = vmul.f32 %v3033_v62, %v3806_v23 }
  0xf6   : >> { %v1063_v24 = vadd.f32 %v1058_v14, %v1044_v5  ;;  %v1064_v25 = vadd.f32 %v1060_v15, %v1045_v6  ;;  %v1080_v26 = vsel %vm1077_vm4, %v1078_v10, %v1079_v11  ;;  %v1081_v27 = vrot.slane %v1073_v9, 3 }
  0xf7   : >> { %v1097_v28 = vrot.slane %v1091_v12, 3  ;;  %v1098_v29 = vrot.slane %v1092_v16, 3  ;;  %v1100_v30 = vrot.slane %v1093_v17, 3  ;;  %v1112_v32 = vmul.f32 %v3035_v13, %v3789_v18  ;;  %v3042_v12 = vld [vmem:[%s4664_s2 + $0x3e] ss:$0 sm:$0xff] }
  0xf8   : >> { %v1082_v33 = vsel %vm1077_vm4, %v1079_v11, %v1081_v27  ;;  %v1085_v34 = vadd.f32 %v1080_v26, %v1063_v24  ;;  %v1113_v35 = vmul.f32 %v3035_v13, %v3792_v19  ;;  %v1114_v36 = vmul.f32 %v3035_v13, %v3795_v20  ;;  %v3894_v24 = vld [vmem:[%s3786_s13 + $0x18] sm:$0xff] }
  0xf9   : >> { %v1086_v38 = vadd.f32 %v1082_v33, %v1064_v25  ;;  %v1099_v39 = vsel %vm1077_vm4, %v1097_v28, %v1098_v29  ;;  %v1101_v40 = vsel %vm1077_vm4, %v1098_v29, %v1100_v30  ;;  %v1119_v41 = vrot.slane %v1112_v32, 4  ;;  %v3051_v25 = vld [vmem:[%s4664_s2 + $0x8] ss:$0 sm:$0xff]  ;;  %v3902_v29 = vld [vmem:[%s3786_s13 + $0x20] sm:$0xff]  ;;  %v3906_v32 = vld [vmem:[%s3797_s14 + $0x18] sm:$0xff] }
  0xfa   : >> { %v1104_v42 = vadd.f32 %v1099_v39, %v1085_v34  ;;  %v1120_v43 = vrot.slane %v1113_v35, 4  ;;  %v1122_v44 = vrot.slane %v1114_v36, 4  ;;  %v1132_v45 = vmul.f32 %v3036_v31, %v3800_v21  ;;  %v3911_v36 = vld [vmem:[%s3797_s14 + $0x20] sm:$0xff] }
  0xfb   : >> { %v1105_v46 = vadd.f32 %v1101_v40, %v1086_v38  ;;  %v1133_v47 = vmul.f32 %v3036_v31, %v3803_v22  ;;  %v1134_v48 = vmul.f32 %v3036_v31, %v3806_v23  ;;  %v1153_v50 = vmul.f32 %v3038_v37, %v3789_v18 }
  0xfc   : >> { %vm1200_vm7 = vcmask 1041408   ;;  %v1121_v51 = vsel %vm1118_vm5, %v1119_v41, %v1120_v43  ;;  %v1123_v52 = vsel %vm1118_vm5, %v1120_v43, %v1122_v44  ;;  %v1138_v53 = vrot.slane %v1132_v45, 4  ;;  %v3923_v41 = vld [vmem:[%s3786_s13 + $0x28] sm:$0x3f] }
  0xfd   : >> { %v1154_v54 = vmul.f32 %v3038_v37, %v3792_v19  ;;  %v1126_v55 = vadd.f32 %v1121_v51, %v1104_v42  ;;  %v1127_v56 = vadd.f32 %v1123_v52, %v1105_v46  ;;  %v1139_v57 = vrot.slane %v1133_v47, 4  ;;  %v3056_v42 = vld [vmem:[%s4664_s2 + $0x41] ss:$0 sm:$0xff]  ;;  %v3930_v47 = vld [vmem:[%s3797_s14 + $0x28] sm:$0x3f] }
  0xfe   : >> { %v1141_v58 = vrot.slane %v1134_v48, 4  ;;  %v1155_v59 = vmul.f32 %v3038_v37, %v3795_v20  ;;  %v1160_v60 = vrot.slane %v1153_v50, 5  ;;  %v1173_v62 = vmul.f32 %v3039_v49, %v3800_v21  ;;  %v3052_v37 = vld [vmem:[%s4664_s2 + $0x40] ss:$0 sm:$0xff] }
  0xff   : >> { %v1161_v61 = vrot.slane %v1154_v54, 5  ;;  %v1140_v1 = vsel %vm1118_vm5, %v1138_v53, %v1139_v57  ;;  %v1174_v3 = vmul.f32 %v3039_v49, %v3803_v22  ;;  %v1175_v4 = vmul.f32 %v3039_v49, %v3806_v23 }
 0x100   : >> { %v1142_v2 = vsel %vm1118_vm5, %v1139_v57, %v1141_v58  ;;  %v1145_v5 = vadd.f32 %v1140_v1, %v1126_v55  ;;  %v1163_v8 = vrot.slane %v1155_v59, 5  ;;  %v1179_v9 = vrot.slane %v1173_v62, 5 }
 0x101   : >> { %v1146_v6 = vadd.f32 %v1142_v2, %v1127_v56  ;;  %v1162_v7 = vsel %vm1159_vm6, %v1160_v60, %v1161_v61  ;;  %v1180_v10 = vrot.slane %v1174_v3, 5  ;;  %v1182_v11 = vrot.slane %v1175_v4, 5  ;;  %v3059_v56 = vld [vmem:[%s4664_s2 + $0xa] ss:$0 sm:$0xff] }
 0x102   : >> { %v1194_v13 = vmul.f32 %v3041_v63, %v3789_v18  ;;  %v1164_v14 = vsel %vm1159_vm6, %v1161_v61, %v1163_v8  ;;  %v1167_v15 = vadd.f32 %v1162_v7, %v1145_v5  ;;  %v1195_v16 = vmul.f32 %v3041_v63, %v3792_v19  ;;  %v3060_v5 = vld [vmem:[%s4664_s2 + $0x42] ss:$0 sm:$0xff] }
 0x103   : >> { %v1196_v17 = vmul.f32 %v3041_v63, %v3795_v20  ;;  %v1168_v26 = vadd.f32 %v1164_v14, %v1146_v6  ;;  %v1181_v27 = vsel %vm1159_vm6, %v1179_v9, %v1180_v10  ;;  %v1183_v18 = vsel %vm1159_vm6, %v1180_v10, %v1182_v11 }
 0x104   : >> { %v1201_v28 = vrot.slane %v1194_v13, 6  ;;  %v1186_v30 = vadd.f32 %v1181_v27, %v1167_v15  ;;  %v1202_v19 = vrot.slane %v1195_v16, 6  ;;  %v1214_v20 = vmul.f32 %v3042_v12, %v3800_v21  ;;  %v3055_v21 = vld [vmem:[%s4664_s2 + $0x9] ss:$0 sm:$0xff]  ;;  %v3063_v15 = vld [vmem:[%s4664_s2 + $0xb] ss:$0 sm:$0xff] }
 0x105   : >> { %v1204_v31 = vrot.slane %v1196_v17, 6  ;;  %v1187_v33 = vadd.f32 %v1183_v18, %v1168_v26  ;;  %v1215_v34 = vmul.f32 %v3042_v12, %v3803_v22  ;;  %v1216_v35 = vmul.f32 %v3042_v12, %v3806_v23 }
 0x106   : >> { %v1247_v38 = vmul.f32 %v3051_v25, %v3894_v24  ;;  %v1203_v39 = vsel %vm1200_vm7, %v1201_v28, %v1202_v19  ;;  %v1220_v22 = vrot.slane %v1214_v20, 6  ;;  %v1248_v23 = vmul.f32 %v3051_v25, %v3902_v29 }
 0x107   : >> { %v1205_v40 = vsel %vm1200_vm7, %v1202_v19, %v1204_v31  ;;  %v1208_v43 = vadd.f32 %v1203_v39, %v1186_v30  ;;  %v1221_v45 = vrot.slane %v1215_v34, 6  ;;  %v1223_v46 = vrot.slane %v1216_v35, 6 }
 0x108   : >> { %v1209_v44 = vadd.f32 %v1205_v40, %v1187_v33  ;;  %v1255_v48 = vmul.f32 %v3052_v37, %v3906_v32  ;;  %v1256_v49 = vmul.f32 %v3052_v37, %v3911_v36  ;;  %v1265_v50 = vmul.f32 %v3055_v21, %v3894_v24  ;;  %v3064_v33 = vld [vmem:[%s4664_s2 + $0x43] ss:$0 sm:$0xff] }
 0x109   : >> { %v1266_v51 = vmul.f32 %v3055_v21, %v3902_v29  ;;  %v1222_v52 = vsel %vm1200_vm7, %v1220_v22, %v1221_v45  ;;  %v1224_v53 = vsel %vm1200_vm7, %v1221_v45, %v1223_v46  ;;  %v1267_v54 = vmul.f32 %v3055_v21, %v3923_v41  ;;  %v3067_v46 = vld [vmem:[%s4664_s2 + $0xc] ss:$0 sm:$0xff] }
 0x10a   : >> { %v1284_v55 = vmul.f32 %v3056_v42, %v3906_v32  ;;  %v1227_v57 = vadd.f32 %v1222_v52, %v1208_v43  ;;  %v1228_v58 = vadd.f32 %v1224_v53, %v1209_v44  ;;  %v1271_v59 = vrot.slane %v1265_v50, 1 }
 0x10b   : >> { %v1272_v60 = vrot.slane %v1266_v51, 1  ;;  %v1274_v61 = vrot.slane %v1267_v54, 1  ;;  %v1285_v62 = vmul.f32 %v3056_v42, %v3911_v36  ;;  %v1286_v63 = vmul.f32 %v3056_v42, %v3930_v47 }
 0x10c   : >> { %v1290_v1 = vrot.slane %v1284_v55, 1  ;;  %v1249_v2 = vadd.f32 %v1247_v38, %v1227_v57  ;;  %v1250_v3 = vadd.f32 %v1248_v23, %v1228_v58  ;;  %v1305_v6 = vmul.f32 %v3059_v56, %v3894_v24 }
 0x10d   : >> { %v1273_v4 = vsel %vm995_vm2, %v1271_v59, %v1272_v60  ;;  %v1275_v7 = vsel %vm995_vm2, %v1272_v60, %v1274_v61  ;;  %v1291_v8 = vrot.slane %v1285_v62, 1  ;;  %v1293_v9 = vrot.slane %v1286_v63, 1 }
 0x10e   : >> { %v1306_v10 = vmul.f32 %v3059_v56, %v3902_v29  ;;  %v1257_v11 = vadd.f32 %v1255_v48, %v1249_v2  ;;  %v1258_v12 = vadd.f32 %v1256_v49, %v1250_v3  ;;  %v1307_v13 = vmul.f32 %v3059_v56, %v3923_v41  ;;  %v3068_v56 = vld [vmem:[%s4664_s2 + $0x44] ss:$0 sm:$0xff] }
 0x10f   : >> { %v1311_v14 = vrot.slane %v1305_v6, 2  ;;  %v1292_v16 = vsel %vm995_vm2, %v1290_v1, %v1291_v8  ;;  %v1294_v17 = vsel %vm995_vm2, %v1291_v8, %v1293_v9  ;;  %v1324_v26 = vmul.f32 %v3060_v5, %v3906_v32  ;;  %v3071_v6 = vld [vmem:[%s4664_s2 + $0xd] ss:$0 sm:$0xff] }
 0x110   : >> { %v1312_v25 = vrot.slane %v1306_v10, 2  ;;  %v1278_v27 = vadd.f32 %v1273_v4, %v1257_v11  ;;  %v1279_v18 = vadd.f32 %v1275_v7, %v1258_v12  ;;  %v1314_v28 = vrot.slane %v1307_v13, 2 }
 0x111   : >> { %v1325_v30 = vmul.f32 %v3060_v5, %v3911_v36  ;;  %v1326_v31 = vmul.f32 %v3060_v5, %v3930_v47  ;;  %v1330_v20 = vrot.slane %v1324_v26, 2  ;;  %v1345_v34 = vmul.f32 %v3063_v15, %v3894_v24 }
 0x112   : >> { %v1313_v19 = vsel %vm1036_vm3, %v1311_v14, %v1312_v25  ;;  %v1297_v35 = vadd.f32 %v1292_v16, %v1278_v27  ;;  %v1298_v37 = vadd.f32 %v1294_v17, %v1279_v18  ;;  %v1315_v38 = vsel %vm1036_vm3, %v1312_v25, %v1314_v28  ;;  %v3072_v17 = vld [vmem:[%s4664_s2 + $0x45] ss:$0 sm:$0xff] }
 0x113   : >> { %v1331_v21 = vrot.slane %v1325_v30, 2  ;;  %v1333_v39 = vrot.slane %v1326_v31, 2  ;;  %v1346_v40 = vmul.f32 %v3063_v15, %v3902_v29  ;;  %v1347_v22 = vmul.f32 %v3063_v15, %v3923_v41 }
 0x114   : >> { %v1351_v23 = vrot.slane %v1345_v34, 3  ;;  %v1318_v42 = vadd.f32 %v1313_v19, %v1297_v35  ;;  %v1319_v43 = vadd.f32 %v1315_v38, %v1298_v37  ;;  %v1364_v45 = vmul.f32 %v3064_v33, %v3906_v32  ;;  %v3075_v34 = vld [vmem:[%s4664_s2 + $0xe] ss:$0 sm:$0xff] }
 0x115   : >> { %v1332_v44 = vsel %vm1036_vm3, %v1330_v20, %v1331_v21  ;;  %v1334_v48 = vsel %vm1036_vm3, %v1331_v21, %v1333_v39  ;;  %v1352_v49 = vrot.slane %v1346_v40, 3  ;;  %v1354_v50 = vrot.slane %v1347_v22, 3 }
 0x116   : >> { %v1365_v51 = vmul.f32 %v3064_v33, %v3911_v36  ;;  %v1337_v52 = vadd.f32 %v1332_v44, %v1318_v42  ;;  %v1338_v53 = vadd.f32 %v1334_v48, %v1319_v43  ;;  %v1366_v54 = vmul.f32 %v3064_v33, %v3930_v47  ;;  %v3076_v42 = vld [vmem:[%s4664_s2 + $0x46] ss:$0 sm:$0xff] }
 0x117   : >> { %v1370_v55 = vrot.slane %v1364_v45, 3  ;;  %v1353_v57 = vsel %vm1077_vm4, %v1351_v23, %v1352_v49  ;;  %v1355_v58 = vsel %vm1077_vm4, %v1352_v49, %v1354_v50  ;;  %v1385_v60 = vmul.f32 %v3067_v46, %v3894_v24 }
 0x118   : >> { %v1371_v59 = vrot.slane %v1365_v51, 3  ;;  %v1358_v61 = vadd.f32 %v1353_v57, %v1337_v52  ;;  %v1359_v62 = vadd.f32 %v1355_v58, %v1338_v53  ;;  %v1373_v63 = vrot.slane %v1366_v54, 3 }
 0x119   : >> { %v1386_v1 = vmul.f32 %v3067_v46, %v3902_v29  ;;  %v1387_v3 = vmul.f32 %v3067_v46, %v3923_v41  ;;  %v1391_v4 = vrot.slane %v1385_v60, 4  ;;  %v1404_v5 = vmul.f32 %v3068_v56, %v3906_v32 }
 0x11a   : >> { %v1372_v2 = vsel %vm1077_vm4, %v1370_v55, %v1371_v59  ;;  %v1374_v7 = vsel %vm1077_vm4, %v1371_v59, %v1373_v63  ;;  %v1405_v10 = vmul.f32 %v3068_v56, %v3911_v36  ;;  %v1406_v13 = vmul.f32 %v3068_v56, %v3930_v47  ;;  %v4020_v56 = vld [vmem:[%s3786_s13 + $0x30] sm:$0xff]  ;;  %v4029_v59 = vld [vmem:[%s3786_s13 + $0x38] sm:$0xff] }
 0x11b   : >> { %v1377_v8 = vadd.f32 %v1372_v2, %v1358_v61  ;;  %v1392_v9 = vrot.slane %v1386_v1, 4  ;;  %v1378_v11 = vadd.f32 %v1374_v7, %v1359_v62  ;;  %v1394_v12 = vrot.slane %v1387_v3, 4  ;;  %v4038_v1 = vld [vmem:[%s3797_s14 + $0x38] sm:$0xff] }
 0x11c   : >> { %v1410_v14 = vrot.slane %v1404_v5, 4  ;;  %v1411_v16 = vrot.slane %v1405_v10, 4  ;;  %v1425_v25 = vmul.f32 %v3071_v6, %v3894_v24  ;;  %v1426_v26 = vmul.f32 %v3071_v6, %v3902_v29 }
 0x11d   : >> { %v1393_v15 = vsel %vm1118_vm5, %v1391_v4, %v1392_v9  ;;  %v1395_v27 = vsel %vm1118_vm5, %v1392_v9, %v1394_v12  ;;  %v1413_v28 = vrot.slane %v1406_v13, 4  ;;  %v1427_v30 = vmul.f32 %v3071_v6, %v3923_v41  ;;  %v3089_v6 = vld [vmem:[%s4664_s2 + $0x11] ss:$0 sm:$0xff]  ;;  %v4050_v9 = vld [vmem:[%s3797_s14 + $0x40] sm:$0x3f] }
 0x11e   : >> { %v1398_v18 = vadd.f32 %v1393_v15, %v1377_v8  ;;  %v1399_v19 = vadd.f32 %v1395_v27, %v1378_v11  ;;  %v1412_v31 = vsel %vm1118_vm5, %v1410_v14, %v1411_v16  ;;  %v1431_v20 = vrot.slane %v1425_v25, 5  ;;  %v3090_v12 = vld [vmem:[%s4664_s2 + $0x49] ss:$0 sm:$0xff] }
 0x11f   : >> { %v1432_v33 = vrot.slane %v1426_v26, 5  ;;  %v1414_v35 = vsel %vm1118_vm5, %v1411_v16, %v1413_v28  ;;  %v1434_v38 = vrot.slane %v1427_v30, 5  ;;  %v1444_v21 = vmul.f32 %v3072_v17, %v3906_v32 }
 0x120   : >> { %v1417_v37 = vadd.f32 %v1412_v31, %v1398_v18  ;;  %v1418_v39 = vadd.f32 %v1414_v35, %v1399_v19  ;;  %v1445_v22 = vmul.f32 %v3072_v17, %v3911_v36  ;;  %v1446_v23 = vmul.f32 %v3072_v17, %v3930_v47  ;;  %v3093_v31 = vld [vmem:[%s4664_s2 + $0x12] ss:$0 sm:$0xff] }
 0x121   : >> { %v1433_v40 = vsel %vm1159_vm6, %v1431_v20, %v1432_v33  ;;  %v1435_v43 = vsel %vm1159_vm6, %v1432_v33, %v1434_v38  ;;  %v1450_v45 = vrot.slane %v1444_v21, 5  ;;  %v1465_v46 = vmul.f32 %v3075_v34, %v3894_v24  ;;  %v3085_v24 = vld [vmem:[%s4664_s2 + $0x10] ss:$0 sm:$0xff] }
 0x122   : >> { %v1438_v44 = vadd.f32 %v1433_v40, %v1417_v37  ;;  %v1439_v48 = vadd.f32 %v1435_v43, %v1418_v39  ;;  %v1451_v49 = vrot.slane %v1445_v22, 5  ;;  %v1453_v50 = vrot.slane %v1446_v23, 5  ;;  %v3094_v40 = vld [vmem:[%s4664_s2 + $0x4a] ss:$0 sm:$0xff] }
 0x123   : >> { %v1466_v51 = vmul.f32 %v3075_v34, %v3902_v29  ;;  %v1467_v52 = vmul.f32 %v3075_v34, %v3923_v41  ;;  %v1471_v53 = vrot.slane %v1465_v46, 6  ;;  %v1484_v54 = vmul.f32 %v3076_v42, %v3906_v32  ;;  %v4032_v32 = vld [vmem:[%s3797_s14 + $0x30] sm:$0xff] }
 0x124   : >> { %v1485_v55 = vmul.f32 %v3076_v42, %v3911_v36  ;;  %v1452_v57 = vsel %vm1159_vm6, %v1450_v45, %v1451_v49  ;;  %v1454_v58 = vsel %vm1159_vm6, %v1451_v49, %v1453_v50  ;;  %v1486_v41 = vmul.f32 %v3076_v42, %v3930_v47  ;;  %v3086_v36 = vld [vmem:[%s4664_s2 + $0x48] ss:$0 sm:$0xff]  ;;  %v4042_v47 = vld [vmem:[%s3786_s13 + $0x40] sm:$0x3f]  ;;  %v3097_v49 = vld [vmem:[%s4664_s2 + $0x13] ss:$0 sm:$0xff] }
 0x125   : >> { %v1472_v29 = vrot.slane %v1466_v51, 6  ;;  %v1457_v60 = vadd.f32 %v1452_v57, %v1438_v44  ;;  %v1458_v61 = vadd.f32 %v1454_v58, %v1439_v48  ;;  %v1474_v62 = vrot.slane %v1467_v52, 6 }
 0x126   : >> { %v1490_v63 = vrot.slane %v1484_v54, 6  ;;  %v1491_v3 = vrot.slane %v1485_v55, 6  ;;  %v1493_v4 = vrot.slane %v1486_v41, 6  ;;  %v1517_v5 = vmul.f32 %v3085_v24, %v4020_v56 }
 0x127   : >> { %v1473_v2 = vsel %vm1200_vm7, %v1471_v53, %v1472_v29  ;;  %v1475_v7 = vsel %vm1200_vm7, %v1472_v29, %v1474_v62  ;;  %v1518_v10 = vmul.f32 %v3085_v24, %v4029_v59  ;;  %v1525_v11 = vmul.f32 %v3086_v36, %v4032_v32 }
 0x128   : >> { %v1478_v8 = vadd.f32 %v1473_v2, %v1457_v60  ;;  %v1479_v13 = vadd.f32 %v1475_v7, %v1458_v61  ;;  %v1492_v14 = vsel %vm1200_vm7, %v1490_v63, %v1491_v3  ;;  %v1494_v15 = vsel %vm1200_vm7, %v1491_v3, %v1493_v4  ;;  %v3098_v2 = vld [vmem:[%s4664_s2 + $0x4b] ss:$0 sm:$0xff]  ;;  %v3101_v7 = vld [vmem:[%s4664_s2 + $0x14] ss:$0 sm:$0xff] }
 0x129   : >> { %v1526_v16 = vmul.f32 %v3086_v36, %v4038_v1  ;;  %v1535_v25 = vmul.f32 %v3089_v6, %v4020_v56  ;;  %v1536_v26 = vmul.f32 %v3089_v6, %v4029_v59  ;;  %v1537_v27 = vmul.f32 %v3089_v6, %v4042_v47 }
 0x12a   : >> { %v1497_v17 = vadd.f32 %v1492_v14, %v1478_v8  ;;  %v1498_v18 = vadd.f32 %v1494_v15, %v1479_v13  ;;  %v1554_v28 = vmul.f32 %v3090_v12, %v4032_v32  ;;  %v1555_v30 = vmul.f32 %v3090_v12, %v4038_v1 }
 0x12b   : >> { %v1556_v19 = vmul.f32 %v3090_v12, %v4050_v9  ;;  %v1541_v33 = vrot.slane %v1535_v25, 1  ;;  %v1542_v34 = vrot.slane %v1536_v26, 1  ;;  %v1544_v35 = vrot.slane %v1537_v27, 1  ;;  %v3102_v27 = vld [vmem:[%s4664_s2 + $0x4c] ss:$0 sm:$0xff] }
 0x12c   : >> { %v1519_v20 = vadd.f32 %v1517_v5, %v1497_v17  ;;  %v1520_v37 = vadd.f32 %v1518_v10, %v1498_v18  ;;  %v1560_v38 = vrot.slane %v1554_v28, 1  ;;  %v1561_v21 = vrot.slane %v1555_v30, 1 }
 0x12d   : >> { %v1563_v39 = vrot.slane %v1556_v19, 1  ;;  %v1543_v23 = vsel %vm995_vm2, %v1541_v33, %v1542_v34  ;;  %v1545_v42 = vsel %vm995_vm2, %v1542_v34, %v1544_v35  ;;  %v1575_v43 = vmul.f32 %v3093_v31, %v4020_v56 }
 0x12e   : >> { %v1527_v22 = vadd.f32 %v1525_v11, %v1519_v20  ;;  %v1528_v44 = vadd.f32 %v1526_v16, %v1520_v37  ;;  %v1562_v45 = vsel %vm995_vm2, %v1560_v38, %v1561_v21  ;;  %v1576_v48 = vmul.f32 %v3093_v31, %v4029_v59 }
 0x12f   : >> { %v1564_v46 = vsel %vm995_vm2, %v1561_v21, %v1563_v39  ;;  %v1577_v51 = vmul.f32 %v3093_v31, %v4042_v47  ;;  %v1581_v52 = vrot.slane %v1575_v43, 2  ;;  %v1594_v53 = vmul.f32 %v3094_v40, %v4032_v32 }
 0x130   : >> { %v1548_v50 = vadd.f32 %v1543_v23, %v1527_v22  ;;  %v1549_v54 = vadd.f32 %v1545_v42, %v1528_v44  ;;  %v1582_v55 = vrot.slane %v1576_v48, 2  ;;  %v1595_v24 = vmul.f32 %v3094_v40, %v4038_v1 }
 0x131   : >> { %v1596_v57 = vmul.f32 %v3094_v40, %v4050_v9  ;;  %v1584_v29 = vrot.slane %v1577_v51, 2  ;;  %v1600_v41 = vrot.slane %v1594_v53, 2  ;;  %v1615_v36 = vmul.f32 %v3097_v49, %v4020_v56  ;;  %v3105_v40 = vld [vmem:[%s4664_s2 + $0x15] ss:$0 sm:$0xff] }
 0x132   : >> { %v1567_v58 = vadd.f32 %v1562_v45, %v1548_v50  ;;  %v1568_v60 = vadd.f32 %v1564_v46, %v1549_v54  ;;  %v1583_v61 = vsel %vm1036_vm3, %v1581_v52, %v1582_v55  ;;  %v1601_v62 = vrot.slane %v1595_v24, 2  ;;  %v3106_v52 = vld [vmem:[%s4664_s2 + $0x4d] ss:$0 sm:$0xff] }
 0x133   : >> { %v1603_v63 = vrot.slane %v1596_v57, 2  ;;  %v1585_v3 = vsel %vm1036_vm3, %v1582_v55, %v1584_v29  ;;  %v1616_v5 = vmul.f32 %v3097_v49, %v4029_v59  ;;  %v1617_v6 = vmul.f32 %v3097_v49, %v4042_v47 }
 0x134   : >> { %v1588_v4 = vadd.f32 %v1583_v61, %v1567_v58  ;;  %v1589_v8 = vadd.f32 %v1585_v3, %v1568_v60  ;;  %v1602_v10 = vsel %vm1036_vm3, %v1600_v41, %v1601_v62  ;;  %v1621_v12 = vrot.slane %v1615_v36, 3  ;;  %v3109_v58 = vld [vmem:[%s4664_s2 + $0x16] ss:$0 sm:$0xff] }
 0x135   : >> { %v1604_v11 = vsel %vm1036_vm3, %v1601_v62, %v1603_v63  ;;  %v1622_v14 = vrot.slane %v1616_v5, 3  ;;  %v1624_v15 = vrot.slane %v1617_v6, 3  ;;  %v1634_v16 = vmul.f32 %v3098_v2, %v4032_v32  ;;  %v3110_v6 = vld [vmem:[%s4664_s2 + $0x4e] ss:$0 sm:$0xff] }
 0x136   : >> { %v1607_v13 = vadd.f32 %v1602_v10, %v1588_v4  ;;  %v1608_v17 = vadd.f32 %v1604_v11, %v1589_v8  ;;  %v1635_v25 = vmul.f32 %v3098_v2, %v4038_v1  ;;  %v1636_v26 = vmul.f32 %v3098_v2, %v4050_v9 }
 0x137   : >> { %v1655_v18 = vmul.f32 %v3101_v7, %v4020_v56  ;;  %v1623_v28 = vsel %vm1077_vm4, %v1621_v12, %v1622_v14  ;;  %v1625_v30 = vsel %vm1077_vm4, %v1622_v14, %v1624_v15  ;;  %v1640_v19 = vrot.slane %v1634_v16, 3 }
 0x138   : >> { %v1656_v31 = vmul.f32 %v3101_v7, %v4029_v59  ;;  %v1628_v20 = vadd.f32 %v1623_v28, %v1607_v13  ;;  %v1629_v33 = vadd.f32 %v1625_v30, %v1608_v17  ;;  %v1641_v34 = vrot.slane %v1635_v25, 3 }
 0x139   : >> { %v1643_v35 = vrot.slane %v1636_v26, 3  ;;  %v1657_v37 = vmul.f32 %v3101_v7, %v4042_v47  ;;  %v1661_v38 = vrot.slane %v1655_v18, 4  ;;  %v1674_v39 = vmul.f32 %v3102_v27, %v4032_v32  ;;  %v3119_v18 = vld [vmem:[%s4664_s2 + $0x18] ss:$0 sm:$0xff] }
 0x13a   : >> { %v1662_v21 = vrot.slane %v1656_v31, 4  ;;  %v1642_v22 = vsel %vm1077_vm4, %v1640_v19, %v1641_v34  ;;  %v1675_v42 = vmul.f32 %v3102_v27, %v4038_v1  ;;  %v1676_v43 = vmul.f32 %v3102_v27, %v4050_v9  ;;  %v4143_v27 = vld [vmem:[%s3786_s13 + $0x48] sm:$0xff]  ;;  %v4153_v19 = vld [vmem:[%s3786_s13 + $0x50] sm:$0xff] }
 0x13b   : >> { %v1644_v23 = vsel %vm1077_vm4, %v1641_v34, %v1643_v35  ;;  %v1647_v44 = vadd.f32 %v1642_v22, %v1628_v20  ;;  %v1664_v48 = vrot.slane %v1657_v37, 4  ;;  %v1680_v49 = vrot.slane %v1674_v39, 4  ;;  %v4156_v31 = vld [vmem:[%s3797_s14 + $0x48] sm:$0xff]  ;;  %v4163_v37 = vld [vmem:[%s3786_s13 + $0x58] sm:$0x3f] }
 0x13c   : >> { %v1648_v45 = vadd.f32 %v1644_v23, %v1629_v33  ;;  %v1663_v46 = vsel %vm1118_vm5, %v1661_v38, %v1662_v21  ;;  %v1681_v50 = vrot.slane %v1675_v42, 4  ;;  %v1683_v51 = vrot.slane %v1676_v43, 4  ;;  %v4166_v38 = vld [vmem:[%s3797_s14 + $0x50] sm:$0xff]  ;;  %v4174_v42 = vld [vmem:[%s3797_s14 + $0x58] sm:$0x3f] }
 0x13d   : >> { %v1695_v53 = vmul.f32 %v3105_v40, %v4020_v56  ;;  %v1665_v54 = vsel %vm1118_vm5, %v1662_v21, %v1664_v48  ;;  %v1668_v55 = vadd.f32 %v1663_v46, %v1647_v44  ;;  %v1696_v24 = vmul.f32 %v3105_v40, %v4029_v59 }
 0x13e   : >> { %v1697_v57 = vmul.f32 %v3105_v40, %v4042_v47  ;;  %v1669_v29 = vadd.f32 %v1665_v54, %v1648_v45  ;;  %v1682_v41 = vsel %vm1118_vm5, %v1680_v49, %v1681_v50  ;;  %v1684_v36 = vsel %vm1118_vm5, %v1681_v50, %v1683_v51  ;;  %v3123_v40 = vld [vmem:[%s4664_s2 + $0x19] ss:$0 sm:$0xff]  ;;  %v3124_v45 = vld [vmem:[%s4664_s2 + $0x51] ss:$0 sm:$0xff] }
 0x13f   : >> { %v1701_v60 = vrot.slane %v1695_v53, 5  ;;  %v1687_v61 = vadd.f32 %v1682_v41, %v1668_v55  ;;  %v1702_v62 = vrot.slane %v1696_v24, 5  ;;  %v1714_v2 = vmul.f32 %v3106_v52, %v4032_v32 }
 0x140   : >> { %v1704_v63 = vrot.slane %v1697_v57, 5  ;;  %v1688_v3 = vadd.f32 %v1684_v36, %v1669_v29  ;;  %v1715_v4 = vmul.f32 %v3106_v52, %v4038_v1  ;;  %v1716_v5 = vmul.f32 %v3106_v52, %v4050_v9  ;;  %v3127_v29 = vld [vmem:[%s4664_s2 + $0x1a] ss:$0 sm:$0xff] }
 0x141   : >> { %v1735_v7 = vmul.f32 %v3109_v58, %v4020_v56  ;;  %v1703_v8 = vsel %vm1159_vm6, %v1701_v60, %v1702_v62  ;;  %v1720_v11 = vrot.slane %v1714_v2, 5  ;;  %v1736_v12 = vmul.f32 %v3109_v58, %v4029_v59 }
 0x142   : >> { %v1705_v10 = vsel %vm1159_vm6, %v1702_v62, %v1704_v63  ;;  %v1708_v13 = vadd.f32 %v1703_v8, %v1687_v61  ;;  %v1721_v15 = vrot.slane %v1715_v4, 5  ;;  %v1723_v16 = vrot.slane %v1716_v5, 5  ;;  %v3128_v4 = vld [vmem:[%s4664_s2 + $0x52] ss:$0 sm:$0xff] }
 0x143   : >> { %v1709_v14 = vadd.f32 %v1705_v10, %v1688_v3  ;;  %v1737_v17 = vmul.f32 %v3109_v58, %v4042_v47  ;;  %v1741_v25 = vrot.slane %v1735_v7, 6  ;;  %v1742_v26 = vrot.slane %v1736_v12, 6 }
 0x144   : >> { %v1754_v56 = vmul.f32 %v3110_v6, %v4032_v32  ;;  %v1722_v59 = vsel %vm1159_vm6, %v1720_v11, %v1721_v15  ;;  %v1724_v28 = vsel %vm1159_vm6, %v1721_v15, %v1723_v16  ;;  %v1755_v30 = vmul.f32 %v3110_v6, %v4038_v1  ;;  %v3120_v32 = vld [vmem:[%s4664_s2 + $0x50] ss:$0 sm:$0xff] }
 0x145   : >> { %v1756_v47 = vmul.f32 %v3110_v6, %v4050_v9  ;;  %v1727_v20 = vadd.f32 %v1722_v59, %v1708_v13  ;;  %v1728_v33 = vadd.f32 %v1724_v28, %v1709_v14  ;;  %v1743_v34 = vsel %vm1200_vm7, %v1741_v25, %v1742_v26  ;;  %v3131_v14 = vld [vmem:[%s4664_s2 + $0x1b] ss:$0 sm:$0xff] }
 0x146   : >> { %v1744_v35 = vrot.slane %v1737_v17, 6  ;;  %v1760_v1 = vrot.slane %v1754_v56, 6  ;;  %v1761_v9 = vrot.slane %v1755_v30, 6  ;;  %v1787_v39 = vmul.f32 %v3119_v18, %v4143_v27 }
 0x147   : >> { %v1763_v21 = vrot.slane %v1756_v47, 6  ;;  %v1748_v23 = vadd.f32 %v1743_v34, %v1727_v20  ;;  %v1788_v43 = vmul.f32 %v3119_v18, %v4153_v19  ;;  %v1795_v44 = vmul.f32 %v3120_v32, %v4156_v31 }
 0x148   : >> { %v1745_v22 = vsel %vm1200_vm7, %v1742_v26, %v1744_v35  ;;  %v1762_v48 = vsel %vm1200_vm7, %v1760_v1, %v1761_v9  ;;  %v1796_v50 = vmul.f32 %v3120_v32, %v4166_v38  ;;  %v1805_v52 = vmul.f32 %v3123_v40, %v4143_v27  ;;  %v3132_v1 = vld [vmem:[%s4664_s2 + $0x53] ss:$0 sm:$0xff] }
 0x149   : >> { %v1749_v46 = vadd.f32 %v1745_v22, %v1728_v33  ;;  %v1764_v49 = vsel %vm1200_vm7, %v1761_v9, %v1763_v21  ;;  %v1767_v51 = vadd.f32 %v1762_v48, %v1748_v23  ;;  %v1806_v53 = vmul.f32 %v3123_v40, %v4153_v19  ;;  %v3135_v22 = vld [vmem:[%s4664_s2 + $0x1c] ss:$0 sm:$0xff] }
 0x14a   : >> { %v1807_v54 = vmul.f32 %v3123_v40, %v4163_v37  ;;  %v1824_v24 = vmul.f32 %v3124_v45, %v4156_v31  ;;  %v1825_v57 = vmul.f32 %v3124_v45, %v4166_v38  ;;  %v1826_v58 = vmul.f32 %v3124_v45, %v4174_v42 }
 0x14b   : >> { %v1768_v55 = vadd.f32 %v1764_v49, %v1749_v46  ;;  %v1789_v41 = vadd.f32 %v1787_v39, %v1767_v51  ;;  %v1811_v36 = vrot.slane %v1805_v52, 1  ;;  %v1812_v60 = vrot.slane %v1806_v53, 1 }
 0x14c   : >> { %v1814_v61 = vrot.slane %v1807_v54, 1  ;;  %v1830_v63 = vrot.slane %v1824_v24, 1  ;;  %v1831_v2 = vrot.slane %v1825_v57, 1  ;;  %v1833_v3 = vrot.slane %v1826_v58, 1  ;;  %v3136_v54 = vld [vmem:[%s4664_s2 + $0x54] ss:$0 sm:$0xff] }
 0x14d   : >> { %v1790_v62 = vadd.f32 %v1788_v43, %v1768_v55  ;;  %v1797_v5 = vadd.f32 %v1795_v44, %v1789_v41  ;;  %v1813_v6 = vsel %vm995_vm2, %v1811_v36, %v1812_v60  ;;  %v1845_v8 = vmul.f32 %v3127_v29, %v4143_v27 }
 0x14e   : >> { %v1815_v7 = vsel %vm995_vm2, %v1812_v60, %v1814_v61  ;;  %v1832_v11 = vsel %vm995_vm2, %v1830_v63, %v1831_v2  ;;  %v1834_v12 = vsel %vm995_vm2, %v1831_v2, %v1833_v3  ;;  %v1846_v13 = vmul.f32 %v3127_v29, %v4153_v19 }
 0x14f   : >> { %v1798_v10 = vadd.f32 %v1796_v50, %v1790_v62  ;;  %v1818_v15 = vadd.f32 %v1813_v6, %v1797_v5  ;;  %v1847_v16 = vmul.f32 %v3127_v29, %v4163_v37  ;;  %v1851_v17 = vrot.slane %v1845_v8, 2 }
 0x150   : >> { %v1864_v25 = vmul.f32 %v3128_v4, %v4156_v31  ;;  %v1852_v56 = vrot.slane %v1846_v13, 2  ;;  %v1865_v18 = vmul.f32 %v3128_v4, %v4166_v38  ;;  %v1866_v59 = vmul.f32 %v3128_v4, %v4174_v42  ;;  %v3139_v4 = vld [vmem:[%s4664_s2 + $0x1d] ss:$0 sm:$0xff] }
 0x151   : >> { %v1819_v26 = vadd.f32 %v1815_v7, %v1798_v10  ;;  %v1837_v28 = vadd.f32 %v1832_v11, %v1818_v15  ;;  %v1854_v30 = vrot.slane %v1847_v16, 2  ;;  %v1885_v32 = vmul.f32 %v3131_v14, %v4143_v27 }
 0x152   : >> { %v1870_v47 = vrot.slane %v1864_v25, 2  ;;  %v1853_v33 = vsel %vm1036_vm3, %v1851_v17, %v1852_v56  ;;  %v1871_v34 = vrot.slane %v1865_v18, 2  ;;  %v1873_v35 = vrot.slane %v1866_v59, 2  ;;  %v3140_v17 = vld [vmem:[%s4664_s2 + $0x55] ss:$0 sm:$0xff] }
 0x153   : >> { %v1838_v20 = vadd.f32 %v1834_v12, %v1819_v26  ;;  %v1855_v9 = vsel %vm1036_vm3, %v1852_v56, %v1854_v30  ;;  %v1858_v21 = vadd.f32 %v1853_v33, %v1837_v28  ;;  %v1886_v39 = vmul.f32 %v3131_v14, %v4153_v19  ;;  %v3143_v28 = vld [vmem:[%s4664_s2 + $0x1e] ss:$0 sm:$0xff] }
 0x154   : >> { %v1887_v40 = vmul.f32 %v3131_v14, %v4163_v37  ;;  %v1872_v43 = vsel %vm1036_vm3, %v1870_v47, %v1871_v34  ;;  %v1874_v44 = vsel %vm1036_vm3, %v1871_v34, %v1873_v35  ;;  %v1891_v45 = vrot.slane %v1885_v32, 3 }
 0x155   : >> { %v1859_v23 = vadd.f32 %v1855_v9, %v1838_v20  ;;  %v1877_v46 = vadd.f32 %v1872_v43, %v1858_v21  ;;  %v1892_v48 = vrot.slane %v1886_v39, 3  ;;  %v1904_v50 = vmul.f32 %v3132_v1, %v4156_v31 }
 0x156   : >> { %v1894_v49 = vrot.slane %v1887_v40, 3  ;;  %v1905_v52 = vmul.f32 %v3132_v1, %v4166_v38  ;;  %v1906_v53 = vmul.f32 %v3132_v1, %v4174_v42  ;;  %v1925_v55 = vmul.f32 %v3135_v22, %v4143_v27  ;;  %v3144_v40 = vld [vmem:[%s4664_s2 + $0x56] ss:$0 sm:$0xff] }
 0x157   : >> { %v1878_v51 = vadd.f32 %v1874_v44, %v1859_v23  ;;  %v1893_v24 = vsel %vm1077_vm4, %v1891_v45, %v1892_v48  ;;  %v1910_v58 = vrot.slane %v1904_v50, 3  ;;  %v1926_v29 = vmul.f32 %v3135_v22, %v4153_v19 }
 0x158   : >> { %v1895_v57 = vsel %vm1077_vm4, %v1892_v48, %v1894_v49  ;;  %v1898_v41 = vadd.f32 %v1893_v24, %v1877_v46  ;;  %v1911_v60 = vrot.slane %v1905_v52, 3  ;;  %v1913_v61 = vrot.slane %v1906_v53, 3 }
 0x159   : >> { %v1899_v36 = vadd.f32 %v1895_v57, %v1878_v51  ;;  %v1927_v62 = vmul.f32 %v3135_v22, %v4163_v37  ;;  %v1931_v63 = vrot.slane %v1925_v55, 4  ;;  %v1932_v2 = vrot.slane %v1926_v29, 4  ;;  %v3153_v55 = vld [vmem:[%s4664_s2 + $0x20] ss:$0 sm:$0xff] }
 0x15a   : >> { %v1944_v3 = vmul.f32 %v3136_v54, %v4156_v31  ;;  %v1912_v5 = vsel %vm1077_vm4, %v1910_v58, %v1911_v60  ;;  %v1914_v6 = vsel %vm1077_vm4, %v1911_v60, %v1913_v61  ;;  %v1945_v7 = vmul.f32 %v3136_v54, %v4166_v38  ;;  %v4277_v58 = vld [vmem:[%s3786_s13 + $0x68] sm:$0xff]  ;;  %v4280_v29 = vld [vmem:[%s3797_s14 + $0x60] sm:$0xff] }
 0x15b   : >> { %v1946_v8 = vmul.f32 %v3136_v54, %v4174_v42  ;;  %v1917_v10 = vadd.f32 %v1912_v5, %v1898_v41  ;;  %v1918_v11 = vadd.f32 %v1914_v6, %v1899_v36  ;;  %v1933_v12 = vsel %vm1118_vm5, %v1931_v63, %v1932_v2  ;;  %v4267_v54 = vld [vmem:[%s3786_s13 + $0x60] sm:$0xff]  ;;  %v4290_v63 = vld [vmem:[%s3797_s14 + $0x68] sm:$0xff] }
 0x15c   : >> { %v1934_v13 = vrot.slane %v1927_v62, 4  ;;  %v1950_v14 = vrot.slane %v1944_v3, 4  ;;  %v1951_v15 = vrot.slane %v1945_v7, 4  ;;  %v1965_v25 = vmul.f32 %v3139_v4, %v4143_v27  ;;  %v4287_v62 = vld [vmem:[%s3786_s13 + $0x70] sm:$0x3f] }
 0x15d   : >> { %v1953_v16 = vrot.slane %v1946_v8, 4  ;;  %v1938_v56 = vadd.f32 %v1933_v12, %v1917_v10  ;;  %v1966_v18 = vmul.f32 %v3139_v4, %v4153_v19  ;;  %v1967_v59 = vmul.f32 %v3139_v4, %v4163_v37  ;;  %v3157_v4 = vld [vmem:[%s4664_s2 + $0x21] ss:$0 sm:$0xff]  ;;  %v4298_v7 = vld [vmem:[%s3797_s14 + $0x70] sm:$0x3f] }
 0x15e   : >> { %v1935_v26 = vsel %vm1118_vm5, %v1932_v2, %v1934_v13  ;;  %v1952_v47 = vsel %vm1118_vm5, %v1950_v14, %v1951_v15  ;;  %v1971_v20 = vrot.slane %v1965_v25, 5  ;;  %v1984_v1 = vmul.f32 %v3140_v17, %v4156_v31 }
 0x15f   : >> { %v1939_v30 = vadd.f32 %v1935_v26, %v1918_v11  ;;  %v1954_v32 = vsel %vm1118_vm5, %v1951_v15, %v1953_v16  ;;  %v1957_v33 = vadd.f32 %v1952_v47, %v1938_v56  ;;  %v1972_v34 = vrot.slane %v1966_v18, 5  ;;  %v3158_v11 = vld [vmem:[%s4664_s2 + $0x59] ss:$0 sm:$0xff] }
 0x160   : >> { %v1974_v35 = vrot.slane %v1967_v59, 5  ;;  %v1985_v21 = vmul.f32 %v3140_v17, %v4166_v38  ;;  %v1986_v39 = vmul.f32 %v3140_v17, %v4174_v42  ;;  %v2005_v22 = vmul.f32 %v3143_v28, %v4143_v27 }
 0x161   : >> { %v1958_v9 = vadd.f32 %v1954_v32, %v1939_v30  ;;  %v1973_v23 = vsel %vm1159_vm6, %v1971_v20, %v1972_v34  ;;  %v1990_v44 = vrot.slane %v1984_v1, 5  ;;  %v2006_v45 = vmul.f32 %v3143_v28, %v4153_v19  ;;  %v3161_v30 = vld [vmem:[%s4664_s2 + $0x22] ss:$0 sm:$0xff] }
 0x162   : >> { %v1975_v43 = vsel %vm1159_vm6, %v1972_v34, %v1974_v35  ;;  %v1978_v46 = vadd.f32 %v1973_v23, %v1957_v33  ;;  %v1991_v49 = vrot.slane %v1985_v21, 5  ;;  %v1993_v50 = vrot.slane %v1986_v39, 5  ;;  %v3162_v21 = vld [vmem:[%s4664_s2 + $0x5a] ss:$0 sm:$0xff] }
 0x163   : >> { %v1979_v48 = vadd.f32 %v1975_v43, %v1958_v9  ;;  %v2007_v51 = vmul.f32 %v3143_v28, %v4163_v37  ;;  %v2011_v52 = vrot.slane %v2005_v22, 6  ;;  %v2012_v53 = vrot.slane %v2006_v45, 6 }
 0x164   : >> { %v2024_v27 = vmul.f32 %v3144_v40, %v4156_v31  ;;  %v1992_v19 = vsel %vm1159_vm6, %v1990_v44, %v1991_v49  ;;  %v1994_v24 = vsel %vm1159_vm6, %v1991_v49, %v1993_v50  ;;  %v2025_v57 = vmul.f32 %v3144_v40, %v4166_v38  ;;  %v3154_v31 = vld [vmem:[%s4664_s2 + $0x58] ss:$0 sm:$0xff] }
 0x165   : >> { %v2026_v37 = vmul.f32 %v3144_v40, %v4174_v42  ;;  %v1997_v41 = vadd.f32 %v1992_v19, %v1978_v46  ;;  %v1998_v36 = vadd.f32 %v1994_v24, %v1979_v48  ;;  %v2013_v60 = vsel %vm1200_vm7, %v2011_v52, %v2012_v53  ;;  %v3165_v48 = vld [vmem:[%s4664_s2 + $0x23] ss:$0 sm:$0xff] }
 0x166   : >> { %v2014_v61 = vrot.slane %v2007_v51, 6  ;;  %v2030_v38 = vrot.slane %v2024_v27, 6  ;;  %v2031_v42 = vrot.slane %v2025_v57, 6  ;;  %v2057_v3 = vmul.f32 %v3153_v55, %v4267_v54 }
 0x167   : >> { %v2033_v2 = vrot.slane %v2026_v37, 6  ;;  %v2018_v6 = vadd.f32 %v2013_v60, %v1997_v41  ;;  %v2058_v8 = vmul.f32 %v3153_v55, %v4277_v58  ;;  %v2065_v10 = vmul.f32 %v3154_v31, %v4280_v29 }
 0x168   : >> { %v2015_v5 = vsel %vm1200_vm7, %v2012_v53, %v2014_v61  ;;  %v2032_v13 = vsel %vm1200_vm7, %v2030_v38, %v2031_v42  ;;  %v2066_v15 = vmul.f32 %v3154_v31, %v4290_v63  ;;  %v2075_v17 = vmul.f32 %v3157_v4, %v4267_v54  ;;  %v3166_v38 = vld [vmem:[%s4664_s2 + $0x5b] ss:$0 sm:$0xff] }
 0x169   : >> { %v2019_v12 = vadd.f32 %v2015_v5, %v1998_v36  ;;  %v2034_v14 = vsel %vm1200_vm7, %v2031_v42, %v2033_v2  ;;  %v2037_v16 = vadd.f32 %v2032_v13, %v2018_v6  ;;  %v2076_v25 = vmul.f32 %v3157_v4, %v4277_v58  ;;  %v3169_v5 = vld [vmem:[%s4664_s2 + $0x24] ss:$0 sm:$0xff] }
 0x16a   : >> { %v2077_v26 = vmul.f32 %v3157_v4, %v4287_v62  ;;  %v2094_v18 = vmul.f32 %v3158_v11, %v4280_v29  ;;  %v2095_v59 = vmul.f32 %v3158_v11, %v4290_v63  ;;  %v2096_v28 = vmul.f32 %v3158_v11, %v4298_v7 }
 0x16b   : >> { %v2038_v56 = vadd.f32 %v2034_v14, %v2019_v12  ;;  %v2059_v47 = vadd.f32 %v2057_v3, %v2037_v16  ;;  %v2081_v32 = vrot.slane %v2075_v17, 1  ;;  %v2082_v20 = vrot.slane %v2076_v25, 1 }
 0x16c   : >> { %v2084_v33 = vrot.slane %v2077_v26, 1  ;;  %v2100_v35 = vrot.slane %v2094_v18, 1  ;;  %v2101_v1 = vrot.slane %v2095_v59, 1  ;;  %v2103_v9 = vrot.slane %v2096_v28, 1  ;;  %v3170_v26 = vld [vmem:[%s4664_s2 + $0x5c] ss:$0 sm:$0xff] }
 0x16d   : >> { %v2060_v34 = vadd.f32 %v2058_v8, %v2038_v56  ;;  %v2067_v39 = vadd.f32 %v2065_v10, %v2059_v47  ;;  %v2083_v40 = vsel %vm995_vm2, %v2081_v32, %v2082_v20  ;;  %v2115_v23 = vmul.f32 %v3161_v30, %v4267_v54 }
 0x16e   : >> { %v2085_v22 = vsel %vm995_vm2, %v2082_v20, %v2084_v33  ;;  %v2102_v44 = vsel %vm995_vm2, %v2100_v35, %v2101_v1  ;;  %v2104_v45 = vsel %vm995_vm2, %v2101_v1, %v2103_v9  ;;  %v2116_v46 = vmul.f32 %v3161_v30, %v4277_v58 }
 0x16f   : >> { %v2068_v43 = vadd.f32 %v2066_v15, %v2060_v34  ;;  %v2088_v49 = vadd.f32 %v2083_v40, %v2067_v39  ;;  %v2117_v50 = vmul.f32 %v3161_v30, %v4287_v62  ;;  %v2121_v51 = vrot.slane %v2115_v23, 2 }
 0x170   : >> { %v2134_v52 = vmul.f32 %v3162_v21, %v4280_v29  ;;  %v2122_v27 = vrot.slane %v2116_v46, 2  ;;  %v2135_v55 = vmul.f32 %v3162_v21, %v4290_v63  ;;  %v2136_v19 = vmul.f32 %v3162_v21, %v4298_v7  ;;  %v3173_v21 = vld [vmem:[%s4664_s2 + $0x25] ss:$0 sm:$0xff] }
 0x171   : >> { %v2089_v53 = vadd.f32 %v2085_v22, %v2068_v43  ;;  %v2107_v24 = vadd.f32 %v2102_v44, %v2088_v49  ;;  %v2124_v57 = vrot.slane %v2117_v50, 2  ;;  %v2155_v31 = vmul.f32 %v3165_v48, %v4267_v54 }
 0x172   : >> { %v2140_v37 = vrot.slane %v2134_v52, 2  ;;  %v2123_v36 = vsel %vm1036_vm3, %v2121_v51, %v2122_v27  ;;  %v2141_v60 = vrot.slane %v2135_v55, 2  ;;  %v2143_v61 = vrot.slane %v2136_v19, 2  ;;  %v3174_v51 = vld [vmem:[%s4664_s2 + $0x5d] ss:$0 sm:$0xff] }
 0x173   : >> { %v2108_v41 = vadd.f32 %v2104_v45, %v2089_v53  ;;  %v2125_v42 = vsel %vm1036_vm3, %v2122_v27, %v2124_v57  ;;  %v2128_v2 = vadd.f32 %v2123_v36, %v2107_v24  ;;  %v2156_v3 = vmul.f32 %v3165_v48, %v4277_v58  ;;  %v3177_v24 = vld [vmem:[%s4664_s2 + $0x26] ss:$0 sm:$0xff] }
 0x174   : >> { %v2157_v4 = vmul.f32 %v3165_v48, %v4287_v62  ;;  %v2142_v8 = vsel %vm1036_vm3, %v2140_v37, %v2141_v60  ;;  %v2144_v10 = vsel %vm1036_vm3, %v2141_v60, %v2143_v61  ;;  %v2161_v11 = vrot.slane %v2155_v31, 3 }
 0x175   : >> { %v2129_v6 = vadd.f32 %v2125_v42, %v2108_v41  ;;  %v2147_v12 = vadd.f32 %v2142_v8, %v2128_v2  ;;  %v2162_v13 = vrot.slane %v2156_v3, 3  ;;  %v2174_v15 = vmul.f32 %v3166_v38, %v4280_v29 }
 0x176   : >> { %v2164_v14 = vrot.slane %v2157_v4, 3  ;;  %v2175_v17 = vmul.f32 %v3166_v38, %v4290_v63  ;;  %v2176_v25 = vmul.f32 %v3166_v38, %v4298_v7  ;;  %v2195_v56 = vmul.f32 %v3169_v5, %v4267_v54  ;;  %v3178_v4 = vld [vmem:[%s4664_s2 + $0x5e] ss:$0 sm:$0xff] }
 0x177   : >> { %v2148_v16 = vadd.f32 %v2144_v10, %v2129_v6  ;;  %v2163_v18 = vsel %vm1077_vm4, %v2161_v11, %v2162_v13  ;;  %v2180_v28 = vrot.slane %v2174_v15, 3  ;;  %v2196_v30 = vmul.f32 %v3169_v5, %v4277_v58 }
 0x178   : >> { %v2165_v59 = vsel %vm1077_vm4, %v2162_v13, %v2164_v14  ;;  %v2168_v47 = vadd.f32 %v2163_v18, %v2147_v12  ;;  %v2181_v20 = vrot.slane %v2175_v17, 3  ;;  %v2183_v33 = vrot.slane %v2176_v25, 3 }
 0x179   : >> { %v2169_v32 = vadd.f32 %v2165_v59, %v2148_v16  ;;  %v2197_v34 = vmul.f32 %v3169_v5, %v4287_v62  ;;  %v2201_v35 = vrot.slane %v2195_v56, 4  ;;  %v2202_v1 = vrot.slane %v2196_v30, 4  ;;  %v3187_v56 = vld [vmem:[%s4664_s2 + $0x28] ss:$0 sm:$0xff]  ;;  %v4404_v30 = vld [vmem:[%s3797_s14 + $0x78] sm:$0xff] }
 0x17a   : >> { %v2214_v9 = vmul.f32 %v3170_v26, %v4280_v29  ;;  %v2182_v39 = vsel %vm1077_vm4, %v2180_v28, %v2181_v20  ;;  %v2184_v40 = vsel %vm1077_vm4, %v2181_v20, %v2183_v33  ;;  %v2215_v22 = vmul.f32 %v3170_v26, %v4290_v63  ;;  %v4401_v28 = vld [vmem:[%s3786_s13 + $0x80] sm:$0xff] }
 0x17b   : >> { %v2216_v23 = vmul.f32 %v3170_v26, %v4298_v7  ;;  %v2187_v43 = vadd.f32 %v2182_v39, %v2168_v47  ;;  %v2188_v44 = vadd.f32 %v2184_v40, %v2169_v32  ;;  %v2203_v45 = vsel %vm1118_vm5, %v2201_v35, %v2202_v1  ;;  %v4391_v26 = vld [vmem:[%s3786_s13 + $0x78] sm:$0xff]  ;;  %v4414_v35 = vld [vmem:[%s3797_s14 + $0x80] sm:$0xff] }
 0x17c   : >> { %v2204_v46 = vrot.slane %v2197_v34, 4  ;;  %v2220_v48 = vrot.slane %v2214_v9, 4  ;;  %v2221_v49 = vrot.slane %v2215_v22, 4  ;;  %v2235_v52 = vmul.f32 %v3173_v21, %v4267_v54  ;;  %v4411_v34 = vld [vmem:[%s3786_s13 + $0x88] sm:$0x3f] }
 0x17d   : >> { %v2223_v50 = vrot.slane %v2216_v23, 4  ;;  %v2208_v27 = vadd.f32 %v2203_v45, %v2187_v43  ;;  %v2236_v55 = vmul.f32 %v3173_v21, %v4277_v58  ;;  %v2237_v19 = vmul.f32 %v3173_v21, %v4287_v62  ;;  %v3191_v21 = vld [vmem:[%s4664_s2 + $0x29] ss:$0 sm:$0xff] }
 0x17e   : >> { %v2205_v53 = vsel %vm1118_vm5, %v2202_v1, %v2204_v46  ;;  %v2222_v37 = vsel %vm1118_vm5, %v2220_v48, %v2221_v49  ;;  %v2241_v41 = vrot.slane %v2235_v52, 5  ;;  %v2254_v38 = vmul.f32 %v3174_v51, %v4280_v29  ;;  %v4422_v22 = vld [vmem:[%s3797_s14 + $0x88] sm:$0x3f] }
 0x17f   : >> { %v2209_v57 = vadd.f32 %v2205_v53, %v2188_v44  ;;  %v2224_v31 = vsel %vm1118_vm5, %v2221_v49, %v2223_v50  ;;  %v2227_v36 = vadd.f32 %v2222_v37, %v2208_v27  ;;  %v2242_v60 = vrot.slane %v2236_v55, 5  ;;  %v3192_v44 = vld [vmem:[%s4664_s2 + $0x61] ss:$0 sm:$0xff] }
 0x180   : >> { %v2244_v61 = vrot.slane %v2237_v19, 5  ;;  %v2255_v2 = vmul.f32 %v3174_v51, %v4290_v63  ;;  %v2256_v3 = vmul.f32 %v3174_v51, %v4298_v7  ;;  %v2275_v5 = vmul.f32 %v3177_v24, %v4267_v54 }
 0x181   : >> { %v2228_v42 = vadd.f32 %v2224_v31, %v2209_v57  ;;  %v2243_v6 = vsel %vm1159_vm6, %v2241_v41, %v2242_v60  ;;  %v2260_v10 = vrot.slane %v2254_v38, 5  ;;  %v2276_v11 = vmul.f32 %v3177_v24, %v4277_v58  ;;  %v3195_v57 = vld [vmem:[%s4664_s2 + $0x2a] ss:$0 sm:$0xff] }
 0x182   : >> { %v2245_v8 = vsel %vm1159_vm6, %v2242_v60, %v2244_v61  ;;  %v2248_v12 = vadd.f32 %v2243_v6, %v2227_v36  ;;  %v2261_v14 = vrot.slane %v2255_v2, 5  ;;  %v2263_v15 = vrot.slane %v2256_v3, 5  ;;  %v3196_v2 = vld [vmem:[%s4664_s2 + $0x62] ss:$0 sm:$0xff] }
 0x183   : >> { %v2249_v13 = vadd.f32 %v2245_v8, %v2228_v42  ;;  %v2277_v16 = vmul.f32 %v3177_v24, %v4287_v62  ;;  %v2281_v17 = vrot.slane %v2275_v5, 6  ;;  %v2282_v25 = vrot.slane %v2276_v11, 6 }
 0x184   : >> { %v2294_v54 = vmul.f32 %v3178_v4, %v4280_v29  ;;  %v2262_v58 = vsel %vm1159_vm6, %v2260_v10, %v2261_v14  ;;  %v2264_v18 = vsel %vm1159_vm6, %v2261_v14, %v2263_v15  ;;  %v2295_v59 = vmul.f32 %v3178_v4, %v4290_v63  ;;  %v3188_v29 = vld [vmem:[%s4664_s2 + $0x60] ss:$0 sm:$0xff] }
 0x185   : >> { %v2296_v62 = vmul.f32 %v3178_v4, %v4298_v7  ;;  %v2267_v47 = vadd.f32 %v2262_v58, %v2248_v12  ;;  %v2268_v32 = vadd.f32 %v2264_v18, %v2249_v13  ;;  %v2283_v20 = vsel %vm1200_vm7, %v2281_v17, %v2282_v25  ;;  %v3199_v13 = vld [vmem:[%s4664_s2 + $0x2b] ss:$0 sm:$0xff] }
 0x186   : >> { %v2284_v33 = vrot.slane %v2277_v16, 6  ;;  %v2300_v63 = vrot.slane %v2294_v54, 6  ;;  %v2301_v7 = vrot.slane %v2295_v59, 6  ;;  %v2327_v9 = vmul.f32 %v3187_v56, %v4391_v26 }
 0x187   : >> { %v2303_v1 = vrot.slane %v2296_v62, 6  ;;  %v2288_v40 = vadd.f32 %v2283_v20, %v2267_v47  ;;  %v2328_v23 = vmul.f32 %v3187_v56, %v4401_v28  ;;  %v2335_v43 = vmul.f32 %v3188_v29, %v4404_v30 }
 0x188   : >> { %v2285_v39 = vsel %vm1200_vm7, %v2282_v25, %v2284_v33  ;;  %v2302_v46 = vsel %vm1200_vm7, %v2300_v63, %v2301_v7  ;;  %v2336_v49 = vmul.f32 %v3188_v29, %v4414_v35  ;;  %v2345_v51 = vmul.f32 %v3191_v21, %v4391_v26  ;;  %v3200_v63 = vld [vmem:[%s4664_s2 + $0x63] ss:$0 sm:$0xff] }
 0x189   : >> { %v2289_v45 = vadd.f32 %v2285_v39, %v2268_v32  ;;  %v2304_v48 = vsel %vm1200_vm7, %v2301_v7, %v2303_v1  ;;  %v2307_v50 = vadd.f32 %v2302_v46, %v2288_v40  ;;  %v2346_v52 = vmul.f32 %v3191_v21, %v4401_v28  ;;  %v3203_v39 = vld [vmem:[%s4664_s2 + $0x2c] ss:$0 sm:$0xff] }
 0x18a   : >> { %v2347_v53 = vmul.f32 %v3191_v21, %v4411_v34  ;;  %v2364_v55 = vmul.f32 %v3192_v44, %v4404_v30  ;;  %v2365_v19 = vmul.f32 %v3192_v44, %v4414_v35  ;;  %v2366_v24 = vmul.f32 %v3192_v44, %v4422_v22 }
 0x18b   : >> { %v2308_v27 = vadd.f32 %v2304_v48, %v2289_v45  ;;  %v2329_v37 = vadd.f32 %v2327_v9, %v2307_v50  ;;  %v2351_v31 = vrot.slane %v2345_v51, 1  ;;  %v2352_v41 = vrot.slane %v2346_v52, 1 }
 0x18c   : >> { %v2354_v36 = vrot.slane %v2347_v53, 1  ;;  %v2370_v61 = vrot.slane %v2364_v55, 1  ;;  %v2371_v38 = vrot.slane %v2365_v19, 1  ;;  %v2373_v42 = vrot.slane %v2366_v24, 1  ;;  %v3204_v53 = vld [vmem:[%s4664_s2 + $0x64] ss:$0 sm:$0xff] }
 0x18d   : >> { %v2330_v60 = vadd.f32 %v2328_v23, %v2308_v27  ;;  %v2337_v3 = vadd.f32 %v2335_v43, %v2329_v37  ;;  %v2353_v4 = vsel %vm995_vm2, %v2351_v31, %v2352_v41  ;;  %v2385_v6 = vmul.f32 %v3195_v57, %v4391_v26 }
 0x18e   : >> { %v2355_v5 = vsel %vm995_vm2, %v2352_v41, %v2354_v36  ;;  %v2372_v10 = vsel %vm995_vm2, %v2370_v61, %v2371_v38  ;;  %v2374_v11 = vsel %vm995_vm2, %v2371_v38, %v2373_v42  ;;  %v2386_v12 = vmul.f32 %v3195_v57, %v4401_v28 }
 0x18f   : >> { %v2338_v8 = vadd.f32 %v2336_v49, %v2330_v60  ;;  %v2358_v14 = vadd.f32 %v2353_v4, %v2337_v3  ;;  %v2387_v15 = vmul.f32 %v3195_v57, %v4411_v34  ;;  %v2391_v16 = vrot.slane %v2385_v6, 2 }
 0x190   : >> { %v2404_v17 = vmul.f32 %v3196_v2, %v4404_v30  ;;  %v2392_v54 = vrot.slane %v2386_v12, 2  ;;  %v2405_v56 = vmul.f32 %v3196_v2, %v4414_v35  ;;  %v2406_v58 = vmul.f32 %v3196_v2, %v4422_v22  ;;  %v3207_v2 = vld [vmem:[%s4664_s2 + $0x2d] ss:$0 sm:$0xff] }
 0x191   : >> { %v2359_v25 = vadd.f32 %v2355_v5, %v2338_v8  ;;  %v2377_v18 = vadd.f32 %v2372_v10, %v2358_v14  ;;  %v2394_v59 = vrot.slane %v2387_v15, 2  ;;  %v2425_v29 = vmul.f32 %v3199_v13, %v4391_v26 }
 0x192   : >> { %v2410_v62 = vrot.slane %v2404_v17, 2  ;;  %v2393_v32 = vsel %vm1036_vm3, %v2391_v16, %v2392_v54  ;;  %v2411_v20 = vrot.slane %v2405_v56, 2  ;;  %v2413_v33 = vrot.slane %v2406_v58, 2  ;;  %v3208_v16 = vld [vmem:[%s4664_s2 + $0x65] ss:$0 sm:$0xff] }
 0x193   : >> { %v2378_v47 = vadd.f32 %v2374_v11, %v2359_v25  ;;  %v2395_v7 = vsel %vm1036_vm3, %v2392_v54, %v2394_v59  ;;  %v2398_v1 = vadd.f32 %v2393_v32, %v2377_v18  ;;  %v2426_v9 = vmul.f32 %v3199_v13, %v4401_v28  ;;  %v3211_v18 = vld [vmem:[%s4664_s2 + $0x2e] ss:$0 sm:$0xff] }
 0x194   : >> { %v2427_v21 = vmul.f32 %v3199_v13, %v4411_v34  ;;  %v2412_v23 = vsel %vm1036_vm3, %v2410_v62, %v2411_v20  ;;  %v2414_v43 = vsel %vm1036_vm3, %v2411_v20, %v2413_v33  ;;  %v2431_v44 = vrot.slane %v2425_v29, 3 }
 0x195   : >> { %v2399_v40 = vadd.f32 %v2395_v7, %v2378_v47  ;;  %v2417_v45 = vadd.f32 %v2412_v23, %v2398_v1  ;;  %v2432_v46 = vrot.slane %v2426_v9, 3  ;;  %v2444_v49 = vmul.f32 %v3200_v63, %v4404_v30 }
 0x196   : >> { %v2434_v48 = vrot.slane %v2427_v21, 3  ;;  %v2445_v51 = vmul.f32 %v3200_v63, %v4414_v35  ;;  %v2446_v52 = vmul.f32 %v3200_v63, %v4422_v22  ;;  %v2465_v27 = vmul.f32 %v3203_v39, %v4391_v26  ;;  %v3212_v21 = vld [vmem:[%s4664_s2 + $0x66] ss:$0 sm:$0xff] }
 0x197   : >> { %v2418_v50 = vadd.f32 %v2414_v43, %v2399_v40  ;;  %v2433_v55 = vsel %vm1077_vm4, %v2431_v44, %v2432_v46  ;;  %v2450_v24 = vrot.slane %v2444_v49, 3  ;;  %v2466_v57 = vmul.f32 %v3203_v39, %v4401_v28 }
 0x198   : >> { %v2435_v19 = vsel %vm1077_vm4, %v2432_v46, %v2434_v48  ;;  %v2438_v37 = vadd.f32 %v2433_v55, %v2417_v45  ;;  %v2451_v41 = vrot.slane %v2445_v51, 3  ;;  %v2453_v36 = vrot.slane %v2446_v52, 3 }
 0x199   : >> { %v2439_v31 = vadd.f32 %v2435_v19, %v2418_v50  ;;  %v2467_v60 = vmul.f32 %v3203_v39, %v4411_v34  ;;  %v2471_v61 = vrot.slane %v2465_v27, 4  ;;  %v2472_v38 = vrot.slane %v2466_v57, 4  ;;  %v3221_v27 = vld [vmem:[%s4664_s2 + $0x30] ss:$0 sm:$0xff] }
 0x19a   : >> { %v2484_v42 = vmul.f32 %v3204_v53, %v4404_v30  ;;  %v2452_v3 = vsel %vm1077_vm4, %v2450_v24, %v2451_v41  ;;  %v2454_v4 = vsel %vm1077_vm4, %v2451_v41, %v2453_v36  ;;  %v2485_v5 = vmul.f32 %v3204_v53, %v4414_v35  ;;  %v4525_v24 = vld [vmem:[%s3786_s13 + $0x98] sm:$0xff]  ;;  %v4528_v57 = vld [vmem:[%s3797_s14 + $0x90] sm:$0xff] }
 0x19b   : >> { %v2486_v6 = vmul.f32 %v3204_v53, %v4422_v22  ;;  %v2457_v8 = vadd.f32 %v2452_v3, %v2438_v37  ;;  %v2458_v10 = vadd.f32 %v2454_v4, %v2439_v31  ;;  %v2473_v11 = vsel %vm1118_vm5, %v2471_v61, %v2472_v38  ;;  %v4515_v53 = vld [vmem:[%s3786_s13 + $0x90] sm:$0xff]  ;;  %v4538_v61 = vld [vmem:[%s3797_s14 + $0x98] sm:$0xff] }
 0x19c   : >> { %v2474_v12 = vrot.slane %v2467_v60, 4  ;;  %v2490_v13 = vrot.slane %v2484_v42, 4  ;;  %v2491_v14 = vrot.slane %v2485_v5, 4  ;;  %v2505_v17 = vmul.f32 %v3207_v2, %v4391_v26  ;;  %v4535_v60 = vld [vmem:[%s3786_s13 + $0xa0] sm:$0x3f]  ;;  %s3250_s13 = sshll.u32 %s3294_s29, 4 }
 0x19d   : >> { %v2493_v15 = vrot.slane %v2486_v6, 4  ;;  %v2478_v54 = vadd.f32 %v2473_v11, %v2457_v8  ;;  %v2506_v56 = vmul.f32 %v3207_v2, %v4401_v28  ;;  %v2507_v58 = vmul.f32 %v3207_v2, %v4411_v34  ;;  %v3225_v2 = vld [vmem:[%s4664_s2 + $0x31] ss:$0 sm:$0xff]  ;;  %v4546_v5 = vld [vmem:[%s3797_s14 + $0xa0] sm:$0x3f]  ;;  %s2870_s24 = scalar_lea.vmem %s217_s25, %s3250_s13  ;;  %s954_s29 = sadd.s32 1, %s3294_s29  }
 0x19e   : >> { %v2475_v25 = vsel %vm1118_vm5, %v2472_v38, %v2474_v12  ;;  %v2492_v62 = vsel %vm1118_vm5, %v2490_v13, %v2491_v14  ;;  %v2511_v47 = vrot.slane %v2505_v17, 5  ;;  %v2524_v63 = vmul.f32 %v3208_v16, %v4404_v30  ;;  %p951_p4 = scmp.ge.s32.totalorder %s954_s29, 16  }
 0x19f   : >> { %v2479_v59 = vadd.f32 %v2475_v25, %v2458_v10  ;;  %v2494_v29 = vsel %vm1118_vm5, %v2491_v14, %v2493_v15  ;;  %v2497_v32 = vadd.f32 %v2492_v62, %v2478_v54  ;;  %v2512_v20 = vrot.slane %v2506_v56, 5  ;;  %v3226_v10 = vld [vmem:[%s4664_s2 + $0x69] ss:$0 sm:$0xff] }
 0x1a0   : >> { %v2514_v33 = vrot.slane %v2507_v58, 5  ;;  %v2525_v1 = vmul.f32 %v3208_v16, %v4414_v35  ;;  %v2526_v9 = vmul.f32 %v3208_v16, %v4422_v22  ;;  %v2545_v39 = vmul.f32 %v3211_v18, %v4391_v26 }
 0x1a1   : >> { %v2498_v7 = vadd.f32 %v2494_v29, %v2479_v59  ;;  %v2513_v40 = vsel %vm1159_vm6, %v2511_v47, %v2512_v20  ;;  %v2530_v43 = vrot.slane %v2524_v63, 5  ;;  %v2546_v44 = vmul.f32 %v3211_v18, %v4401_v28  ;;  %v3229_v59 = vld [vmem:[%s4664_s2 + $0x32] ss:$0 sm:$0xff] }
 0x1a2   : >> { %v2515_v23 = vsel %vm1159_vm6, %v2512_v20, %v2514_v33  ;;  %v2518_v45 = vadd.f32 %v2513_v40, %v2497_v32  ;;  %v2531_v48 = vrot.slane %v2525_v1, 5  ;;  %v2533_v49 = vrot.slane %v2526_v9, 5  ;;  %v3230_v1 = vld [vmem:[%s4664_s2 + $0x6a] ss:$0 sm:$0xff] }
 0x1a3   : >> { %v2519_v46 = vadd.f32 %v2515_v23, %v2498_v7  ;;  %v2547_v50 = vmul.f32 %v3211_v18, %v4411_v34  ;;  %v2551_v51 = vrot.slane %v2545_v39, 6  ;;  %v2552_v52 = vrot.slane %v2546_v44, 6 }
 0x1a4   : >> { %v2564_v26 = vmul.f32 %v3212_v21, %v4404_v30  ;;  %v2532_v28 = vsel %vm1159_vm6, %v2530_v43, %v2531_v48  ;;  %v2534_v55 = vsel %vm1159_vm6, %v2531_v48, %v2533_v49  ;;  %v2565_v19 = vmul.f32 %v3212_v21, %v4414_v35  ;;  %v3222_v30 = vld [vmem:[%s4664_s2 + $0x68] ss:$0 sm:$0xff] }
 0x1a5   : >> { %v2566_v34 = vmul.f32 %v3212_v21, %v4422_v22  ;;  %v2537_v37 = vadd.f32 %v2532_v28, %v2518_v45  ;;  %v2538_v31 = vadd.f32 %v2534_v55, %v2519_v46  ;;  %v2553_v41 = vsel %vm1200_vm7, %v2551_v51, %v2552_v52  ;;  %v3233_v46 = vld [vmem:[%s4664_s2 + $0x33] ss:$0 sm:$0xff] }
 0x1a6   : >> { %v2554_v36 = vrot.slane %v2547_v50, 6  ;;  %v2570_v35 = vrot.slane %v2564_v26, 6  ;;  %v2571_v22 = vrot.slane %v2565_v19, 6  ;;  %v2597_v42 = vmul.f32 %v3221_v27, %v4515_v53 }
 0x1a7   : >> { %v2573_v38 = vrot.slane %v2566_v34, 6  ;;  %v2558_v4 = vadd.f32 %v2553_v41, %v2537_v37  ;;  %v2598_v6 = vmul.f32 %v3221_v27, %v4525_v24  ;;  %v2605_v8 = vmul.f32 %v3222_v30, %v4528_v57 }
 0x1a8   : >> { %v2555_v3 = vsel %vm1200_vm7, %v2552_v52, %v2554_v36  ;;  %v2572_v12 = vsel %vm1200_vm7, %v2570_v35, %v2571_v22  ;;  %v2606_v14 = vmul.f32 %v3222_v30, %v4538_v61  ;;  %v2615_v16 = vmul.f32 %v3225_v2, %v4515_v53  ;;  %v3234_v35 = vld [vmem:[%s4664_s2 + $0x6b] ss:$0 sm:$0xff] }
 0x1a9   : >> { %v2559_v11 = vadd.f32 %v2555_v3, %v2538_v31  ;;  %v2574_v13 = vsel %vm1200_vm7, %v2571_v22, %v2573_v38  ;;  %v2577_v15 = vadd.f32 %v2572_v12, %v2558_v4  ;;  %v2616_v17 = vmul.f32 %v3225_v2, %v4525_v24  ;;  %v3237_v3 = vld [vmem:[%s4664_s2 + $0x34] ss:$0 sm:$0xff] }
 0x1aa   : >> { %v2617_v25 = vmul.f32 %v3225_v2, %v4535_v60  ;;  %v2634_v56 = vmul.f32 %v3226_v10, %v4528_v57  ;;  %v2635_v58 = vmul.f32 %v3226_v10, %v4538_v61  ;;  %v2636_v18 = vmul.f32 %v3226_v10, %v4546_v5 }
 0x1ab   : >> { %v2578_v54 = vadd.f32 %v2574_v13, %v2559_v11  ;;  %v2599_v62 = vadd.f32 %v2597_v42, %v2577_v15  ;;  %v2621_v29 = vrot.slane %v2615_v16, 1  ;;  %v2622_v47 = vrot.slane %v2616_v17, 1 }
 0x1ac   : >> { %v2624_v32 = vrot.slane %v2617_v25, 1  ;;  %v2640_v33 = vrot.slane %v2634_v56, 1  ;;  %v2641_v63 = vrot.slane %v2635_v58, 1  ;;  %v2643_v7 = vrot.slane %v2636_v18, 1  ;;  %v3238_v25 = vld [vmem:[%s4664_s2 + $0x6c] ss:$0 sm:$0xff] }
 0x1ad   : >> { %v2600_v20 = vadd.f32 %v2598_v6, %v2578_v54  ;;  %v2607_v9 = vadd.f32 %v2605_v8, %v2599_v62  ;;  %v2623_v21 = vsel %vm995_vm2, %v2621_v29, %v2622_v47  ;;  %v2655_v40 = vmul.f32 %v3229_v59, %v4515_v53 }
 0x1ae   : >> { %v2625_v39 = vsel %vm995_vm2, %v2622_v47, %v2624_v32  ;;  %v2642_v43 = vsel %vm995_vm2, %v2640_v33, %v2641_v63  ;;  %v2644_v44 = vsel %vm995_vm2, %v2641_v63, %v2643_v7  ;;  %v2656_v45 = vmul.f32 %v3229_v59, %v4525_v24 }
 0x1af   : >> { %v2608_v23 = vadd.f32 %v2606_v14, %v2600_v20  ;;  %v2628_v48 = vadd.f32 %v2623_v21, %v2607_v9  ;;  %v2657_v49 = vmul.f32 %v3229_v59, %v4535_v60  ;;  %v2661_v50 = vrot.slane %v2655_v40, 2 }
 0x1b0   : >> { %v2674_v51 = vmul.f32 %v3230_v1, %v4528_v57  ;;  %v2662_v26 = vrot.slane %v2656_v45, 2  ;;  %v2675_v27 = vmul.f32 %v3230_v1, %v4538_v61  ;;  %v2676_v28 = vmul.f32 %v3230_v1, %v4546_v5  ;;  %v3241_v1 = vld [vmem:[%s4664_s2 + $0x35] ss:$0 sm:$0xff] }
 0x1b1   : >> { %v2629_v52 = vadd.f32 %v2625_v39, %v2608_v23  ;;  %v2647_v55 = vadd.f32 %v2642_v43, %v2628_v48  ;;  %v2664_v19 = vrot.slane %v2657_v49, 2  ;;  %v2695_v30 = vmul.f32 %v3233_v46, %v4515_v53 }
 0x1b2   : >> { %v2680_v34 = vrot.slane %v2674_v51, 2  ;;  %v2663_v31 = vsel %vm1036_vm3, %v2661_v50, %v2662_v26  ;;  %v2681_v41 = vrot.slane %v2675_v27, 2  ;;  %v2683_v36 = vrot.slane %v2676_v28, 2  ;;  %v3242_v50 = vld [vmem:[%s4664_s2 + $0x6d] ss:$0 sm:$0xff] }
 0x1b3   : >> { %v2648_v37 = vadd.f32 %v2644_v44, %v2629_v52  ;;  %v2665_v22 = vsel %vm1036_vm3, %v2662_v26, %v2664_v19  ;;  %v2668_v38 = vadd.f32 %v2663_v31, %v2647_v55  ;;  %v2696_v42 = vmul.f32 %v3233_v46, %v4525_v24  ;;  %v3245_v55 = vld [vmem:[%s4664_s2 + $0x36] ss:$0 sm:$0xff] }
 0x1b4   : >> { %v2697_v2 = vmul.f32 %v3233_v46, %v4535_v60  ;;  %v2682_v6 = vsel %vm1036_vm3, %v2680_v34, %v2681_v41  ;;  %v2684_v8 = vsel %vm1036_vm3, %v2681_v41, %v2683_v36  ;;  %v2701_v10 = vrot.slane %v2695_v30, 3 }
 0x1b5   : >> { %v2669_v4 = vadd.f32 %v2665_v22, %v2648_v37  ;;  %v2687_v11 = vadd.f32 %v2682_v6, %v2668_v38  ;;  %v2702_v12 = vrot.slane %v2696_v42, 3  ;;  %v2714_v14 = vmul.f32 %v3234_v35, %v4528_v57 }
 0x1b6   : >> { %v2704_v13 = vrot.slane %v2697_v2, 3  ;;  %v2715_v16 = vmul.f32 %v3234_v35, %v4538_v61  ;;  %v2716_v17 = vmul.f32 %v3234_v35, %v4546_v5  ;;  %v2735_v54 = vmul.f32 %v3237_v3, %v4515_v53  ;;  %v3246_v2 = vld [vmem:[%s4664_s2 + $0x6e] ss:$0 sm:$0xff] }
 0x1b7   : >> { %v2688_v15 = vadd.f32 %v2684_v8, %v2669_v4  ;;  %v2703_v56 = vsel %vm1077_vm4, %v2701_v10, %v2702_v12  ;;  %v2720_v18 = vrot.slane %v2714_v14, 3  ;;  %v2736_v59 = vmul.f32 %v3237_v3, %v4525_v24 }
 0x1b8   : >> { %v2705_v58 = vsel %vm1077_vm4, %v2702_v12, %v2704_v13  ;;  %v2708_v62 = vadd.f32 %v2703_v56, %v2687_v11  ;;  %v2721_v47 = vrot.slane %v2715_v16, 3  ;;  %v2723_v32 = vrot.slane %v2716_v17, 3 }
 0x1b9   : >> { %v2709_v29 = vadd.f32 %v2705_v58, %v2688_v15  ;;  %v2737_v20 = vmul.f32 %v3237_v3, %v4535_v60  ;;  %v2741_v33 = vrot.slane %v2735_v54, 4  ;;  %v2742_v63 = vrot.slane %v2736_v59, 4 }
 0x1ba   : >> { %v2754_v7 = vmul.f32 %v3238_v25, %v4528_v57  ;;  %v2722_v9 = vsel %vm1077_vm4, %v2720_v18, %v2721_v47  ;;  %v2724_v21 = vsel %vm1077_vm4, %v2721_v47, %v2723_v32  ;;  %v2755_v39 = vmul.f32 %v3238_v25, %v4538_v61 }
 0x1bb   : >> { %v2756_v40 = vmul.f32 %v3238_v25, %v4546_v5  ;;  %v2727_v23 = vadd.f32 %v2722_v9, %v2708_v62  ;;  %v2728_v43 = vadd.f32 %v2724_v21, %v2709_v29  ;;  %v2743_v44 = vsel %vm1118_vm5, %v2741_v33, %v2742_v63 }
 0x1bc   : >> { %v2744_v45 = vrot.slane %v2737_v20, 4  ;;  %v2760_v46 = vrot.slane %v2754_v7, 4  ;;  %v2761_v48 = vrot.slane %v2755_v39, 4  ;;  %v2775_v51 = vmul.f32 %v3241_v1, %v4515_v53 }
 0x1bd   : >> { %v2763_v49 = vrot.slane %v2756_v40, 4  ;;  %v2748_v26 = vadd.f32 %v2743_v44, %v2727_v23  ;;  %v2776_v27 = vmul.f32 %v3241_v1, %v4525_v24  ;;  %v2777_v28 = vmul.f32 %v3241_v1, %v4535_v60 }
 0x1be   : >> { %v2745_v52 = vsel %vm1118_vm5, %v2742_v63, %v2744_v45  ;;  %v2762_v34 = vsel %vm1118_vm5, %v2760_v46, %v2761_v48  ;;  %v2781_v37 = vrot.slane %v2775_v51, 5  ;;  %v2794_v35 = vmul.f32 %v3242_v50, %v4528_v57 }
 0x1bf   : >> { %v2749_v19 = vadd.f32 %v2745_v52, %v2728_v43  ;;  %v2764_v30 = vsel %vm1118_vm5, %v2761_v48, %v2763_v49  ;;  %v2767_v31 = vadd.f32 %v2762_v34, %v2748_v26  ;;  %v2782_v41 = vrot.slane %v2776_v27, 5 }
 0x1c0   : >> { %v2784_v36 = vrot.slane %v2777_v28, 5  ;;  %v2795_v38 = vmul.f32 %v3242_v50, %v4538_v61  ;;  %v2796_v42 = vmul.f32 %v3242_v50, %v4546_v5  ;;  %v2815_v3 = vmul.f32 %v3245_v55, %v4515_v53 }
 0x1c1   : >> { %v2768_v22 = vadd.f32 %v2764_v30, %v2749_v19  ;;  %v2783_v4 = vsel %vm1159_vm6, %v2781_v37, %v2782_v41  ;;  %v2800_v8 = vrot.slane %v2794_v35, 5  ;;  %v2816_v10 = vmul.f32 %v3245_v55, %v4525_v24 }
 0x1c2   : >> { %v2785_v6 = vsel %vm1159_vm6, %v2782_v41, %v2784_v36  ;;  %v2788_v11 = vadd.f32 %v2783_v4, %v2767_v31  ;;  %v2801_v13 = vrot.slane %v2795_v38, 5  ;;  %v2803_v14 = vrot.slane %v2796_v42, 5 }
 0x1c3   : >> { %v2789_v12 = vadd.f32 %v2785_v6, %v2768_v22  ;;  %v2817_v15 = vmul.f32 %v3245_v55, %v4535_v60  ;;  %v2821_v16 = vrot.slane %v2815_v3, 6  ;;  %v2822_v17 = vrot.slane %v2816_v10, 6 }
 0x1c4   : >> { %v2834_v25 = vmul.f32 %v3246_v2, %v4528_v57  ;;  %v2802_v54 = vsel %vm1159_vm6, %v2800_v8, %v2801_v13  ;;  %v2804_v53 = vsel %vm1159_vm6, %v2801_v13, %v2803_v14  ;;  %v2835_v56 = vmul.f32 %v3246_v2, %v4538_v61 }
 0x1c5   : >> { %v2836_v58 = vmul.f32 %v3246_v2, %v4546_v5  ;;  %v2807_v18 = vadd.f32 %v2802_v54, %v2788_v11  ;;  %v2808_v24 = vadd.f32 %v2804_v53, %v2789_v12  ;;  %v2823_v59 = vsel %vm1200_vm7, %v2821_v16, %v2822_v17 }
 0x1c6   : >> { %v2824_v62 = vrot.slane %v2817_v15, 6  ;;  %v2840_v29 = vrot.slane %v2834_v25, 6  ;;  %v2841_v47 = vrot.slane %v2835_v56, 6 }
 0x1c7   : >> { %v2843_v60 = vrot.slane %v2836_v58, 6  ;;  %v2828_v20 = vadd.f32 %v2823_v59, %v2807_v18 }
 0x1c8   : >> { %v2825_v32 = vsel %vm1200_vm7, %v2822_v17, %v2824_v62  ;;  %v2842_v33 = vsel %vm1200_vm7, %v2840_v29, %v2841_v47 }
 0x1c9   : >> { %v2829_v57 = vadd.f32 %v2825_v32, %v2808_v24  ;;  %v2844_v63 = vsel %vm1200_vm7, %v2841_v47, %v2843_v60  ;;  %v2847_v61 = vadd.f32 %v2842_v33, %v2828_v20 }
 0x1cb   : >> { %v2848_v5 = vadd.f32 %v2844_v63, %v2829_v57  ;;  %v2855_v7 = vadd.f32 %v3332_v0, %v2847_v61 }
 0x1cd   : >> { %v2856_v1 = vadd.f32 %v3332_v0, %v2848_v5  ;;  %v3248_v9 = vmul.f32 -1.442695, %v2855_v7 }
 0x1cf   : >> { %v3249_v21 = vmul.f32 -1.442695, %v2856_v1  ;;  %3272 = vpow2.f32 %v3248_v9 }
 0x1d1   : >> { %3274 = vpow2.f32 %v3249_v21 }
 0x1d9   : >> { %v3273_v39 = vpop.eup %3272 }
 0x1da   : >> { %v2863_v23 = vadd.f32 1.0, %v3273_v39 }
 0x1db   : >> { %v3275_v40 = vpop.eup %3274 }
 0x1dc   : >> { %v2864_v43 = vadd.f32 1.0, %v3275_v40  ;;  %3276 = vrcp.f32 %v2863_v23 }
 0x1de   : >> { %3278 = vrcp.f32 %v2864_v43 }
 0x1e3   : > { %953 = sbr.rel (!%p951_p4) target bundleno = 229 (0xe5), region = 128 }
 0x1e6   : >> { %v3277_v44 = vpop.eup %3276 }
 0x1e7   : >> { %2871 = vst.msk [vmem:[%s2870_s24] sm:$0xff] %vm251_vm0, %v3277_v44 }
 0x1e8   : >> { %v3279_v45 = vpop.eup %3278 }
 0x1e9   : >> { %2872 = vst.msk [vmem:[%s2870_s24 + $0x8] sm:$0xff] %vm251_vm0, %v3279_v45 }
 0x1ea PF: > { %s14_s15 = sadd.s32 1, %s3290_s15  }
 0x1eb   : > { %p11_p5 = scmp.ge.s32.totalorder %s14_s15, 4  }
 0x1ed   :  { %13 = sbr.rel (!%p11_p5) target bundleno = 1 (0x1), region = 139 }

</bundles_post_ra>
